<compile_context>
chip_gen: v7x
topology: tpu7x:2x2x1
jax: 0.10.0
libtpu: 0.0.40
codegen_flags: <defaults>
</compile_context>

<pallas_src>
import functools

import jax
import jax.numpy as jnp
from jax import lax
from jax.experimental import pallas as pl
from jax.experimental.pallas import tpu as pltpu


# ---------------------------------------------------------------------------
# Fused kernel: maxpool(2x2) -> conv3x3+BN+ReLU -> conv3x3+BN+ReLU
# One grid step = one batch element x one tile of `th` pooled output rows.
# ---------------------------------------------------------------------------
def _down_fused_kernel(xb_ref, xt_ref, xd_ref, w1_ref, s1_ref, b1_ref,
                       w2_ref, s2_ref, b2_ref, o_ref, pbuf, mbuf, *, flat_out):
    # Block shapes:
    #   xb_ref : (th, 2, Wo, 2*Cin)   body raw rows (auto-pipelined)
    #   xt_ref : (2, 2, Wo, 2*Cin)    2-pooled-row halo above (clamped at border)
    #   xd_ref : (2, 2, Wo, 2*Cin)    2-pooled-row halo below (clamped at border)
    #   w1_ref : (9*Cin, Cmid)        conv1 weights, im2col layout (bf16)
    #   w2_ref : (9*Cmid, Cout)       conv2 weights, im2col layout (bf16)
    #   o_ref  : (th, Wo*Cout) if flat_out else (th, Wo, Cout)
    #   pbuf   : (th+4, Wo+2, Cin)    pooled rows + conv1 zero W-pad (scratch)
    #   mbuf   : (th+2, Wo+2, Cmid)   conv1 output + conv2 zero W-pad (scratch)
    th, _, Wo, _ = xb_ref.shape
    Cin = pbuf.shape[-1]
    Cmid = mbuf.shape[-1]
    Cout = w2_ref.shape[-1]
    R1 = th + 2
    cdt = pbuf.dtype

    i = pl.program_id(1)
    last = pl.num_programs(1) - 1
    has_top = i > 0
    has_bot = i < last

    def pool2x2(x4):
        # (R, 2, Wo, 2*Cin) -> (R, Wo, Cin); row pair = dim 1, col pair = lane halves.
        r = jnp.maximum(x4[:, 0, :, :], x4[:, 1, :, :])
        return jnp.maximum(r[:, :, :Cin], r[:, :, Cin:])

    body_p = pool2x2(xb_ref[...])
    top_p = pool2x2(xt_ref[...])
    bot_p = pool2x2(xd_ref[...])
    # Halo blocks at the image border are clamped fetches -> mask with zeros;
    # those zero rows double as conv1's H zero padding.
    top_p = jnp.where(has_top, top_p, jnp.zeros_like(top_p))
    bot_p = jnp.where(has_bot, bot_p, jnp.zeros_like(bot_p))

    # Pooled rows + one zero column each side (conv1's W padding).
    zcol_p = jnp.zeros((th + 4, 1, Cin), cdt)
    pbuf[:, 0:1, :] = zcol_p
    pbuf[:, Wo + 1:Wo + 2, :] = zcol_p
    pbuf[0:2, 1:Wo + 1, :] = top_p
    pbuf[2:th + 2, 1:Wo + 1, :] = body_p
    pbuf[th + 2:th + 4, 1:Wo + 1, :] = bot_p

    # ---- conv1: single im2col matmul, K = 9*Cin ------------------------------
    cols1 = [pbuf[kh:kh + R1, kw:kw + Wo, :].reshape(R1 * Wo, Cin)
             for kh in range(3) for kw in range(3)]
    patches1 = jnp.concatenate(cols1, axis=-1)                 # (R1*Wo, 9*Cin)
    acc1 = jnp.dot(patches1, w1_ref[...], preferred_element_type=jnp.float32)
    h1 = jnp.maximum(acc1 * s1_ref[...] + b1_ref[...], 0.0)    # f32 scale/bias/ReLU

    # conv1 result (bf16) + conv2's zero W padding; stays in VMEM.
    zcol_m = jnp.zeros((R1, 1, Cmid), cdt)
    mbuf[:, 0:1, :] = zcol_m
    mbuf[:, Wo + 1:Wo + 2, :] = zcol_m
    mbuf[:, 1:Wo + 1, :] = h1.astype(cdt).reshape(R1, Wo, Cmid)

    @pl.when(i == 0)          # top of the image: conv2 zero pad (conv1 row -1)
    def _():
        mbuf[0:1, :, :] = jnp.zeros((1, Wo + 2, Cmid), cdt)

    @pl.when(i == last)       # bottom of the image: conv2 zero pad (conv1 row Ho)
    def _():
        mbuf[th + 1:th + 2, :, :] = jnp.zeros((1, Wo + 2, Cmid), cdt)

    # ---- conv2: single im2col matmul, K = 9*Cmid -----------------------------
    cols2 = [mbuf[kh:kh + th, kw:kw + Wo, :].reshape(th * Wo, Cmid)
             for kh in range(3) for kw in range(3)]
    patches2 = jnp.concatenate(cols2, axis=-1)                  # (th*Wo, 9*Cmid)
    acc2 = jnp.dot(patches2, w2_ref[...], preferred_element_type=jnp.float32)
    h2 = jnp.maximum(acc2 * s2_ref[...] + b2_ref[...], 0.0)

    if flat_out:
        # Lane-dense store: full-extent (Wo*Cout) last dim -> unmasked vst.
        o_ref[...] = h2.reshape(th, Wo * Cout).astype(o_ref.dtype)
    else:
        o_ref[...] = h2.reshape(th, Wo, Cout).astype(o_ref.dtype)


# ---------------------------------------------------------------------------
# VMEM budgeting / tile selection (generation-aware)
# ---------------------------------------------------------------------------
def _vmem_limit_bytes():
    """Scoped-VMEM limit for this kernel (v5e/v6e: 128 MiB phys, v7x: 64 MiB)."""
    cap = 64 * 1024 * 1024
    try:
        cap = int(getattr(pltpu.get_tpu_info(), "vmem_capacity_bytes", cap)) or cap
    except Exception:
        pass
    return int(min(cap // 2, 40 * 1024 * 1024))


def _pick_tile_h(Ho, Wo, cin, cmid, cout, vmem_limit_bytes):
    """Largest pooled-row tile whose footprint (double-buffered blocks, resident
    weights, scratches, im2col temporaries) fits the scoped-VMEM limit."""
    budget = vmem_limit_bytes - (2 << 20)                # headroom for compiler scratch
    bfb, f32b = 2, 4
    wbytes = 2 * bfb * 9 * (cin * cmid + cmid * cout)    # resident weights (x2 buffers)

    def cost(th):
        r1 = th + 2
        xin = 2 * (th + 4) * 2 * Wo * 2 * cin * bfb      # body + halo blocks, x2 buffers
        outb = 2 * th * Wo * cout * f32b                 # output block, x2 buffers
        pb = (th + 4) * (Wo + 2) * cin * bfb
        mb = r1 * (Wo + 2) * cmid * bfb
        tmp1 = r1 * Wo * (9 * cin * bfb + cmid * f32b)   # im2col1 + acc1
        tmp2 = th * Wo * (9 * cmid * bfb + cout * f32b)  # im2col2 + acc2
        return wbytes + xin + outb + pb + mb + tmp1 + tmp2

    divisors = [d for d in range(1, Ho + 1)
                if Ho % d == 0 and (d % 2 == 0 or d == Ho)]
    fitting = [d for d in divisors if cost(d) <= budget]
    if not fitting:
        # TODO(synk): tile Cout / K on extra grid axes for very large channel
        # counts where the weights alone exceed the budget (v7x 64 MiB VMEM).
        return min(divisors)
    best = max(fitting)
    flat = [d for d in fitting if d % 8 == 0 or d == Ho]
    if flat and 2 * max(flat) >= best:
        return max(flat)     # prefer a tile that enables the lane-dense output store
    return best


# ---------------------------------------------------------------------------
# pallas_call wrapper
# ---------------------------------------------------------------------------
def _call_down_kernel(x_flat, w1r, s1, b1, w2r, s2, b2, *, N, Ho, Wo, Cin, Cmid,
                      Cout, th, n_t, flat_out, vmem_limit):
    cdt = x_flat.dtype
    half = max(th // 2, 1)           # th is even whenever n_t > 1
    hho = Ho // 2
    hrows = max((N * Ho) // 2, 1)

    in_specs = [
        # body rows of this tile
        pl.BlockSpec((th, 2, Wo, 2 * Cin), lambda n, i: (n * n_t + i, 0, 0, 0)),
        # 2-pooled-row halo above (clamped; masked to zero at the image top)
        pl.BlockSpec((2, 2, Wo, 2 * Cin),
                     lambda n, i: (jnp.clip(n * hho + i * half - 1, 0, hrows - 1),
                                   0, 0, 0)),
        # 2-pooled-row halo below (clamped; masked to zero at the image bottom)
        pl.BlockSpec((2, 2, Wo, 2 * Cin),
                     lambda n, i: (jnp.clip(n * hho + (i + 1) * half, 0, hrows - 1),
                                   0, 0, 0)),
        # resident weights / folded BN scale+bias
        pl.BlockSpec((9 * Cin, Cmid), lambda n, i: (0, 0)),
        pl.BlockSpec((1, Cmid), lambda n, i: (0, 0)),
        pl.BlockSpec((1, Cmid), lambda n, i: (0, 0)),
        pl.BlockSpec((9 * Cmid, Cout), lambda n, i: (0, 0)),
        pl.BlockSpec((1, Cout), lambda n, i: (0, 0)),
        pl.BlockSpec((1, Cout), lambda n, i: (0, 0)),
    ]
    if flat_out:
        out_shape = jax.ShapeDtypeStruct((N, Ho, Wo * Cout), jnp.float32)
        out_spec = pl.BlockSpec((None, th, Wo * Cout), lambda n, i: (n, i, 0))
    else:
        out_shape = jax.ShapeDtypeStruct((N, Ho, Wo, Cout), jnp.float32)
        out_spec = pl.BlockSpec((None, th, Wo, Cout), lambda n, i: (n, i, 0, 0))

    flops = 2 * N * Ho * Wo * 9 * (Cin * Cmid + Cmid * Cout)
    bytes_accessed = (x_flat.size * 2 + w1r.size * 2 + w2r.size * 2
                      + (s1.size + b1.size + s2.size + b2.size) * 4
                      + N * Ho * Wo * Cout * 4)

    kernel = functools.partial(_down_fused_kernel, flat_out=flat_out)
    return pl.pallas_call(
        kernel,
        out_shape=out_shape,
        # Both grid axes are independent -> "parallel" (megacore / multi-TC
        # sharding on v7x); N * n_t is usually even.
        grid=(N, n_t),
        in_specs=in_specs,
        out_specs=out_spec,
        scratch_shapes=[
            pltpu.VMEM((th + 4, Wo + 2, Cin), cdt),     # pooled rows (+ conv1 pad)
            pltpu.VMEM((th + 2, Wo + 2, Cmid), cdt),    # conv1 output (+ conv2 pad)
        ],
        compiler_params=pltpu.CompilerParams(
            dimension_semantics=("parallel", "parallel"),
            vmem_limit_bytes=int(vmem_limit)),
        cost_estimate=pl.CostEstimate(flops=int(flops), transcendentals=0,
                                      bytes_accessed=int(bytes_accessed)),
    )(x_flat, x_flat, x_flat, w1r, s1, b1, w2r, s2, b2)


def down_forward_nhwc(x, params, tile_h=None):
    """Down(x) on an NHWC activation (transpose-free core)."""
    N, H, W, Cin = x.shape
    assert H % 2 == 0 and W % 2 == 0, "MaxPool2d(2): even H and W required"
    Ho, Wo = H // 2, W // 2
    assert N * Ho >= 2, "need at least two pooled rows in total"

    w1, w2 = params["w1"], params["w2"]                  # HWIO
    Cmid, Cout = w1.shape[-1], w2.shape[-1]

    vmem_limit = _vmem_limit_bytes()
    th = tile_h if tile_h is not None else _pick_tile_h(Ho, Wo, Cin, Cmid, Cout,
                                                        vmem_limit)
    assert Ho % th == 0 and (th % 2 == 0 or th == Ho), f"bad tile_h={th} (Ho={Ho})"
    n_t = Ho // th
    flat_out = (th % 8 == 0) or (th == Ho)

    cdt = jnp.bfloat16                                   # storage / MXU-input dtype
    # Metadata-only reshape: expose the 2x2 pool window as (row pair, lane halves).
    x_flat = x.astype(cdt).reshape(N * Ho, 2, Wo, 2 * Cin)
    w1r = w1.astype(cdt).reshape(9 * Cin, Cmid)          # im2col weight layout
    w2r = w2.astype(cdt).reshape(9 * Cmid, Cout)
    s1 = params["scale1"].reshape(1, Cmid).astype(jnp.float32)
    b1 = params["bias1"].reshape(1, Cmid).astype(jnp.float32)
    s2 = params["scale2"].reshape(1, Cout).astype(jnp.float32)
    b2 = params["bias2"].reshape(1, Cout).astype(jnp.float32)

    def run(flat):
        return _call_down_kernel(x_flat, w1r, s1, b1, w2r, s2, b2,
                                 N=N, Ho=Ho, Wo=Wo, Cin=Cin, Cmid=Cmid, Cout=Cout,
                                 th=th, n_t=n_t, flat_out=flat,
                                 vmem_limit=vmem_limit)

    if flat_out:
        try:
            out = jax.block_until_ready(run(True)).reshape(N, Ho, Wo, Cout)
        except Exception:
            # Flattened (lane-dense) output store failed to lower on this
            # backend -> fall back to the channel-minor output block.
            out = run(False)
    else:
        out = run(False)
    return out


def down_forward(x_nchw, params, tile_h=None):
    """Down(x): NCHW in, NCHW out (PyTorch semantics)."""
    x = jnp.transpose(x_nchw, (0, 2, 3, 1)).astype(jnp.float32)    # NCHW -> NHWC
    out = down_forward_nhwc(x, params, tile_h)
    return jnp.transpose(out, (0, 3, 1, 2))                        # NHWC -> NCHW


# ---------------------------------------------------------------------------
# Pure-JAX reference (eval-mode BN)
# ---------------------------------------------------------------------------
def _ref_conv_bn_relu(x, w, conv_b, bn, eps):
    gamma, beta, mean, var = bn
    y = lax.conv_general_dilated(
        x, w, window_strides=(1, 1), padding=((1, 1), (1, 1)),
        dimension_numbers=("NHWC", "HWIO", "NHWC"))
    y = y + conv_b
    y = (y - mean) / jnp.sqrt(var + eps) * gamma + beta
    return jnp.maximum(y, 0.0)


def _ref_down(x_nchw, w1, b1, bn1, w2, b2, bn2, eps):
    x = jnp.transpose(x_nchw, (0, 2, 3, 1))
    N, H, W, C = x.shape
    x = x.reshape(N, H // 2, 2, W // 2, 2, C).max(axis=(2, 4))     # maxpool 2x2
    x = _ref_conv_bn_relu(x, w1, b1, bn1, eps)
    x = _ref_conv_bn_relu(x, w2, b2, bn2, eps)
    return jnp.transpose(x, (0, 3, 1, 2))


if __name__ == "__main__":
    key = jax.random.PRNGKey(0)
    eps = 1e-5
    N, Cin, H, W = 2, 4, 16, 16
    Cout = 8                      # in Down, mid_channels == out_channels

    ks = jax.random.split(key, 16)
    x = jax.random.normal(ks[0], (N, Cin, H, W), dtype=jnp.float32)
    # Conv weights in HWIO layout (transposed PyTorch OIHW).
    w1 = jax.random.normal(ks[1], (3, 3, Cin, Cout), jnp.float32) * 0.1
    b1 = jax.random.normal(ks[2], (Cout,), jnp.float32) * 0.1
    w2 = jax.random.normal(ks[3], (3, 3, Cout, Cout), jnp.float32) * 0.1
    b2 = jax.random.normal(ks[4], (Cout,), jnp.float32) * 0.1
    # Non-identity eval-mode BatchNorm stats (exercises the scale/bias fold).
    g1 = 0.5 + jax.random.uniform(ks[5], (Cout,), dtype=jnp.float32)
    be1 = jax.random.normal(ks[6], (Cout,), jnp.float32) * 0.1
    mu1 = jax.random.normal(ks[7], (Cout,), jnp.float32) * 0.1
    v1 = 0.5 + jax.random.uniform(ks[8], (Cout,), dtype=jnp.float32)
    g2 = 0.5 + jax.random.uniform(ks[9], (Cout,), dtype=jnp.float32)
    be2 = jax.random.normal(ks[10], (Cout,), jnp.float32) * 0.1
    mu2 = jax.random.normal(ks[11], (Cout,), jnp.float32) * 0.1
    v2 = 0.5 + jax.random.uniform(ks[12], (Cout,), dtype=jnp.float32)

    scale1 = g1 / jnp.sqrt(v1 + eps)
    bias1 = be1 + (b1 - mu1) * scale1
    scale2 = g2 / jnp.sqrt(v2 + eps)
    bias2 = be2 + (b2 - mu2) * scale2
    params = dict(w1=w1, scale1=scale1, bias1=bias1,
                  w2=w2, scale2=scale2, bias2=bias2)

    # Default path (whole pooled image per step at this tiny size).
    ref = _ref_down(x, w1, b1, (g1, be1, mu1, v1), w2, b2, (g2, be2, mu2, v2), eps)
    out = jax.block_until_ready(down_forward(x, params))
    assert out.shape == (N, Cout, H // 2, W // 2), out.shape
    err = float(jnp.max(jnp.abs(out - ref)))
    assert err < 5e-2, f"default path mismatch: max|err|={err}"

    # Larger image: forced multi-tile runs exercise the halo blocks, the
    # lane-dense (flattened) output path, and the channel-minor fallback path.
    x2 = jax.random.normal(ks[13], (N, Cin, 32, 32), dtype=jnp.float32)
    ref2 = _ref_down(x2, w1, b1, (g1, be1, mu1, v1), w2, b2, (g2, be2, mu2, v2), eps)
    out2 = jax.block_until_ready(down_forward(x2, params, tile_h=8))
    err2 = float(jnp.max(jnp.abs(out2 - ref2)))
    assert err2 < 5e-2, f"tiled (halo, flat-out) path mismatch: max|err|={err2}"
    out3 = jax.block_until_ready(down_forward(x2, params, tile_h=2))
    err3 = float(jnp.max(jnp.abs(out3 - ref2)))
    assert err3 < 5e-2, f"tiled (halo, fallback-out) path mismatch: max|err|={err3}"

    print("KERNEL_OK")
</pallas_src>

<mosaic_0001>
module attributes {stable_mosaic.version = 11 : i64} {
  func.func @_down_fused_kernel(%arg0: i32, %arg1: i32, %arg2: memref<8x2x8x8xbf16, #tpu.memory_space<vmem>>, %arg3: memref<2x2x8x8xbf16, #tpu.memory_space<vmem>>, %arg4: memref<2x2x8x8xbf16, #tpu.memory_space<vmem>>, %arg5: memref<36x8xbf16, #tpu.memory_space<vmem>>, %arg6: memref<1x8xf32, #tpu.memory_space<vmem>>, %arg7: memref<1x8xf32, #tpu.memory_space<vmem>>, %arg8: memref<72x8xbf16, #tpu.memory_space<vmem>>, %arg9: memref<1x8xf32, #tpu.memory_space<vmem>>, %arg10: memref<1x8xf32, #tpu.memory_space<vmem>>, %arg11: memref<1x8x64xf32, #tpu.memory_space<vmem>>, %arg12: memref<12x10x4xbf16, #tpu.memory_space<vmem>>, %arg13: memref<10x10x8xbf16, #tpu.memory_space<vmem>>) attributes {dimension_semantics = [#tpu.dimension_semantics<parallel>, #tpu.dimension_semantics<parallel>], iteration_bounds = array<i64: 2, 1>, scalar_prefetch = 0 : i64, scratch_operands = 2 : i64, tpu.core_type = #tpu.core_type<tc>, window_params = [{transform_indices = @transform_0, window_bounds = array<i64: 8, 2, 8, 8>}, {transform_indices = @transform_1, window_bounds = array<i64: 2, 2, 8, 8>}, {transform_indices = @transform_2, window_bounds = array<i64: 2, 2, 8, 8>}, {pipeline_mode = #tpu.pipeline_mode<synchronous>, transform_indices = @transform_3, window_bounds = array<i64: 36, 8>}, {pipeline_mode = #tpu.pipeline_mode<synchronous>, transform_indices = @transform_4, window_bounds = array<i64: 1, 8>}, {pipeline_mode = #tpu.pipeline_mode<synchronous>, transform_indices = @transform_5, window_bounds = array<i64: 1, 8>}, {pipeline_mode = #tpu.pipeline_mode<synchronous>, transform_indices = @transform_6, window_bounds = array<i64: 72, 8>}, {pipeline_mode = #tpu.pipeline_mode<synchronous>, transform_indices = @transform_7, window_bounds = array<i64: 1, 8>}, {pipeline_mode = #tpu.pipeline_mode<synchronous>, transform_indices = @transform_8, window_bounds = array<i64: 1, 8>}, {transform_indices = @transform_9, window_bounds = array<i64: 1, 8, 64>}]} {
    %c0_i32 = arith.constant 0 : i32
    %0 = arith.cmpi sgt, %arg1, %c0_i32 : i32
    %c0_i32_0 = arith.constant 0 : i32
    %1 = arith.cmpi slt, %arg1, %c0_i32_0 : i32
    %c0 = arith.constant 0 : index
    %c0_1 = arith.constant 0 : index
    %c0_2 = arith.constant 0 : index
    %c0_3 = arith.constant 0 : index
    %2 = vector.load %arg2[%c0, %c0_1, %c0_2, %c0_3] : memref<8x2x8x8xbf16, #tpu.memory_space<vmem>>, vector<8x2x8x8xbf16>
    %3 = vector.extract_strided_slice %2 {offsets = [0, 0, 0, 0], sizes = [8, 1, 8, 8], strides = [1, 1, 1, 1]} : vector<8x2x8x8xbf16> to vector<8x1x8x8xbf16>
    %4 = vector.shape_cast %3 : vector<8x1x8x8xbf16> to vector<8x8x8xbf16>
    %5 = vector.extract_strided_slice %2 {offsets = [0, 1, 0, 0], sizes = [8, 1, 8, 8], strides = [1, 1, 1, 1]} : vector<8x2x8x8xbf16> to vector<8x1x8x8xbf16>
    %6 = vector.shape_cast %5 : vector<8x1x8x8xbf16> to vector<8x8x8xbf16>
    %7 = arith.maximumf %4, %6 : vector<8x8x8xbf16>
    %8 = vector.extract_strided_slice %7 {offsets = [0, 0, 0], sizes = [8, 8, 4], strides = [1, 1, 1]} : vector<8x8x8xbf16> to vector<8x8x4xbf16>
    %9 = vector.extract_strided_slice %7 {offsets = [0, 0, 4], sizes = [8, 8, 4], strides = [1, 1, 1]} : vector<8x8x8xbf16> to vector<8x8x4xbf16>
    %10 = arith.maximumf %8, %9 : vector<8x8x4xbf16>
    %c0_4 = arith.constant 0 : index
    %c0_5 = arith.constant 0 : index
    %c0_6 = arith.constant 0 : index
    %c0_7 = arith.constant 0 : index
    %11 = vector.load %arg3[%c0_4, %c0_5, %c0_6, %c0_7] : memref<2x2x8x8xbf16, #tpu.memory_space<vmem>>, vector<2x2x8x8xbf16>
    %12 = vector.extract_strided_slice %11 {offsets = [0, 0, 0, 0], sizes = [2, 1, 8, 8], strides = [1, 1, 1, 1]} : vector<2x2x8x8xbf16> to vector<2x1x8x8xbf16>
    %13 = vector.shape_cast %12 : vector<2x1x8x8xbf16> to vector<2x8x8xbf16>
    %14 = vector.extract_strided_slice %11 {offsets = [0, 1, 0, 0], sizes = [2, 1, 8, 8], strides = [1, 1, 1, 1]} : vector<2x2x8x8xbf16> to vector<2x1x8x8xbf16>
    %15 = vector.shape_cast %14 : vector<2x1x8x8xbf16> to vector<2x8x8xbf16>
    %16 = arith.maximumf %13, %15 : vector<2x8x8xbf16>
    %17 = vector.extract_strided_slice %16 {offsets = [0, 0, 0], sizes = [2, 8, 4], strides = [1, 1, 1]} : vector<2x8x8xbf16> to vector<2x8x4xbf16>
    %18 = vector.extract_strided_slice %16 {offsets = [0, 0, 4], sizes = [2, 8, 4], strides = [1, 1, 1]} : vector<2x8x8xbf16> to vector<2x8x4xbf16>
    %19 = arith.maximumf %17, %18 : vector<2x8x4xbf16>
    %c0_8 = arith.constant 0 : index
    %c0_9 = arith.constant 0 : index
    %c0_10 = arith.constant 0 : index
    %c0_11 = arith.constant 0 : index
    %20 = vector.load %arg4[%c0_8, %c0_9, %c0_10, %c0_11] : memref<2x2x8x8xbf16, #tpu.memory_space<vmem>>, vector<2x2x8x8xbf16>
    %21 = vector.extract_strided_slice %20 {offsets = [0, 0, 0, 0], sizes = [2, 1, 8, 8], strides = [1, 1, 1, 1]} : vector<2x2x8x8xbf16> to vector<2x1x8x8xbf16>
    %22 = vector.shape_cast %21 : vector<2x1x8x8xbf16> to vector<2x8x8xbf16>
    %23 = vector.extract_strided_slice %20 {offsets = [0, 1, 0, 0], sizes = [2, 1, 8, 8], strides = [1, 1, 1, 1]} : vector<2x2x8x8xbf16> to vector<2x1x8x8xbf16>
    %24 = vector.shape_cast %23 : vector<2x1x8x8xbf16> to vector<2x8x8xbf16>
    %25 = arith.maximumf %22, %24 : vector<2x8x8xbf16>
    %26 = vector.extract_strided_slice %25 {offsets = [0, 0, 0], sizes = [2, 8, 4], strides = [1, 1, 1]} : vector<2x8x8xbf16> to vector<2x8x4xbf16>
    %27 = vector.extract_strided_slice %25 {offsets = [0, 0, 4], sizes = [2, 8, 4], strides = [1, 1, 1]} : vector<2x8x8xbf16> to vector<2x8x4xbf16>
    %28 = arith.maximumf %26, %27 : vector<2x8x4xbf16>
    %cst = arith.constant 0.000000e+00 : bf16
    %29 = vector.broadcast %cst : bf16 to vector<2x8x4xbf16>
    %30 = arith.select %0, %19, %29 : vector<2x8x4xbf16>
    %cst_12 = arith.constant 0.000000e+00 : bf16
    %31 = vector.broadcast %cst_12 : bf16 to vector<2x8x4xbf16>
    %32 = arith.select %1, %28, %31 : vector<2x8x4xbf16>
    %cst_13 = arith.constant 0.000000e+00 : bf16
    %33 = vector.broadcast %cst_13 : bf16 to vector<12x1x4xbf16>
    %c0_14 = arith.constant 0 : index
    %c0_15 = arith.constant 0 : index
    %c0_16 = arith.constant 0 : index
    %34 = vector.load %arg12[%c0_14, %c0_15, %c0_16] : memref<12x10x4xbf16, #tpu.memory_space<vmem>>, vector<12x1x4xbf16>
    tpu.vector_store %arg12[%c0_14, %c0_15, %c0_16], %33 {strides = array<i32>} : memref<12x10x4xbf16, #tpu.memory_space<vmem>>, vector<12x1x4xbf16>,
    %c0_17 = arith.constant 0 : index
    %c9 = arith.constant 9 : index
    %c0_18 = arith.constant 0 : index
    %35 = vector.load %arg12[%c0_17, %c9, %c0_18] : memref<12x10x4xbf16, #tpu.memory_space<vmem>>, vector<12x1x4xbf16>
    tpu.vector_store %arg12[%c0_17, %c9, %c0_18], %33 {strides = array<i32>} : memref<12x10x4xbf16, #tpu.memory_space<vmem>>, vector<12x1x4xbf16>,
    %c0_19 = arith.constant 0 : index
    %c1 = arith.constant 1 : index
    %c0_20 = arith.constant 0 : index
    %36 = vector.load %arg12[%c0_19, %c1, %c0_20] : memref<12x10x4xbf16, #tpu.memory_space<vmem>>, vector<2x8x4xbf16>
    tpu.vector_store %arg12[%c0_19, %c1, %c0_20], %30 {strides = array<i32>} : memref<12x10x4xbf16, #tpu.memory_space<vmem>>, vector<2x8x4xbf16>,
    %c2 = arith.constant 2 : index
    %c1_21 = arith.constant 1 : index
    %c0_22 = arith.constant 0 : index
    %37 = vector.load %arg12[%c2, %c1_21, %c0_22] : memref<12x10x4xbf16, #tpu.memory_space<vmem>>, vector<8x8x4xbf16>
    tpu.vector_store %arg12[%c2, %c1_21, %c0_22], %10 {strides = array<i32>} : memref<12x10x4xbf16, #tpu.memory_space<vmem>>, vector<8x8x4xbf16>,
    %c10 = arith.constant 10 : index
    %c1_23 = arith.constant 1 : index
    %c0_24 = arith.constant 0 : index
    %38 = vector.load %arg12[%c10, %c1_23, %c0_24] : memref<12x10x4xbf16, #tpu.memory_space<vmem>>, vector<2x8x4xbf16>
    tpu.vector_store %arg12[%c10, %c1_23, %c0_24], %32 {strides = array<i32>} : memref<12x10x4xbf16, #tpu.memory_space<vmem>>, vector<2x8x4xbf16>,
    %c0_25 = arith.constant 0 : index
    %c0_26 = arith.constant 0 : index
    %c0_27 = arith.constant 0 : index
    %39 = vector.load %arg12[%c0_25, %c0_26, %c0_27] : memref<12x10x4xbf16, #tpu.memory_space<vmem>>, vector<10x8x4xbf16>
    %40 = vector.shape_cast %39 : vector<10x8x4xbf16> to vector<80x4xbf16>
    %c0_28 = arith.constant 0 : index
    %c1_29 = arith.constant 1 : index
    %c0_30 = arith.constant 0 : index
    %41 = vector.load %arg12[%c0_28, %c1_29, %c0_30] : memref<12x10x4xbf16, #tpu.memory_space<vmem>>, vector<10x8x4xbf16>
    %42 = vector.shape_cast %41 : vector<10x8x4xbf16> to vector<80x4xbf16>
    %c0_31 = arith.constant 0 : index
    %c2_32 = arith.constant 2 : index
    %c0_33 = arith.constant 0 : index
    %43 = vector.load %arg12[%c0_31, %c2_32, %c0_33] : memref<12x10x4xbf16, #tpu.memory_space<vmem>>, vector<10x8x4xbf16>
    %44 = vector.shape_cast %43 : vector<10x8x4xbf16> to vector<80x4xbf16>
    %c1_34 = arith.constant 1 : index
    %c0_35 = arith.constant 0 : index
    %c0_36 = arith.constant 0 : index
    %45 = vector.load %arg12[%c1_34, %c0_35, %c0_36] : memref<12x10x4xbf16, #tpu.memory_space<vmem>>, vector<10x8x4xbf16>
    %46 = vector.shape_cast %45 : vector<10x8x4xbf16> to vector<80x4xbf16>
    %c1_37 = arith.constant 1 : index
    %c1_38 = arith.constant 1 : index
    %c0_39 = arith.constant 0 : index
    %47 = vector.load %arg12[%c1_37, %c1_38, %c0_39] : memref<12x10x4xbf16, #tpu.memory_space<vmem>>, vector<10x8x4xbf16>
    %48 = vector.shape_cast %47 : vector<10x8x4xbf16> to vector<80x4xbf16>
    %c1_40 = arith.constant 1 : index
    %c2_41 = arith.constant 2 : index
    %c0_42 = arith.constant 0 : index
    %49 = vector.load %arg12[%c1_40, %c2_41, %c0_42] : memref<12x10x4xbf16, #tpu.memory_space<vmem>>, vector<10x8x4xbf16>
    %50 = vector.shape_cast %49 : vector<10x8x4xbf16> to vector<80x4xbf16>
    %c2_43 = arith.constant 2 : index
    %c0_44 = arith.constant 0 : index
    %c0_45 = arith.constant 0 : index
    %51 = vector.load %arg12[%c2_43, %c0_44, %c0_45] : memref<12x10x4xbf16, #tpu.memory_space<vmem>>, vector<10x8x4xbf16>
    %52 = vector.shape_cast %51 : vector<10x8x4xbf16> to vector<80x4xbf16>
    %c2_46 = arith.constant 2 : index
    %c1_47 = arith.constant 1 : index
    %c0_48 = arith.constant 0 : index
    %53 = vector.load %arg12[%c2_46, %c1_47, %c0_48] : memref<12x10x4xbf16, #tpu.memory_space<vmem>>, vector<10x8x4xbf16>
    %54 = vector.shape_cast %53 : vector<10x8x4xbf16> to vector<80x4xbf16>
    %c2_49 = arith.constant 2 : index
    %c2_50 = arith.constant 2 : index
    %c0_51 = arith.constant 0 : index
    %55 = vector.load %arg12[%c2_49, %c2_50, %c0_51] : memref<12x10x4xbf16, #tpu.memory_space<vmem>>, vector<10x8x4xbf16>
    %56 = vector.shape_cast %55 : vector<10x8x4xbf16> to vector<80x4xbf16>
    %57 = tpu.concatenate %40, %42, %44, %46, %48, %50, %52, %54, %56 in 1 : vector<80x4xbf16>, vector<80x4xbf16>, vector<80x4xbf16>, vector<80x4xbf16>, vector<80x4xbf16>, vector<80x4xbf16>, vector<80x4xbf16>, vector<80x4xbf16>, vector<80x4xbf16> -> vector<80x36xbf16>
    %c0_52 = arith.constant 0 : index
    %c0_53 = arith.constant 0 : index
    %58 = vector.load %arg5[%c0_52, %c0_53] : memref<36x8xbf16, #tpu.memory_space<vmem>>, vector<36x8xbf16>
    %cst_54 = arith.constant dense<0.000000e+00> : vector<80x8xf32>
    %59 = tpu.matmul %57, %58, %cst_54 {dimension_numbers = #tpu.dot_dimension_numbers<[1], [0], [0], [1], [0, 0, 1, 1], [], []>} : vector<80x36xbf16>, vector<36x8xbf16>, vector<80x8xf32> -> vector<80x8xf32>
    %c0_55 = arith.constant 0 : index
    %c0_56 = arith.constant 0 : index
    %60 = vector.load %arg6[%c0_55, %c0_56] : memref<1x8xf32, #tpu.memory_space<vmem>>, vector<1x8xf32>
    %61 = vector.broadcast %60 : vector<1x8xf32> to vector<80x8xf32>
    %62 = arith.mulf %59, %61 : vector<80x8xf32>
    %c0_57 = arith.constant 0 : index
    %c0_58 = arith.constant 0 : index
    %63 = vector.load %arg7[%c0_57, %c0_58] : memref<1x8xf32, #tpu.memory_space<vmem>>, vector<1x8xf32>
    %64 = vector.broadcast %63 : vector<1x8xf32> to vector<80x8xf32>
    %65 = arith.addf %62, %64 : vector<80x8xf32>
    %cst_59 = arith.constant 0.000000e+00 : f32
    %66 = vector.broadcast %cst_59 : f32 to vector<80x8xf32>
    %67 = arith.maximumf %65, %66 : vector<80x8xf32>
    %cst_60 = arith.constant 0.000000e+00 : bf16
    %68 = vector.broadcast %cst_60 : bf16 to vector<10x1x8xbf16>
    %c0_61 = arith.constant 0 : index
    %c0_62 = arith.constant 0 : index
    %c0_63 = arith.constant 0 : index
    %69 = vector.load %arg13[%c0_61, %c0_62, %c0_63] : memref<10x10x8xbf16, #tpu.memory_space<vmem>>, vector<10x1x8xbf16>
    tpu.vector_store %arg13[%c0_61, %c0_62, %c0_63], %68 {strides = array<i32>} : memref<10x10x8xbf16, #tpu.memory_space<vmem>>, vector<10x1x8xbf16>,
    %c0_64 = arith.constant 0 : index
    %c9_65 = arith.constant 9 : index
    %c0_66 = arith.constant 0 : index
    %70 = vector.load %arg13[%c0_64, %c9_65, %c0_66] : memref<10x10x8xbf16, #tpu.memory_space<vmem>>, vector<10x1x8xbf16>
    tpu.vector_store %arg13[%c0_64, %c9_65, %c0_66], %68 {strides = array<i32>} : memref<10x10x8xbf16, #tpu.memory_space<vmem>>, vector<10x1x8xbf16>,
    %71 = arith.truncf %67 : vector<80x8xf32> to vector<80x8xbf16>
    %72 = vector.shape_cast %71 : vector<80x8xbf16> to vector<10x8x8xbf16>
    %c0_67 = arith.constant 0 : index
    %c1_68 = arith.constant 1 : index
    %c0_69 = arith.constant 0 : index
    %73 = vector.load %arg13[%c0_67, %c1_68, %c0_69] : memref<10x10x8xbf16, #tpu.memory_space<vmem>>, vector<10x8x8xbf16>
    tpu.vector_store %arg13[%c0_67, %c1_68, %c0_69], %72 {strides = array<i32>} : memref<10x10x8xbf16, #tpu.memory_space<vmem>>, vector<10x8x8xbf16>,
    %c0_i32_70 = arith.constant 0 : i32
    %74 = arith.cmpi eq, %arg1, %c0_i32_70 : i32
    %75 = arith.extui %74 : i1 to i32
    %c0_i32_71 = arith.constant 0 : i32
    %76 = arith.cmpi ne, %75, %c0_i32_71 : i32
    scf.if %76 {
      %cst_112 = arith.constant 0.000000e+00 : bf16
      %113 = vector.broadcast %cst_112 : bf16 to vector<1x10x8xbf16>
      %c0_113 = arith.constant 0 : index
      %c0_114 = arith.constant 0 : index
      %c0_115 = arith.constant 0 : index
      %114 = vector.load %arg13[%c0_113, %c0_114, %c0_115] : memref<10x10x8xbf16, #tpu.memory_space<vmem>>, vector<1x10x8xbf16>
      tpu.vector_store %arg13[%c0_113, %c0_114, %c0_115], %113 {strides = array<i32>} : memref<10x10x8xbf16, #tpu.memory_space<vmem>>, vector<1x10x8xbf16>,
    } else {
    }
    %c0_i32_72 = arith.constant 0 : i32
    %77 = arith.cmpi eq, %arg1, %c0_i32_72 : i32
    %78 = arith.extui %77 : i1 to i32
    %c0_i32_73 = arith.constant 0 : i32
    %79 = arith.cmpi ne, %78, %c0_i32_73 : i32
    scf.if %79 {
      %cst_112 = arith.constant 0.000000e+00 : bf16
      %113 = vector.broadcast %cst_112 : bf16 to vector<1x10x8xbf16>
      %c9_113 = arith.constant 9 : index
      %c0_114 = arith.constant 0 : index
      %c0_115 = arith.constant 0 : index
      %114 = vector.load %arg13[%c9_113, %c0_114, %c0_115] : memref<10x10x8xbf16, #tpu.memory_space<vmem>>, vector<1x10x8xbf16>
      tpu.vector_store %arg13[%c9_113, %c0_114, %c0_115], %113 {strides = array<i32>} : memref<10x10x8xbf16, #tpu.memory_space<vmem>>, vector<1x10x8xbf16>,
    } else {
    }
    %c0_74 = arith.constant 0 : index
    %c0_75 = arith.constant 0 : index
    %c0_76 = arith.constant 0 : index
    %80 = vector.load %arg13[%c0_74, %c0_75, %c0_76] : memref<10x10x8xbf16, #tpu.memory_space<vmem>>, vector<8x8x8xbf16>
    %81 = vector.shape_cast %80 : vector<8x8x8xbf16> to vector<64x8xbf16>
    %c0_77 = arith.constant 0 : index
    %c1_78 = arith.constant 1 : index
    %c0_79 = arith.constant 0 : index
    %82 = vector.load %arg13[%c0_77, %c1_78, %c0_79] : memref<10x10x8xbf16, #tpu.memory_space<vmem>>, vector<8x8x8xbf16>
    %83 = vector.shape_cast %82 : vector<8x8x8xbf16> to vector<64x8xbf16>
    %c0_80 = arith.constant 0 : index
    %c2_81 = arith.constant 2 : index
    %c0_82 = arith.constant 0 : index
    %84 = vector.load %arg13[%c0_80, %c2_81, %c0_82] : memref<10x10x8xbf16, #tpu.memory_space<vmem>>, vector<8x8x8xbf16>
    %85 = vector.shape_cast %84 : vector<8x8x8xbf16> to vector<64x8xbf16>
    %c1_83 = arith.constant 1 : index
    %c0_84 = arith.constant 0 : index
    %c0_85 = arith.constant 0 : index
    %86 = vector.load %arg13[%c1_83, %c0_84, %c0_85] : memref<10x10x8xbf16, #tpu.memory_space<vmem>>, vector<8x8x8xbf16>
    %87 = vector.shape_cast %86 : vector<8x8x8xbf16> to vector<64x8xbf16>
    %c1_86 = arith.constant 1 : index
    %c1_87 = arith.constant 1 : index
    %c0_88 = arith.constant 0 : index
    %88 = vector.load %arg13[%c1_86, %c1_87, %c0_88] : memref<10x10x8xbf16, #tpu.memory_space<vmem>>, vector<8x8x8xbf16>
    %89 = vector.shape_cast %88 : vector<8x8x8xbf16> to vector<64x8xbf16>
    %c1_89 = arith.constant 1 : index
    %c2_90 = arith.constant 2 : index
    %c0_91 = arith.constant 0 : index
    %90 = vector.load %arg13[%c1_89, %c2_90, %c0_91] : memref<10x10x8xbf16, #tpu.memory_space<vmem>>, vector<8x8x8xbf16>
    %91 = vector.shape_cast %90 : vector<8x8x8xbf16> to vector<64x8xbf16>
    %c2_92 = arith.constant 2 : index
    %c0_93 = arith.constant 0 : index
    %c0_94 = arith.constant 0 : index
    %92 = vector.load %arg13[%c2_92, %c0_93, %c0_94] : memref<10x10x8xbf16, #tpu.memory_space<vmem>>, vector<8x8x8xbf16>
    %93 = vector.shape_cast %92 : vector<8x8x8xbf16> to vector<64x8xbf16>
    %c2_95 = arith.constant 2 : index
    %c1_96 = arith.constant 1 : index
    %c0_97 = arith.constant 0 : index
    %94 = vector.load %arg13[%c2_95, %c1_96, %c0_97] : memref<10x10x8xbf16, #tpu.memory_space<vmem>>, vector<8x8x8xbf16>
    %95 = vector.shape_cast %94 : vector<8x8x8xbf16> to vector<64x8xbf16>
    %c2_98 = arith.constant 2 : index
    %c2_99 = arith.constant 2 : index
    %c0_100 = arith.constant 0 : index
    %96 = vector.load %arg13[%c2_98, %c2_99, %c0_100] : memref<10x10x8xbf16, #tpu.memory_space<vmem>>, vector<8x8x8xbf16>
    %97 = vector.shape_cast %96 : vector<8x8x8xbf16> to vector<64x8xbf16>
    %98 = tpu.concatenate %81, %83, %85, %87, %89, %91, %93, %95, %97 in 1 : vector<64x8xbf16>, vector<64x8xbf16>, vector<64x8xbf16>, vector<64x8xbf16>, vector<64x8xbf16>, vector<64x8xbf16>, vector<64x8xbf16>, vector<64x8xbf16>, vector<64x8xbf16> -> vector<64x72xbf16>
    %c0_101 = arith.constant 0 : index
    %c0_102 = arith.constant 0 : index
    %99 = vector.load %arg8[%c0_101, %c0_102] : memref<72x8xbf16, #tpu.memory_space<vmem>>, vector<72x8xbf16>
    %cst_103 = arith.constant dense<0.000000e+00> : vector<64x8xf32>
    %100 = tpu.matmul %98, %99, %cst_103 {dimension_numbers = #tpu.dot_dimension_numbers<[1], [0], [0], [1], [0, 0, 1, 1], [], []>} : vector<64x72xbf16>, vector<72x8xbf16>, vector<64x8xf32> -> vector<64x8xf32>
    %c0_104 = arith.constant 0 : index
    %c0_105 = arith.constant 0 : index
    %101 = vector.load %arg9[%c0_104, %c0_105] : memref<1x8xf32, #tpu.memory_space<vmem>>, vector<1x8xf32>
    %102 = vector.broadcast %101 : vector<1x8xf32> to vector<64x8xf32>
    %103 = arith.mulf %100, %102 : vector<64x8xf32>
    %c0_106 = arith.constant 0 : index
    %c0_107 = arith.constant 0 : index
    %104 = vector.load %arg10[%c0_106, %c0_107] : memref<1x8xf32, #tpu.memory_space<vmem>>, vector<1x8xf32>
    %105 = vector.broadcast %104 : vector<1x8xf32> to vector<64x8xf32>
    %106 = arith.addf %103, %105 : vector<64x8xf32>
    %cst_108 = arith.constant 0.000000e+00 : f32
    %107 = vector.broadcast %cst_108 : f32 to vector<64x8xf32>
    %108 = arith.maximumf %106, %107 : vector<64x8xf32>
    %109 = vector.shape_cast %108 : vector<64x8xf32> to vector<8x64xf32>
    %c0_109 = arith.constant 0 : index
    %c0_110 = arith.constant 0 : index
    %c0_111 = arith.constant 0 : index
    %110 = vector.load %arg11[%c0_109, %c0_110, %c0_111] : memref<1x8x64xf32, #tpu.memory_space<vmem>>, vector<1x8x64xf32>
    %111 = vector.shape_cast %110 : vector<1x8x64xf32> to vector<8x64xf32>
    %112 = vector.shape_cast %109 : vector<8x64xf32> to vector<1x8x64xf32>
    tpu.vector_store %arg11[%c0_109, %c0_110, %c0_111], %112 {strides = array<i32>} : memref<1x8x64xf32, #tpu.memory_space<vmem>>, vector<1x8x64xf32>,
    return
  }
  func.func @transform_0(%arg0: i32, %arg1: i32) -> (i32, i32, i32, i32) {
    %c1_i32 = arith.constant 1 : i32
    %0 = arith.muli %arg0, %c1_i32 : i32
    %1 = arith.addi %0, %arg1 : i32
    %c0_i32 = arith.constant 0 : i32
    %c0_i32_0 = arith.constant 0 : i32
    %c0_i32_1 = arith.constant 0 : i32
    %c0_i32_2 = arith.constant 0 : i32
    return %1, %c0_i32, %c0_i32_0, %c0_i32_1 : i32, i32, i32, i32
  }
  func.func @transform_1(%arg0: i32, %arg1: i32) -> (i32, i32, i32, i32) {
    %c4_i32 = arith.constant 4 : i32
    %0 = arith.muli %arg0, %c4_i32 : i32
    %c4_i32_0 = arith.constant 4 : i32
    %1 = arith.muli %arg1, %c4_i32_0 : i32
    %2 = arith.addi %0, %1 : i32
    %c1_i32 = arith.constant 1 : i32
    %3 = arith.subi %2, %c1_i32 : i32
    %c0_i32 = arith.constant 0 : i32
    %c7_i32 = arith.constant 7 : i32
    %4 = arith.maxsi %c0_i32, %3 : i32
    %5 = arith.minsi %c7_i32, %4 : i32
    %c0_i32_1 = arith.constant 0 : i32
    %c0_i32_2 = arith.constant 0 : i32
    %c0_i32_3 = arith.constant 0 : i32
    %c0_i32_4 = arith.constant 0 : i32
    return %5, %c0_i32_1, %c0_i32_2, %c0_i32_3 : i32, i32, i32, i32
  }
  func.func @transform_2(%arg0: i32, %arg1: i32) -> (i32, i32, i32, i32) {
    %c4_i32 = arith.constant 4 : i32
    %0 = arith.muli %arg0, %c4_i32 : i32
    %c1_i32 = arith.constant 1 : i32
    %1 = arith.addi %arg1, %c1_i32 : i32
    %c4_i32_0 = arith.constant 4 : i32
    %2 = arith.muli %1, %c4_i32_0 : i32
    %3 = arith.addi %0, %2 : i32
    %c0_i32 = arith.constant 0 : i32
    %c7_i32 = arith.constant 7 : i32
    %4 = arith.maxsi %c0_i32, %3 : i32
    %5 = arith.minsi %c7_i32, %4 : i32
    %c0_i32_1 = arith.constant 0 : i32
    %c0_i32_2 = arith.constant 0 : i32
    %c0_i32_3 = arith.constant 0 : i32
    %c0_i32_4 = arith.constant 0 : i32
    return %5, %c0_i32_1, %c0_i32_2, %c0_i32_3 : i32, i32, i32, i32
  }
  func.func @transform_3(%arg0: i32, %arg1: i32) -> (i32, i32) {
    %c0_i32 = arith.constant 0 : i32
    %c0_i32_0 = arith.constant 0 : i32
    %c0_i32_1 = arith.constant 0 : i32
    return %c0_i32, %c0_i32_0 : i32, i32
  }
  func.func @transform_4(%arg0: i32, %arg1: i32) -> (i32, i32) {
    %c0_i32 = arith.constant 0 : i32
    %c0_i32_0 = arith.constant 0 : i32
    %c0_i32_1 = arith.constant 0 : i32
    return %c0_i32, %c0_i32_0 : i32, i32
  }
  func.func @transform_5(%arg0: i32, %arg1: i32) -> (i32, i32) {
    %c0_i32 = arith.constant 0 : i32
    %c0_i32_0 = arith.constant 0 : i32
    %c0_i32_1 = arith.constant 0 : i32
    return %c0_i32, %c0_i32_0 : i32, i32
  }
  func.func @transform_6(%arg0: i32, %arg1: i32) -> (i32, i32) {
    %c0_i32 = arith.constant 0 : i32
    %c0_i32_0 = arith.constant 0 : i32
    %c0_i32_1 = arith.constant 0 : i32
    return %c0_i32, %c0_i32_0 : i32, i32
  }
  func.func @transform_7(%arg0: i32, %arg1: i32) -> (i32, i32) {
    %c0_i32 = arith.constant 0 : i32
    %c0_i32_0 = arith.constant 0 : i32
    %c0_i32_1 = arith.constant 0 : i32
    return %c0_i32, %c0_i32_0 : i32, i32
  }
  func.func @transform_8(%arg0: i32, %arg1: i32) -> (i32, i32) {
    %c0_i32 = arith.constant 0 : i32
    %c0_i32_0 = arith.constant 0 : i32
    %c0_i32_1 = arith.constant 0 : i32
    return %c0_i32, %c0_i32_0 : i32, i32
  }
  func.func @transform_9(%arg0: i32, %arg1: i32) -> (i32, i32, i32) {
    %c0_i32 = arith.constant 0 : i32
    %c0_i32_0 = arith.constant 0 : i32
    return %arg0, %arg1, %c0_i32 : i32, i32, i32
  }
}

module attributes {stable_mosaic.version = 11 : i64} {
  func.func @_down_fused_kernel(%arg0: i32, %arg1: i32, %arg2: memref<8x2x8x8xbf16, #tpu.memory_space<vmem>>, %arg3: memref<2x2x8x8xbf16, #tpu.memory_space<vmem>>, %arg4: memref<2x2x8x8xbf16, #tpu.memory_space<vmem>>, %arg5: memref<36x8xbf16, #tpu.memory_space<vmem>>, %arg6: memref<1x8xf32, #tpu.memory_space<vmem>>, %arg7: memref<1x8xf32, #tpu.memory_space<vmem>>, %arg8: memref<72x8xbf16, #tpu.memory_space<vmem>>, %arg9: memref<1x8xf32, #tpu.memory_space<vmem>>, %arg10: memref<1x8xf32, #tpu.memory_space<vmem>>, %arg11: memref<1x8x8x8xf32, #tpu.memory_space<vmem>>, %arg12: memref<12x10x4xbf16, #tpu.memory_space<vmem>>, %arg13: memref<10x10x8xbf16, #tpu.memory_space<vmem>>) attributes {dimension_semantics = [#tpu.dimension_semantics<parallel>, #tpu.dimension_semantics<parallel>], iteration_bounds = array<i64: 2, 1>, scalar_prefetch = 0 : i64, scratch_operands = 2 : i64, tpu.core_type = #tpu.core_type<tc>, window_params = [{transform_indices = @transform_0, window_bounds = array<i64: 8, 2, 8, 8>}, {transform_indices = @transform_1, window_bounds = array<i64: 2, 2, 8, 8>}, {transform_indices = @transform_2, window_bounds = array<i64: 2, 2, 8, 8>}, {pipeline_mode = #tpu.pipeline_mode<synchronous>, transform_indices = @transform_3, window_bounds = array<i64: 36, 8>}, {pipeline_mode = #tpu.pipeline_mode<synchronous>, transform_indices = @transform_4, window_bounds = array<i64: 1, 8>}, {pipeline_mode = #tpu.pipeline_mode<synchronous>, transform_indices = @transform_5, window_bounds = array<i64: 1, 8>}, {pipeline_mode = #tpu.pipeline_mode<synchronous>, transform_indices = @transform_6, window_bounds = array<i64: 72, 8>}, {pipeline_mode = #tpu.pipeline_mode<synchronous>, transform_indices = @transform_7, window_bounds = array<i64: 1, 8>}, {pipeline_mode = #tpu.pipeline_mode<synchronous>, transform_indices = @transform_8, window_bounds = array<i64: 1, 8>}, {transform_indices = @transform_9, window_bounds = array<i64: 1, 8, 8, 8>}]} {
    %c0_i32 = arith.constant 0 : i32
    %0 = arith.cmpi sgt, %arg1, %c0_i32 : i32
    %c0_i32_0 = arith.constant 0 : i32
    %1 = arith.cmpi slt, %arg1, %c0_i32_0 : i32
    %c0 = arith.constant 0 : index
    %c0_1 = arith.constant 0 : index
    %c0_2 = arith.constant 0 : index
    %c0_3 = arith.constant 0 : index
    %2 = vector.load %arg2[%c0, %c0_1, %c0_2, %c0_3] : memref<8x2x8x8xbf16, #tpu.memory_space<vmem>>, vector<8x2x8x8xbf16>
    %3 = vector.extract_strided_slice %2 {offsets = [0, 0, 0, 0], sizes = [8, 1, 8, 8], strides = [1, 1, 1, 1]} : vector<8x2x8x8xbf16> to vector<8x1x8x8xbf16>
    %4 = vector.shape_cast %3 : vector<8x1x8x8xbf16> to vector<8x8x8xbf16>
    %5 = vector.extract_strided_slice %2 {offsets = [0, 1, 0, 0], sizes = [8, 1, 8, 8], strides = [1, 1, 1, 1]} : vector<8x2x8x8xbf16> to vector<8x1x8x8xbf16>
    %6 = vector.shape_cast %5 : vector<8x1x8x8xbf16> to vector<8x8x8xbf16>
    %7 = arith.maximumf %4, %6 : vector<8x8x8xbf16>
    %8 = vector.extract_strided_slice %7 {offsets = [0, 0, 0], sizes = [8, 8, 4], strides = [1, 1, 1]} : vector<8x8x8xbf16> to vector<8x8x4xbf16>
    %9 = vector.extract_strided_slice %7 {offsets = [0, 0, 4], sizes = [8, 8, 4], strides = [1, 1, 1]} : vector<8x8x8xbf16> to vector<8x8x4xbf16>
    %10 = arith.maximumf %8, %9 : vector<8x8x4xbf16>
    %c0_4 = arith.constant 0 : index
    %c0_5 = arith.constant 0 : index
    %c0_6 = arith.constant 0 : index
    %c0_7 = arith.constant 0 : index
    %11 = vector.load %arg3[%c0_4, %c0_5, %c0_6, %c0_7] : memref<2x2x8x8xbf16, #tpu.memory_space<vmem>>, vector<2x2x8x8xbf16>
    %12 = vector.extract_strided_slice %11 {offsets = [0, 0, 0, 0], sizes = [2, 1, 8, 8], strides = [1, 1, 1, 1]} : vector<2x2x8x8xbf16> to vector<2x1x8x8xbf16>
    %13 = vector.shape_cast %12 : vector<2x1x8x8xbf16> to vector<2x8x8xbf16>
    %14 = vector.extract_strided_slice %11 {offsets = [0, 1, 0, 0], sizes = [2, 1, 8, 8], strides = [1, 1, 1, 1]} : vector<2x2x8x8xbf16> to vector<2x1x8x8xbf16>
    %15 = vector.shape_cast %14 : vector<2x1x8x8xbf16> to vector<2x8x8xbf16>
    %16 = arith.maximumf %13, %15 : vector<2x8x8xbf16>
    %17 = vector.extract_strided_slice %16 {offsets = [0, 0, 0], sizes = [2, 8, 4], strides = [1, 1, 1]} : vector<2x8x8xbf16> to vector<2x8x4xbf16>
    %18 = vector.extract_strided_slice %16 {offsets = [0, 0, 4], sizes = [2, 8, 4], strides = [1, 1, 1]} : vector<2x8x8xbf16> to vector<2x8x4xbf16>
    %19 = arith.maximumf %17, %18 : vector<2x8x4xbf16>
    %c0_8 = arith.constant 0 : index
    %c0_9 = arith.constant 0 : index
    %c0_10 = arith.constant 0 : index
    %c0_11 = arith.constant 0 : index
    %20 = vector.load %arg4[%c0_8, %c0_9, %c0_10, %c0_11] : memref<2x2x8x8xbf16, #tpu.memory_space<vmem>>, vector<2x2x8x8xbf16>
    %21 = vector.extract_strided_slice %20 {offsets = [0, 0, 0, 0], sizes = [2, 1, 8, 8], strides = [1, 1, 1, 1]} : vector<2x2x8x8xbf16> to vector<2x1x8x8xbf16>
    %22 = vector.shape_cast %21 : vector<2x1x8x8xbf16> to vector<2x8x8xbf16>
    %23 = vector.extract_strided_slice %20 {offsets = [0, 1, 0, 0], sizes = [2, 1, 8, 8], strides = [1, 1, 1, 1]} : vector<2x2x8x8xbf16> to vector<2x1x8x8xbf16>
    %24 = vector.shape_cast %23 : vector<2x1x8x8xbf16> to vector<2x8x8xbf16>
    %25 = arith.maximumf %22, %24 : vector<2x8x8xbf16>
    %26 = vector.extract_strided_slice %25 {offsets = [0, 0, 0], sizes = [2, 8, 4], strides = [1, 1, 1]} : vector<2x8x8xbf16> to vector<2x8x4xbf16>
    %27 = vector.extract_strided_slice %25 {offsets = [0, 0, 4], sizes = [2, 8, 4], strides = [1, 1, 1]} : vector<2x8x8xbf16> to vector<2x8x4xbf16>
    %28 = arith.maximumf %26, %27 : vector<2x8x4xbf16>
    %cst = arith.constant 0.000000e+00 : bf16
    %29 = vector.broadcast %cst : bf16 to vector<2x8x4xbf16>
    %30 = arith.select %0, %19, %29 : vector<2x8x4xbf16>
    %cst_12 = arith.constant 0.000000e+00 : bf16
    %31 = vector.broadcast %cst_12 : bf16 to vector<2x8x4xbf16>
    %32 = arith.select %1, %28, %31 : vector<2x8x4xbf16>
    %cst_13 = arith.constant 0.000000e+00 : bf16
    %33 = vector.broadcast %cst_13 : bf16 to vector<12x1x4xbf16>
    %c0_14 = arith.constant 0 : index
    %c0_15 = arith.constant 0 : index
    %c0_16 = arith.constant 0 : index
    %34 = vector.load %arg12[%c0_14, %c0_15, %c0_16] : memref<12x10x4xbf16, #tpu.memory_space<vmem>>, vector<12x1x4xbf16>
    tpu.vector_store %arg12[%c0_14, %c0_15, %c0_16], %33 {strides = array<i32>} : memref<12x10x4xbf16, #tpu.memory_space<vmem>>, vector<12x1x4xbf16>,
    %c0_17 = arith.constant 0 : index
    %c9 = arith.constant 9 : index
    %c0_18 = arith.constant 0 : index
    %35 = vector.load %arg12[%c0_17, %c9, %c0_18] : memref<12x10x4xbf16, #tpu.memory_space<vmem>>, vector<12x1x4xbf16>
    tpu.vector_store %arg12[%c0_17, %c9, %c0_18], %33 {strides = array<i32>} : memref<12x10x4xbf16, #tpu.memory_space<vmem>>, vector<12x1x4xbf16>,
    %c0_19 = arith.constant 0 : index
    %c1 = arith.constant 1 : index
    %c0_20 = arith.constant 0 : index
    %36 = vector.load %arg12[%c0_19, %c1, %c0_20] : memref<12x10x4xbf16, #tpu.memory_space<vmem>>, vector<2x8x4xbf16>
    tpu.vector_store %arg12[%c0_19, %c1, %c0_20], %30 {strides = array<i32>} : memref<12x10x4xbf16, #tpu.memory_space<vmem>>, vector<2x8x4xbf16>,
    %c2 = arith.constant 2 : index
    %c1_21 = arith.constant 1 : index
    %c0_22 = arith.constant 0 : index
    %37 = vector.load %arg12[%c2, %c1_21, %c0_22] : memref<12x10x4xbf16, #tpu.memory_space<vmem>>, vector<8x8x4xbf16>
    tpu.vector_store %arg12[%c2, %c1_21, %c0_22], %10 {strides = array<i32>} : memref<12x10x4xbf16, #tpu.memory_space<vmem>>, vector<8x8x4xbf16>,
    %c10 = arith.constant 10 : index
    %c1_23 = arith.constant 1 : index
    %c0_24 = arith.constant 0 : index
    %38 = vector.load %arg12[%c10, %c1_23, %c0_24] : memref<12x10x4xbf16, #tpu.memory_space<vmem>>, vector<2x8x4xbf16>
    tpu.vector_store %arg12[%c10, %c1_23, %c0_24], %32 {strides = array<i32>} : memref<12x10x4xbf16, #tpu.memory_space<vmem>>, vector<2x8x4xbf16>,
    %c0_25 = arith.constant 0 : index
    %c0_26 = arith.constant 0 : index
    %c0_27 = arith.constant 0 : index
    %39 = vector.load %arg12[%c0_25, %c0_26, %c0_27] : memref<12x10x4xbf16, #tpu.memory_space<vmem>>, vector<10x8x4xbf16>
    %40 = vector.shape_cast %39 : vector<10x8x4xbf16> to vector<80x4xbf16>
    %c0_28 = arith.constant 0 : index
    %c1_29 = arith.constant 1 : index
    %c0_30 = arith.constant 0 : index
    %41 = vector.load %arg12[%c0_28, %c1_29, %c0_30] : memref<12x10x4xbf16, #tpu.memory_space<vmem>>, vector<10x8x4xbf16>
    %42 = vector.shape_cast %41 : vector<10x8x4xbf16> to vector<80x4xbf16>
    %c0_31 = arith.constant 0 : index
    %c2_32 = arith.constant 2 : index
    %c0_33 = arith.constant 0 : index
    %43 = vector.load %arg12[%c0_31, %c2_32, %c0_33] : memref<12x10x4xbf16, #tpu.memory_space<vmem>>, vector<10x8x4xbf16>
    %44 = vector.shape_cast %43 : vector<10x8x4xbf16> to vector<80x4xbf16>
    %c1_34 = arith.constant 1 : index
    %c0_35 = arith.constant 0 : index
    %c0_36 = arith.constant 0 : index
    %45 = vector.load %arg12[%c1_34, %c0_35, %c0_36] : memref<12x10x4xbf16, #tpu.memory_space<vmem>>, vector<10x8x4xbf16>
    %46 = vector.shape_cast %45 : vector<10x8x4xbf16> to vector<80x4xbf16>
    %c1_37 = arith.constant 1 : index
    %c1_38 = arith.constant 1 : index
    %c0_39 = arith.constant 0 : index
    %47 = vector.load %arg12[%c1_37, %c1_38, %c0_39] : memref<12x10x4xbf16, #tpu.memory_space<vmem>>, vector<10x8x4xbf16>
    %48 = vector.shape_cast %47 : vector<10x8x4xbf16> to vector<80x4xbf16>
    %c1_40 = arith.constant 1 : index
    %c2_41 = arith.constant 2 : index
    %c0_42 = arith.constant 0 : index
    %49 = vector.load %arg12[%c1_40, %c2_41, %c0_42] : memref<12x10x4xbf16, #tpu.memory_space<vmem>>, vector<10x8x4xbf16>
    %50 = vector.shape_cast %49 : vector<10x8x4xbf16> to vector<80x4xbf16>
    %c2_43 = arith.constant 2 : index
    %c0_44 = arith.constant 0 : index
    %c0_45 = arith.constant 0 : index
    %51 = vector.load %arg12[%c2_43, %c0_44, %c0_45] : memref<12x10x4xbf16, #tpu.memory_space<vmem>>, vector<10x8x4xbf16>
    %52 = vector.shape_cast %51 : vector<10x8x4xbf16> to vector<80x4xbf16>
    %c2_46 = arith.constant 2 : index
    %c1_47 = arith.constant 1 : index
    %c0_48 = arith.constant 0 : index
    %53 = vector.load %arg12[%c2_46, %c1_47, %c0_48] : memref<12x10x4xbf16, #tpu.memory_space<vmem>>, vector<10x8x4xbf16>
    %54 = vector.shape_cast %53 : vector<10x8x4xbf16> to vector<80x4xbf16>
    %c2_49 = arith.constant 2 : index
    %c2_50 = arith.constant 2 : index
    %c0_51 = arith.constant 0 : index
    %55 = vector.load %arg12[%c2_49, %c2_50, %c0_51] : memref<12x10x4xbf16, #tpu.memory_space<vmem>>, vector<10x8x4xbf16>
    %56 = vector.shape_cast %55 : vector<10x8x4xbf16> to vector<80x4xbf16>
    %57 = tpu.concatenate %40, %42, %44, %46, %48, %50, %52, %54, %56 in 1 : vector<80x4xbf16>, vector<80x4xbf16>, vector<80x4xbf16>, vector<80x4xbf16>, vector<80x4xbf16>, vector<80x4xbf16>, vector<80x4xbf16>, vector<80x4xbf16>, vector<80x4xbf16> -> vector<80x36xbf16>
    %c0_52 = arith.constant 0 : index
    %c0_53 = arith.constant 0 : index
    %58 = vector.load %arg5[%c0_52, %c0_53] : memref<36x8xbf16, #tpu.memory_space<vmem>>, vector<36x8xbf16>
    %cst_54 = arith.constant dense<0.000000e+00> : vector<80x8xf32>
    %59 = tpu.matmul %57, %58, %cst_54 {dimension_numbers = #tpu.dot_dimension_numbers<[1], [0], [0], [1], [0, 0, 1, 1], [], []>} : vector<80x36xbf16>, vector<36x8xbf16>, vector<80x8xf32> -> vector<80x8xf32>
    %c0_55 = arith.constant 0 : index
    %c0_56 = arith.constant 0 : index
    %60 = vector.load %arg6[%c0_55, %c0_56] : memref<1x8xf32, #tpu.memory_space<vmem>>, vector<1x8xf32>
    %61 = vector.broadcast %60 : vector<1x8xf32> to vector<80x8xf32>
    %62 = arith.mulf %59, %61 : vector<80x8xf32>
    %c0_57 = arith.constant 0 : index
    %c0_58 = arith.constant 0 : index
    %63 = vector.load %arg7[%c0_57, %c0_58] : memref<1x8xf32, #tpu.memory_space<vmem>>, vector<1x8xf32>
    %64 = vector.broadcast %63 : vector<1x8xf32> to vector<80x8xf32>
    %65 = arith.addf %62, %64 : vector<80x8xf32>
    %cst_59 = arith.constant 0.000000e+00 : f32
    %66 = vector.broadcast %cst_59 : f32 to vector<80x8xf32>
    %67 = arith.maximumf %65, %66 : vector<80x8xf32>
    %cst_60 = arith.constant 0.000000e+00 : bf16
    %68 = vector.broadcast %cst_60 : bf16 to vector<10x1x8xbf16>
    %c0_61 = arith.constant 0 : index
    %c0_62 = arith.constant 0 : index
    %c0_63 = arith.constant 0 : index
    %69 = vector.load %arg13[%c0_61, %c0_62, %c0_63] : memref<10x10x8xbf16, #tpu.memory_space<vmem>>, vector<10x1x8xbf16>
    tpu.vector_store %arg13[%c0_61, %c0_62, %c0_63], %68 {strides = array<i32>} : memref<10x10x8xbf16, #tpu.memory_space<vmem>>, vector<10x1x8xbf16>,
    %c0_64 = arith.constant 0 : index
    %c9_65 = arith.constant 9 : index
    %c0_66 = arith.constant 0 : index
    %70 = vector.load %arg13[%c0_64, %c9_65, %c0_66] : memref<10x10x8xbf16, #tpu.memory_space<vmem>>, vector<10x1x8xbf16>
    tpu.vector_store %arg13[%c0_64, %c9_65, %c0_66], %68 {strides = array<i32>} : memref<10x10x8xbf16, #tpu.memory_space<vmem>>, vector<10x1x8xbf16>,
    %71 = arith.truncf %67 : vector<80x8xf32> to vector<80x8xbf16>
    %72 = vector.shape_cast %71 : vector<80x8xbf16> to vector<10x8x8xbf16>
    %c0_67 = arith.constant 0 : index
    %c1_68 = arith.constant 1 : index
    %c0_69 = arith.constant 0 : index
    %73 = vector.load %arg13[%c0_67, %c1_68, %c0_69] : memref<10x10x8xbf16, #tpu.memory_space<vmem>>, vector<10x8x8xbf16>
    tpu.vector_store %arg13[%c0_67, %c1_68, %c0_69], %72 {strides = array<i32>} : memref<10x10x8xbf16, #tpu.memory_space<vmem>>, vector<10x8x8xbf16>,
    %c0_i32_70 = arith.constant 0 : i32
    %74 = arith.cmpi eq, %arg1, %c0_i32_70 : i32
    %75 = arith.extui %74 : i1 to i32
    %c0_i32_71 = arith.constant 0 : i32
    %76 = arith.cmpi ne, %75, %c0_i32_71 : i32
    scf.if %76 {
      %cst_113 = arith.constant 0.000000e+00 : bf16
      %113 = vector.broadcast %cst_113 : bf16 to vector<1x10x8xbf16>
      %c0_114 = arith.constant 0 : index
      %c0_115 = arith.constant 0 : index
      %c0_116 = arith.constant 0 : index
      %114 = vector.load %arg13[%c0_114, %c0_115, %c0_116] : memref<10x10x8xbf16, #tpu.memory_space<vmem>>, vector<1x10x8xbf16>
      tpu.vector_store %arg13[%c0_114, %c0_115, %c0_116], %113 {strides = array<i32>} : memref<10x10x8xbf16, #tpu.memory_space<vmem>>, vector<1x10x8xbf16>,
    } else {
    }
    %c0_i32_72 = arith.constant 0 : i32
    %77 = arith.cmpi eq, %arg1, %c0_i32_72 : i32
    %78 = arith.extui %77 : i1 to i32
    %c0_i32_73 = arith.constant 0 : i32
    %79 = arith.cmpi ne, %78, %c0_i32_73 : i32
    scf.if %79 {
      %cst_113 = arith.constant 0.000000e+00 : bf16
      %113 = vector.broadcast %cst_113 : bf16 to vector<1x10x8xbf16>
      %c9_114 = arith.constant 9 : index
      %c0_115 = arith.constant 0 : index
      %c0_116 = arith.constant 0 : index
      %114 = vector.load %arg13[%c9_114, %c0_115, %c0_116] : memref<10x10x8xbf16, #tpu.memory_space<vmem>>, vector<1x10x8xbf16>
      tpu.vector_store %arg13[%c9_114, %c0_115, %c0_116], %113 {strides = array<i32>} : memref<10x10x8xbf16, #tpu.memory_space<vmem>>, vector<1x10x8xbf16>,
    } else {
    }
    %c0_74 = arith.constant 0 : index
    %c0_75 = arith.constant 0 : index
    %c0_76 = arith.constant 0 : index
    %80 = vector.load %arg13[%c0_74, %c0_75, %c0_76] : memref<10x10x8xbf16, #tpu.memory_space<vmem>>, vector<8x8x8xbf16>
    %81 = vector.shape_cast %80 : vector<8x8x8xbf16> to vector<64x8xbf16>
    %c0_77 = arith.constant 0 : index
    %c1_78 = arith.constant 1 : index
    %c0_79 = arith.constant 0 : index
    %82 = vector.load %arg13[%c0_77, %c1_78, %c0_79] : memref<10x10x8xbf16, #tpu.memory_space<vmem>>, vector<8x8x8xbf16>
    %83 = vector.shape_cast %82 : vector<8x8x8xbf16> to vector<64x8xbf16>
    %c0_80 = arith.constant 0 : index
    %c2_81 = arith.constant 2 : index
    %c0_82 = arith.constant 0 : index
    %84 = vector.load %arg13[%c0_80, %c2_81, %c0_82] : memref<10x10x8xbf16, #tpu.memory_space<vmem>>, vector<8x8x8xbf16>
    %85 = vector.shape_cast %84 : vector<8x8x8xbf16> to vector<64x8xbf16>
    %c1_83 = arith.constant 1 : index
    %c0_84 = arith.constant 0 : index
    %c0_85 = arith.constant 0 : index
    %86 = vector.load %arg13[%c1_83, %c0_84, %c0_85] : memref<10x10x8xbf16, #tpu.memory_space<vmem>>, vector<8x8x8xbf16>
    %87 = vector.shape_cast %86 : vector<8x8x8xbf16> to vector<64x8xbf16>
    %c1_86 = arith.constant 1 : index
    %c1_87 = arith.constant 1 : index
    %c0_88 = arith.constant 0 : index
    %88 = vector.load %arg13[%c1_86, %c1_87, %c0_88] : memref<10x10x8xbf16, #tpu.memory_space<vmem>>, vector<8x8x8xbf16>
    %89 = vector.shape_cast %88 : vector<8x8x8xbf16> to vector<64x8xbf16>
    %c1_89 = arith.constant 1 : index
    %c2_90 = arith.constant 2 : index
    %c0_91 = arith.constant 0 : index
    %90 = vector.load %arg13[%c1_89, %c2_90, %c0_91] : memref<10x10x8xbf16, #tpu.memory_space<vmem>>, vector<8x8x8xbf16>
    %91 = vector.shape_cast %90 : vector<8x8x8xbf16> to vector<64x8xbf16>
    %c2_92 = arith.constant 2 : index
    %c0_93 = arith.constant 0 : index
    %c0_94 = arith.constant 0 : index
    %92 = vector.load %arg13[%c2_92, %c0_93, %c0_94] : memref<10x10x8xbf16, #tpu.memory_space<vmem>>, vector<8x8x8xbf16>
    %93 = vector.shape_cast %92 : vector<8x8x8xbf16> to vector<64x8xbf16>
    %c2_95 = arith.constant 2 : index
    %c1_96 = arith.constant 1 : index
    %c0_97 = arith.constant 0 : index
    %94 = vector.load %arg13[%c2_95, %c1_96, %c0_97] : memref<10x10x8xbf16, #tpu.memory_space<vmem>>, vector<8x8x8xbf16>
    %95 = vector.shape_cast %94 : vector<8x8x8xbf16> to vector<64x8xbf16>
    %c2_98 = arith.constant 2 : index
    %c2_99 = arith.constant 2 : index
    %c0_100 = arith.constant 0 : index
    %96 = vector.load %arg13[%c2_98, %c2_99, %c0_100] : memref<10x10x8xbf16, #tpu.memory_space<vmem>>, vector<8x8x8xbf16>
    %97 = vector.shape_cast %96 : vector<8x8x8xbf16> to vector<64x8xbf16>
    %98 = tpu.concatenate %81, %83, %85, %87, %89, %91, %93, %95, %97 in 1 : vector<64x8xbf16>, vector<64x8xbf16>, vector<64x8xbf16>, vector<64x8xbf16>, vector<64x8xbf16>, vector<64x8xbf16>, vector<64x8xbf16>, vector<64x8xbf16>, vector<64x8xbf16> -> vector<64x72xbf16>
    %c0_101 = arith.constant 0 : index
    %c0_102 = arith.constant 0 : index
    %99 = vector.load %arg8[%c0_101, %c0_102] : memref<72x8xbf16, #tpu.memory_space<vmem>>, vector<72x8xbf16>
    %cst_103 = arith.constant dense<0.000000e+00> : vector<64x8xf32>
    %100 = tpu.matmul %98, %99, %cst_103 {dimension_numbers = #tpu.dot_dimension_numbers<[1], [0], [0], [1], [0, 0, 1, 1], [], []>} : vector<64x72xbf16>, vector<72x8xbf16>, vector<64x8xf32> -> vector<64x8xf32>
    %c0_104 = arith.constant 0 : index
    %c0_105 = arith.constant 0 : index
    %101 = vector.load %arg9[%c0_104, %c0_105] : memref<1x8xf32, #tpu.memory_space<vmem>>, vector<1x8xf32>
    %102 = vector.broadcast %101 : vector<1x8xf32> to vector<64x8xf32>
    %103 = arith.mulf %100, %102 : vector<64x8xf32>
    %c0_106 = arith.constant 0 : index
    %c0_107 = arith.constant 0 : index
    %104 = vector.load %arg10[%c0_106, %c0_107] : memref<1x8xf32, #tpu.memory_space<vmem>>, vector<1x8xf32>
    %105 = vector.broadcast %104 : vector<1x8xf32> to vector<64x8xf32>
    %106 = arith.addf %103, %105 : vector<64x8xf32>
    %cst_108 = arith.constant 0.000000e+00 : f32
    %107 = vector.broadcast %cst_108 : f32 to vector<64x8xf32>
    %108 = arith.maximumf %106, %107 : vector<64x8xf32>
    %109 = vector.shape_cast %108 : vector<64x8xf32> to vector<8x8x8xf32>
    %c0_109 = arith.constant 0 : index
    %c0_110 = arith.constant 0 : index
    %c0_111 = arith.constant 0 : index
    %c0_112 = arith.constant 0 : index
    %110 = vector.load %arg11[%c0_109, %c0_110, %c0_111, %c0_112] : memref<1x8x8x8xf32, #tpu.memory_space<vmem>>, vector<1x8x8x8xf32>
    %111 = vector.shape_cast %110 : vector<1x8x8x8xf32> to vector<8x8x8xf32>
    %112 = vector.shape_cast %109 : vector<8x8x8xf32> to vector<1x8x8x8xf32>
    tpu.vector_store %arg11[%c0_109, %c0_110, %c0_111, %c0_112], %112 {strides = array<i32>} : memref<1x8x8x8xf32, #tpu.memory_space<vmem>>, vector<1x8x8x8xf32>,
    return
  }
  func.func @transform_0(%arg0: i32, %arg1: i32) -> (i32, i32, i32, i32) {
    %c1_i32 = arith.constant 1 : i32
    %0 = arith.muli %arg0, %c1_i32 : i32
    %1 = arith.addi %0, %arg1 : i32
    %c0_i32 = arith.constant 0 : i32
    %c0_i32_0 = arith.constant 0 : i32
    %c0_i32_1 = arith.constant 0 : i32
    %c0_i32_2 = arith.constant 0 : i32
    return %1, %c0_i32, %c0_i32_0, %c0_i32_1 : i32, i32, i32, i32
  }
  func.func @transform_1(%arg0: i32, %arg1: i32) -> (i32, i32, i32, i32) {
    %c4_i32 = arith.constant 4 : i32
    %0 = arith.muli %arg0, %c4_i32 : i32
    %c4_i32_0 = arith.constant 4 : i32
    %1 = arith.muli %arg1, %c4_i32_0 : i32
    %2 = arith.addi %0, %1 : i32
    %c1_i32 = arith.constant 1 : i32
    %3 = arith.subi %2, %c1_i32 : i32
    %c0_i32 = arith.constant 0 : i32
    %c7_i32 = arith.constant 7 : i32
    %4 = arith.maxsi %c0_i32, %3 : i32
    %5 = arith.minsi %c7_i32, %4 : i32
    %c0_i32_1 = arith.constant 0 : i32
    %c0_i32_2 = arith.constant 0 : i32
    %c0_i32_3 = arith.constant 0 : i32
    %c0_i32_4 = arith.constant 0 : i32
    return %5, %c0_i32_1, %c0_i32_2, %c0_i32_3 : i32, i32, i32, i32
  }
  func.func @transform_2(%arg0: i32, %arg1: i32) -> (i32, i32, i32, i32) {
    %c4_i32 = arith.constant 4 : i32
    %0 = arith.muli %arg0, %c4_i32 : i32
    %c1_i32 = arith.constant 1 : i32
    %1 = arith.addi %arg1, %c1_i32 : i32
    %c4_i32_0 = arith.constant 4 : i32
    %2 = arith.muli %1, %c4_i32_0 : i32
    %3 = arith.addi %0, %2 : i32
    %c0_i32 = arith.constant 0 : i32
    %c7_i32 = arith.constant 7 : i32
    %4 = arith.maxsi %c0_i32, %3 : i32
    %5 = arith.minsi %c7_i32, %4 : i32
    %c0_i32_1 = arith.constant 0 : i32
    %c0_i32_2 = arith.constant 0 : i32
    %c0_i32_3 = arith.constant 0 : i32
    %c0_i32_4 = arith.constant 0 : i32
    return %5, %c0_i32_1, %c0_i32_2, %c0_i32_3 : i32, i32, i32, i32
  }
  func.func @transform_3(%arg0: i32, %arg1: i32) -> (i32, i32) {
    %c0_i32 = arith.constant 0 : i32
    %c0_i32_0 = arith.constant 0 : i32
    %c0_i32_1 = arith.constant 0 : i32
    return %c0_i32, %c0_i32_0 : i32, i32
  }
  func.func @transform_4(%arg0: i32, %arg1: i32) -> (i32, i32) {
    %c0_i32 = arith.constant 0 : i32
    %c0_i32_0 = arith.constant 0 : i32
    %c0_i32_1 = arith.constant 0 : i32
    return %c0_i32, %c0_i32_0 : i32, i32
  }
  func.func @transform_5(%arg0: i32, %arg1: i32) -> (i32, i32) {
    %c0_i32 = arith.constant 0 : i32
    %c0_i32_0 = arith.constant 0 : i32
    %c0_i32_1 = arith.constant 0 : i32
    return %c0_i32, %c0_i32_0 : i32, i32
  }
  func.func @transform_6(%arg0: i32, %arg1: i32) -> (i32, i32) {
    %c0_i32 = arith.constant 0 : i32
    %c0_i32_0 = arith.constant 0 : i32
    %c0_i32_1 = arith.constant 0 : i32
    return %c0_i32, %c0_i32_0 : i32, i32
  }
  func.func @transform_7(%arg0: i32, %arg1: i32) -> (i32, i32) {
    %c0_i32 = arith.constant 0 : i32
    %c0_i32_0 = arith.constant 0 : i32
    %c0_i32_1 = arith.constant 0 : i32
    return %c0_i32, %c0_i32_0 : i32, i32
  }
  func.func @transform_8(%arg0: i32, %arg1: i32) -> (i32, i32) {
    %c0_i32 = arith.constant 0 : i32
    %c0_i32_0 = arith.constant 0 : i32
    %c0_i32_1 = arith.constant 0 : i32
    return %c0_i32, %c0_i32_0 : i32, i32
  }
  func.func @transform_9(%arg0: i32, %arg1: i32) -> (i32, i32, i32, i32) {
    %c0_i32 = arith.constant 0 : i32
    %c0_i32_0 = arith.constant 0 : i32
    %c0_i32_1 = arith.constant 0 : i32
    return %arg0, %arg1, %c0_i32, %c0_i32_0 : i32, i32, i32, i32
  }
}

</mosaic_0001>

<bundles_post_ra>
// kernel: tpu_custom_call.1
= control target key start
LH: loop header
LB: loop body
LE: loop exit
PB: predicated region body
PF: predicated region fallthrough
CT: control target
= control target key end

     0   :  { %14 = vsyncpa [#allocation5], 0  ;;  %s5422_s0 = inlined_call_operand.vmem [shape: bf16[16,2,8,8], index: 0, kind: input, shape index: {}]   ;;  %s5423_s1 = inlined_call_operand.vmem [shape: bf16[16,2,8,8], index: 1, kind: input, shape index: {}]   ;;  %s5424_s2 = inlined_call_operand.vmem [shape: bf16[16,2,8,8], index: 2, kind: input, shape index: {}]   ;;  %s5425_s3 = inlined_call_operand.vmem [shape: bf16[36,8], index: 3, kind: input, shape index: {}]   ;;  %s5426_s4 = inlined_call_operand.vmem [shape: f32[1,8], index: 4, kind: input, shape index: {}]   ;;  %s5427_s5 = inlined_call_operand.vmem [shape: f32[1,8], index: 5, kind: input, shape index: {}]   ;;  %s5428_s6 = inlined_call_operand.vmem [shape: bf16[72,8], index: 6, kind: input, shape index: {}]   ;;  %s5429_s7 = inlined_call_operand.vmem [shape: f32[1,8], index: 7, kind: input, shape index: {}]   ;;  %s5430_s8 = inlined_call_operand.vmem [shape: f32[1,8], index: 8, kind: input, shape index: {}]   ;;  %s5431_s9 = inlined_call_operand.hbm [shape: f32[2,8,8,8], index: 9, kind: output, shape index: {}]  }
   0x1   :  { %16 = vsyncpa [#allocation5 + $0x1], 0  ;;  %s4022_s28 = smov 0   ;;  %s4024_s29 = smov 0  }
   0x2   :  { %s4026_s30 = smov 0   ;;  %s4028_s10 = smov 0  }
   0x3   :  { %s4030_s11 = smov 0   ;;  %s4032_s12 = smov 0  }
   0x4 LB: > { %s3450_s13 = sadd.s32 4294967295, %s3952_s12   ;;  %s3451_s14 = sadd.s32 4294967294, %s3952_s12   ;;  %s3952_s12 = sphi %s4032_s12, %s22_s12   ;;  %s3948_s11 = sphi %s4030_s11, %s5490_s11   ;;  %s3944_s10 = sphi %s4028_s10, %s5489_s10   ;;  %s3940_s30 = sphi %s4026_s30, %s5488_s30   ;;  %s3936_s29 = sphi %s4024_s29, %s5487_s29   ;;  %s3932_s28 = sphi %s4022_s28, %s5486_s28  }
   0x5   : > { %s34_s15 = sadd.s32 1, %s3948_s11  ;;  %s281_s16 = sadd.s32 1, %s3940_s30 }
   0x6   : > { %p36_p0 = scmp.ge.s32.totalorder %s34_s15, 2  ;;  %p291_p1 = scmp.ne.s32.totalorder %s3940_s30, %s3936_s29 }
   0x7   : > { %p292_p2 = scmp.eq.s32.totalorder %s3450_s13, 1  ;;  %p297_p3 = scmp.ne.s32.totalorder %s3936_s29, %s3932_s28 }
   0x8   : > { %s5492_s15 = smov (%p36_p0, %s34_s15), 0  ;;  %p298_p5 = scmp.eq.s32.totalorder %s3451_s14, 1 }
   0x9   : > { %p4062_p4 = por %p292_p2, %p291_p1  ;;  %s276_s18 = ssub.s32 %s3948_s11, %s5492_s15 }
   0xa   : > { %p3480_p6 = scmp.ge.s32.totalorder %s3952_s12, 1  ;;  %p279_p7 = scmp.eq.s32.totalorder %s276_s18, 0 }
   0xb   : > { %p4069_p8 = por %p298_p5, %p297_p3  ;;  %p398_p9 = scmp.lt.s32.totalorder %s3952_s12, 3 }
   0xc   : > { %s4075_s20 = scalar_select %p279_p7, %s3940_s30, %s281_s16  }
   0xd   : > { %p399_p10 = pnand %p3480_p6, %p398_p9 }
   0xf   : > { %402 = sbr.rel (%p399_p10) target bundleno = 1031 (0x407), region = 56 }
  0x16   : > { %s3482_s21 = sshll.u32 %s3944_s10, 3  ;;  %vm629_vm0 = vcmask 24576   ;;  %vm630_vm1 = vsmask.f32 256  ;;  %v644_v1 = vld [vmem:[#allocation2 + $0x20] sm:$0x1] }
  0x17   : > { %p466_p11 = scmp.lt.s32.totalorder %s3482_s21, 15  ;;  %vm4079_vm2 = vmand %vm629_vm0, %vm630_vm1  ;;  %vm668_vm3 = vsmask.f32 7938  ;;  %v682_v4 = vld [vmem:[#allocation2 + $0x24] sm:$0x1]  ;;  %s3954_s26 = smov 124  }
  0x18   : > { %v645_v2 = vsel %vm4079_vm2, 0, %v644_v1  ;;  %vm4086_vm4 = vmand %vm629_vm0, %vm668_vm3  ;;  %v638_v5 = vld [vmem:[#allocation2 + $0x10] sm:$0x1]  ;;  %v676_v8 = vld [vmem:[#allocation2 + $0x14] sm:$0x1]  ;;  %vm726_vm5 = vcmask 27648  }
  0x19   : > { %s5494_s21 = smov (!%p466_p11, %s3482_s21), 15  ;;  %646 = vst [vmem:[#allocation2 + $0x20] sm:$0x1] %v645_v2  ;;  %v683_v6 = vsel %vm4086_vm4, 0, %v682_v4  ;;  %v639_v7 = vsel %vm4079_vm2, 0, %v638_v5  ;;  %v677_v9 = vsel %vm4086_vm4, 0, %v676_v8  ;;  %vm4185_vm6 = vmand %vm726_vm5, %vm668_vm3 }
  0x1a   : > { %684 = vst [vmem:[#allocation2 + $0x24] sm:$0x1] %v683_v6  ;;  %640 = vst [vmem:[#allocation2 + $0x10] sm:$0x1] %v639_v7  ;;  %v647_v10 = vld [vmem:[#allocation2 + $0x28] sm:$0x1] }
  0x1b   : > { %v685_v11 = vld [vmem:[#allocation2 + $0x2c] sm:$0x1]  ;;  %s3683_s22 = sshll.u32 %s5494_s21, 3  ;;  %678 = vst [vmem:[#allocation2 + $0x14] sm:$0x1] %v677_v9  ;;  %v648_v12 = vsel %vm4079_vm2, 0, %v647_v10 }
  0x1c   : > { %v686_v13 = vsel %vm4086_vm4, 0, %v685_v11  ;;  %v641_v14 = vld [vmem:[#allocation2 + $0x18] sm:$0x1]  ;;  %s4103_s25 = scalar_lea.vmem %s5422_s0, %s3683_s22  ;;  %649 = vst [vmem:[#allocation2 + $0x28] sm:$0x1] %v648_v12  ;;  %v5432_v4 = vmov 0  }
  0x1d   : > { %687 = vst [vmem:[#allocation2 + $0x2c] sm:$0x1] %v686_v13  ;;  %v642_v15 = vsel %vm4079_vm2, 0, %v641_v14  ;;  %v527_v16 = vld [vmem:[%s4103_s25 + $0x10] sm:$0xf]  ;;  %v4182_v5 = vrot.slane %v5432_v4, 7 }
  0x1e   : > { %v528_v17 = vld [vmem:[%s4103_s25 + $0x14] sm:$0xf]  ;;  %v523_v18 = vld [vmem:[%s4103_s25] sm:$0xf]  ;;  %643 = vst [vmem:[#allocation2 + $0x18] sm:$0x1] %v642_v15 }
  0x1f   : > { %v4110_v19 = vmax.bf16 %v528_v17, %v527_v16  ;;  %v524_v20 = vld [vmem:[%s4103_s25 + $0x4] sm:$0xf]  ;;  %v529_v21 = vld [vmem:[%s4103_s25 + $0x18] sm:$0xf]  ;;  %v530_v22 = vld [vmem:[%s4103_s25 + $0x1c] sm:$0xf] }
  0x20   : > { %v4115_v23 = vmax.bf16 %v524_v20, %v523_v18  ;;  %v525_v24 = vld [vmem:[%s4103_s25 + $0x8] sm:$0xf]  ;;  %v526_v25 = vld [vmem:[%s4103_s25 + $0xc] sm:$0xf]  ;;  %v4121_v26 = vmax.bf16 %v530_v22, %v529_v21  ;;  %v679_v27 = vld [vmem:[#allocation2 + $0x1c] sm:$0x1] }
  0x21   : > { %559 = vrot.lane.b32.xlu1 %v4110_v19, %s3954_s26  ;;  %v4125_v28 = vmax.bf16 %v526_v25, %v525_v24  ;;  %v533_v29 = vld [vmem:[%s4103_s25 + $0x28] sm:$0xf]  ;;  %v534_v30 = vld [vmem:[%s4103_s25 + $0x2c] sm:$0xf]  ;;  %v653_v31 = vld [vmem:[#allocation2 + $0x38] sm:$0x1] }
  0x22   : > { %555 = vrot.lane.b32.xlu0 %v4115_v23, %s3954_s26  ;;  %v531_v32 = vld [vmem:[%s4103_s25 + $0x20] sm:$0xf]  ;;  %v532_v33 = vld [vmem:[%s4103_s25 + $0x24] sm:$0xf]  ;;  %v4133_v34 = vmax.bf16 %v534_v30, %v533_v29  ;;  %v535_v35 = vld [vmem:[%s4103_s25 + $0x30] sm:$0xf] }
  0x23   : > { %v536_v36 = vld [vmem:[%s4103_s25 + $0x34] sm:$0xf]  ;;  %v537_v37 = vld [vmem:[%s4103_s25 + $0x38] sm:$0xf]  ;;  %v538_v38 = vld [vmem:[%s4103_s25 + $0x3c] sm:$0xf]  ;;  %v4145_v41 = vmax.bf16 %v532_v33, %v531_v32 }
  0x24   : > { %v680_v39 = vsel %vm4086_vm4, 0, %v679_v27  ;;  %v654_v40 = vsel %vm4079_vm2, 0, %v653_v31  ;;  %v691_v42 = vld [vmem:[#allocation2 + $0x3c] sm:$0x1]  ;;  %v650_v43 = vld [vmem:[#allocation2 + $0x30] sm:$0x1]  ;;  %v4157_v52 = vmax.bf16 %v538_v38, %v537_v37  ;;  %v4165_v57 = vmax.bf16 %v536_v36, %v535_v35 }
  0x25   : > { %561 = vrot.lane.b32.xlu1 %v4121_v26, %s3954_s26  ;;  %681 = vst [vmem:[#allocation2 + $0x1c] sm:$0x1] %v680_v39  ;;  %655 = vst [vmem:[#allocation2 + $0x38] sm:$0x1] %v654_v40  ;;  %v688_v44 = vld [vmem:[#allocation2 + $0x34] sm:$0x1] }
  0x26   : > { %557 = vrot.lane.b32.xlu0 %v4125_v28, %s3954_s26  ;;  %v692_v45 = vsel %vm4086_vm4, 0, %v691_v42  ;;  %v651_v46 = vsel %vm4079_vm2, 0, %v650_v43  ;;  %v689_v47 = vsel %vm4086_vm4, 0, %v688_v44  ;;  %v656_v48 = vld [vmem:[#allocation2 + $0x40] sm:$0x1]  ;;  %v4190_v7 = vrot.slane %v4182_v5, 4 }
  0x27   : > { %693 = vst [vmem:[#allocation2 + $0x3c] sm:$0x1] %v692_v45  ;;  %652 = vst [vmem:[#allocation2 + $0x30] sm:$0x1] %v651_v46  ;;  %v657_v49 = vsel %vm4079_vm2, 0, %v656_v48  ;;  %vm1095_vm8 = vcmask 1042432  }
  0x28   : > { %690 = vst [vmem:[#allocation2 + $0x34] sm:$0x1] %v689_v47  ;;  %v694_v50 = vld [vmem:[#allocation2 + $0x44] sm:$0x1]  ;;  %v659_v51 = vld [vmem:[#allocation2 + $0x48] sm:$0x1] }
  0x29   : > { %565 = vrot.lane.b32.xlu1 %v4133_v34, %s3954_s26  ;;  %658 = vst [vmem:[#allocation2 + $0x40] sm:$0x1] %v657_v49  ;;  %v695_v53 = vsel %vm4086_vm4, 0, %v694_v50  ;;  %v660_v54 = vsel %vm4079_vm2, 0, %v659_v51  ;;  %v697_v55 = vld [vmem:[#allocation2 + $0x4c] sm:$0x1] }
  0x2a   : > { %v632_v56 = vld [vmem:[#allocation2] sm:$0x1]  ;;  %563 = vrot.lane.b32.xlu0 %v4145_v41, %s3954_s26  ;;  %696 = vst [vmem:[#allocation2 + $0x44] sm:$0x1] %v695_v53  ;;  %661 = vst [vmem:[#allocation2 + $0x48] sm:$0x1] %v660_v54 }
  0x2b   : > { %v698_v58 = vsel %vm4086_vm4, 0, %v697_v55  ;;  %v633_v59 = vsel %vm4079_vm2, 0, %v632_v56  ;;  %v635_v60 = vld [vmem:[#allocation2 + $0x8] sm:$0x1]  ;;  %v670_v61 = vld [vmem:[#allocation2 + $0x4] sm:$0x1] }
  0x2c   : > { %699 = vst [vmem:[#allocation2 + $0x4c] sm:$0x1] %v698_v58  ;;  %634 = vst [vmem:[#allocation2] sm:$0x1] %v633_v59  ;;  %v636_v62 = vsel %vm4079_vm2, 0, %v635_v60  ;;  %v671_v63 = vsel %vm4086_vm4, 0, %v670_v61 }
  0x2d   : > { %v673_v1 = vld [vmem:[#allocation2 + $0xc] sm:$0x1]  ;;  %637 = vst [vmem:[#allocation2 + $0x8] sm:$0x1] %v636_v62  ;;  %672 = vst [vmem:[#allocation2 + $0x4] sm:$0x1] %v671_v63  ;;  %569 = vrot.lane.b32.xlu1 %v4157_v52, %s3954_s26 }
  0x2e   : > { %v674_v2 = vsel %vm4086_vm4, 0, %v673_v1  ;;  %567 = vrot.lane.b32.xlu0 %v4165_v57, %s3954_s26  ;;  %vm922_vm7 = vsmask.f32 3328  ;;  %vm1096_vm9 = vcmask 1046532   ;;  %vm923_vm10 = vsmask.f32 7440 }
  0x2f   : > { %675 = vst [vmem:[#allocation2 + $0xc] sm:$0x1] %v674_v2  ;;  %vm4204_vm11 = vmor %vm1095_vm8, %vm1096_vm9  ;;  %s3956_s1 = smov 8   ;;  %s3957_s27 = smov 4   ;;  %v662_v58 = vld [vmem:[#allocation2 + $0x50] sm:$0x1] }
  0x30   : > { %vm4212_vm12 = vmor %vm922_vm7, %vm923_vm10  ;;  %v663_v59 = vsel %vm4079_vm2, 0, %v662_v58  ;;  %v700_v62 = vld [vmem:[#allocation2 + $0x54] sm:$0x1]  ;;  %v665_v1 = vld [vmem:[#allocation2 + $0x58] sm:$0x1]  ;;  %s3958_s2 = smov 12  }
  0x31   : > { %664 = vst [vmem:[#allocation2 + $0x50] sm:$0x1] %v663_v59  ;;  %v701_v63 = vsel %vm4086_vm4, 0, %v700_v62  ;;  %v666_v2 = vsel %vm4079_vm2, 0, %v665_v1  ;;  %s3959_s13 = smov 24   ;;  %s3960_s14 = smov 32  }
  0x32   : > { %702 = vst [vmem:[#allocation2 + $0x54] sm:$0x1] %v701_v63  ;;  %667 = vst [vmem:[#allocation2 + $0x58] sm:$0x1] %v666_v2  ;;  %s3961_s16 = smov 20   ;;  %s3962_s18 = smov 28  }
  0x33   : > { %v728_v8 = vld [vmem:[#allocation2] sm:$0xf]  ;;  %s3963_s21 = smov 16   ;;  %vm1968_vm13 = vcmask 1041408   ;;  %vm3965_vm14 = vmmov 0   ;;  %vm1844_vm15 = vcmask 31744  }
  0x34   : > { %v729_v9 = vsel %vm4185_vm6, %v4182_v5, %v728_v8  ;;  %v731_v10 = vld [vmem:[#allocation2 + $0x4] sm:$0x1]  ;;  %v734_v11 = vld [vmem:[#allocation2 + $0x8] sm:$0xf]  ;;  %v703_v8 = vld [vmem:[#allocation2 + $0x5c] sm:$0x1] }
  0x35   : > { %730 = vst [vmem:[#allocation2] sm:$0xf] %v729_v9  ;;  %v732_v12 = vsel %vm4079_vm2, %v4190_v7, %v731_v10  ;;  %v735_v13 = vsel %vm4185_vm6, %v4182_v5, %v734_v11  ;;  %v704_v11 = vsel %vm4086_vm4, 0, %v703_v8  ;;  %v833_v8 = vld [vmem:[#allocation2 + $0x20] sm:$0xf]  ;;  %vm1860_vm0 = vcmask 64512  }
  0x36   : > { %v737_v14 = vld [vmem:[#allocation2 + $0xc] sm:$0x1]  ;;  %733 = vst [vmem:[#allocation2 + $0x4] sm:$0x1] %v732_v12  ;;  %736 = vst [vmem:[#allocation2 + $0x8] sm:$0xf] %v735_v13 }
  0x37   : > { %v738_v15 = vsel %vm4079_vm2, %v4190_v7, %v737_v14  ;;  %705 = vst [vmem:[#allocation2 + $0x5c] sm:$0x1] %v704_v11  ;;  %vm1882_vm4 = vcmask 130048   ;;  %vm1893_vm5 = vcmask 162816   ;;  %vm1915_vm7 = vcmask 228352   ;;  %s3966_s23 = smov 48  }
  0x38   : > { %739 = vst [vmem:[#allocation2 + $0xc] sm:$0x1] %v738_v15  ;;  %v890_v60 = vld [vmem:[#allocation2 + $0x50] sm:$0xf]  ;;  %vm1926_vm8 = vcmask 261120   ;;  %vm1957_vm9 = vcmask 293888  }
  0x39   : > { %v891_v61 = vsel %vm4185_vm6, %v4182_v5, %v890_v60  ;;  %v893_v10 = vld [vmem:[#allocation2 + $0x54] sm:$0x1]  ;;  %v896_v15 = vld [vmem:[#allocation2 + $0x58] sm:$0xf]  ;;  %vm2089_vm10 = vcmask 57344   ;;  %s3968_s25 = smov 64  }
  0x3a   : > { %892 = vst [vmem:[#allocation2 + $0x50] sm:$0xf] %v891_v61  ;;  %v894_v12 = vsel %vm4079_vm2, %v4190_v7, %v893_v10  ;;  %s3969_s26 = smov 56   ;;  %s3700_s24 = sshll.u32 %s3944_s10, 10 }
  0x3b   : > { %895 = vst [vmem:[#allocation2 + $0x54] sm:$0x1] %v894_v12 }
  0x3c   : > { %v902_v16 = vld [vmem:[#allocation2] sm:$0xf] }
  0x3d   : > { %v1065_v17 = vld [vmem:[#allocation2] sm:$0xe]  ;;  %v903_v18 = vld [vmem:[#allocation2 + $0x8] sm:$0xf]  ;;  %v912_v20 = vld [vmem:[#allocation2 + $0x4] sm:$0x1] }
  0x3e   : > { %v926_v21 = vshrl.u32 %v902_v16, 16  ;;  %v929_v22 = vshll.u32 %v902_v16, 16  ;;  %v935_v25 = vshll.u32 %v912_v20, 16  ;;  %v940_v27 = vshrl.u32 %v903_v18, 16  ;;  %v1066_v36 = vld [vmem:[#allocation2 + $0x8] sm:$0xe] }
  0x3f   : > { %v913_v24 = vld [vmem:[#allocation2 + $0xc] sm:$0x1]  ;;  %v943_v29 = vshll.u32 %v903_v18, 16  ;;  %v3504_v31 = vrot.slane %v1065_v17, 9  ;;  %v1100_v37 = vrot.slane %v912_v20, 5  ;;  %v3505_v40 = vrot.slane %v1066_v36, 9 }
  0x40   : > { %v928_v32 = vrot.slane %v926_v21, 4  ;;  %v931_v33 = vrot.slane %v929_v22, 5  ;;  %v949_v35 = vshll.u32 %v913_v24, 16  ;;  %v942_v38 = vrot.slane %v940_v27, 4  ;;  %v4233_v9 = vld [vmem:[#allocation2 + $0x8] sm:$0xf] }
  0x41   : > { %v945_v39 = vrot.slane %v943_v29, 5  ;;  %v937_v43 = vrot.slane %v935_v25, 5  ;;  %v1101_v44 = vsel %vm4204_vm11, %v3504_v31, %v1100_v37  ;;  %v1104_v45 = vrot.slane %v913_v24, 5  ;;  %v4242_v16 = vld [vmem:[#allocation2 + $0x50] sm:$0xf] }
  0x42   : > { %v932_v42 = vor.u32 %v931_v33, %v928_v32  ;;  %v951_v48 = vrot.slane %v949_v35, 5  ;;  %v1160_v13 = vshrl.u32 %v4233_v9, 16  ;;  %v1163_v14 = vshll.u32 %v4233_v9, 16  ;;  %v1377_v3 = vld [vmem:[#allocation2 + $0x50] sm:$0xf] }
  0x43   : > { %v946_v47 = vor.u32 %v945_v39, %v942_v38  ;;  %v1105_v50 = vsel %vm4204_vm11, %v3505_v40, %v1104_v45  ;;  %v897_v17 = vsel %vm4185_vm6, %v4182_v5, %v896_v15  ;;  %v1286_v21 = vshrl.u32 %v4242_v16, 16  ;;  %v899_v24 = vld [vmem:[#allocation2 + $0x5c] sm:$0x1]  ;;  %v1149_v31 = vld [vmem:[#allocation2 + $0xc] sm:$0x1] }
  0x44   : > { %v933_v49 = vrot.slane %v932_v42, 4  ;;  %v3544_v53 = vcombine.low %v1101_v44, %v1105_v50  ;;  %898 = vst [vmem:[#allocation2 + $0x58] sm:$0xf] %v897_v17  ;;  %v1162_v18 = vrot.slane %v1160_v13, 4  ;;  %v1165_v20 = vrot.slane %v1163_v14, 5 }
  0x45   : > { %v947_v51 = vrot.slane %v946_v47, 4  ;;  %v1289_v22 = vshll.u32 %v4242_v16, 16  ;;  %v1502_v25 = vshrl.u32 %v1377_v3, 16  ;;  %v1505_v27 = vshll.u32 %v1377_v3, 16  ;;  %v1299_v5 = vld [vmem:[#allocation2 + $0x8] sm:$0xe] }
  0x46   : > { %v938_v54 = vsel %vm4212_vm12, %v933_v49, %v937_v43  ;;  %1664 = vrot.lane.b32.xlu1 %v3544_v53, %s3956_s1  ;;  %v900_v29 = vsel %vm4079_vm2, %v4190_v7, %v899_v24  ;;  %v1166_v32 = vor.u32 %v1165_v20, %v1162_v18  ;;  %v1169_v33 = vshll.u32 %v1149_v31, 16  ;;  %v4258_v47 = vld [vmem:[#allocation2 + $0x50] sm:$0xe]  ;;  %v4260_v49 = vld [vmem:[#allocation2 + $0x54] sm:$0x1] }
  0x47   : > { %v952_v55 = vsel %vm4212_vm12, %v947_v51, %v951_v48  ;;  %901 = vst [vmem:[#allocation2 + $0x5c] sm:$0x1] %v900_v29  ;;  %v1288_v35 = vrot.slane %v1286_v21, 4  ;;  %v1291_v36 = vrot.slane %v1289_v22, 5  ;;  %v1504_v37 = vrot.slane %v1502_v25, 4 }
  0x48   : > { %v3539_v56 = vcombine.low %v938_v54, %v952_v55  ;;  %v1507_v38 = vrot.slane %v1505_v27, 5  ;;  %v3514_v39 = vrot.slane %v1299_v5, 9  ;;  %v1331_v40 = vrot.slane %v1149_v31, 5  ;;  %v4262_v50 = vld [vmem:[#allocation2 + $0x50] sm:$0xe] }
  0x49   : > { %v4252_v42 = vrot.slane %v1166_v32, 4  ;;  %v4254_v43 = vrot.slane %v1169_v33, 5  ;;  %v1292_v44 = vor.u32 %v1291_v36, %v1288_v35  ;;  %5451 = vst [vmem:[#allocation7_spill] sm:$0xff] %v4262_v50  ;;  %v4274_v58 = vld [vmem:[#allocation2 + $0x54] sm:$0x1]  ;;  %v1367_v12 = vrot.slane %v4260_v49, 5 }
  0x4a   : > { %1639 = vrot.lane.b32.xlu0 %v3539_v56, %s3957_s27  ;;  %v1508_v7 = vor.u32 %v1507_v38, %v1504_v37  ;;  %v4267_v54 = vsel %vm4204_vm11, %v3514_v39, %v1331_v40  ;;  %v1295_v56 = vshll.u32 %v4260_v49, 16  ;;  %5452 = vst [vmem:[#allocation8_spill] sm:$0xff] %v4274_v58  ;;  %v836_v14 = vld [vmem:[#allocation2 + $0x24] sm:$0x1]  ;;  %v821_v21 = vld [vmem:[#allocation2 + $0x10] sm:$0xf] }
  0x4b   : > { %v4256_v45 = vld [vmem:[#allocation2 + $0x58] sm:$0xf]  ;;  %v4279_v61 = vrot.slane %v1292_v44, 4  ;;  %v824_v32 = vld [vmem:[#allocation2 + $0x14] sm:$0x1] }
  0x4c   : > { %v1516_v60 = vshrl.u32 %v4256_v45, 16  ;;  %v4281_v1 = vrot.slane %v1508_v7, 4  ;;  %v1519_v18 = vshll.u32 %v4256_v45, 16  ;;  %v4289_v20 = vrot.slane %v1295_v56, 5  ;;  %v839_v44 = vld [vmem:[#allocation2 + $0x28] sm:$0xf] }
  0x4d   : > { %5453 = vst [vmem:[#allocation9_spill] sm:$0xff] %v4279_v61  ;;  %v842_v56 = vld [vmem:[#allocation2 + $0x2c] sm:$0x1] }
  0x4e   : > { %5454 = vst [vmem:[#allocation10_spill] sm:$0xff] %v4281_v1  ;;  %5455 = vst [vmem:[#allocation11_spill] sm:$0xff] %v4289_v20  ;;  %v4292_v27 = vrot.slane %v1516_v60, 4 }
  0x50   : > { %5456 = vst [vmem:[#allocation12_spill] sm:$0xff] %v4292_v27 }
  0x93   : > { %v560_v48 = vpop.permute.xlu1 %559 }
  0x94   : > { %v581_v51 = vmax.bf16 %v560_v48, %v4110_v19  ;;  %v556_v53 = vpop.permute.xlu0 %555  ;;  %v3523_v19 = vrot.slane %v4258_v47, 9 }
  0x95   : > { %v579_v59 = vmax.bf16 %v556_v53, %v4115_v23 }
  0x96   : > { %v757_v62 = vshrl.u32 %v581_v51, 16  ;;  %v760_v63 = vshll.u32 %v581_v51, 16 }
  0x97   : > { %v741_v10 = vshrl.u32 %v579_v59, 16  ;;  %v562_v11 = vpop.permute.xlu1 %561  ;;  %v744_v24 = vshll.u32 %v579_v59, 16  ;;  %v827_v59 = vld [vmem:[#allocation2 + $0x18] sm:$0xf] }
  0x98   : > { %v759_v15 = vrot.slane %v757_v62, 7  ;;  %v582_v17 = vmax.bf16 %v562_v11, %v4121_v26  ;;  %v558_v3 = vpop.permute.xlu0 %557 }
  0x99   : > { %v743_v22 = vrot.slane %v741_v10, 7  ;;  %v580_v25 = vmax.bf16 %v558_v3, %v4125_v28  ;;  %v830_v10 = vld [vmem:[#allocation2 + $0x1c] sm:$0x1] }
  0x9a   : > { %v762_v29 = vor.u32 %v760_v63, %v759_v15  ;;  %v763_v31 = vrot.slane %v759_v15, 4  ;;  %v765_v33 = vshrl.u32 %v582_v17, 16  ;;  %v768_v5 = vshll.u32 %v582_v17, 16 }
  0x9b   : > { %v746_v35 = vor.u32 %v744_v24, %v743_v22  ;;  %v747_v36 = vrot.slane %v743_v22, 4  ;;  %v749_v26 = vshrl.u32 %v580_v25, 16  ;;  %v752_v37 = vshll.u32 %v580_v25, 16  ;;  %v566_v38 = vpop.permute.xlu1 %565  ;;  %v851_v25 = vld [vmem:[#allocation2 + $0x38] sm:$0xf] }
  0x9c   : > { %v834_v39 = vsel %vm4185_vm6, %v762_v29, %v833_v8  ;;  %v837_v40 = vsel %vm4079_vm2, %v763_v31, %v836_v14  ;;  %v767_v28 = vrot.slane %v765_v33, 7  ;;  %v584_v7 = vmax.bf16 %v566_v38, %v4133_v34  ;;  %v564_v48 = vpop.permute.xlu0 %563 }
  0x9d   : > { %835 = vst [vmem:[#allocation2 + $0x20] sm:$0xf] %v834_v39  ;;  %838 = vst [vmem:[#allocation2 + $0x24] sm:$0x1] %v837_v40  ;;  %v822_v51 = vsel %vm4185_vm6, %v746_v35, %v821_v21  ;;  %v825_v53 = vsel %vm4079_vm2, %v747_v36, %v824_v32  ;;  %v751_v60 = vrot.slane %v749_v26, 7  ;;  %v583_v62 = vmax.bf16 %v564_v48, %v4145_v41 }
  0x9e   : > { %823 = vst [vmem:[#allocation2 + $0x10] sm:$0xf] %v822_v51  ;;  %826 = vst [vmem:[#allocation2 + $0x14] sm:$0x1] %v825_v53  ;;  %v770_v63 = vor.u32 %v768_v5, %v767_v28  ;;  %v771_v8 = vrot.slane %v767_v28, 4  ;;  %v781_v34 = vshrl.u32 %v584_v7, 16 }
  0x9f   : > { %v784_v11 = vshll.u32 %v584_v7, 16  ;;  %v754_v14 = vor.u32 %v752_v37, %v751_v60  ;;  %v755_v15 = vrot.slane %v751_v60, 4  ;;  %v773_v17 = vshrl.u32 %v583_v62, 16  ;;  %v570_v21 = vpop.permute.xlu1 %569  ;;  %v854_v5 = vld [vmem:[#allocation2 + $0x3c] sm:$0x1] }
  0xa0   : > { %v776_v3 = vshll.u32 %v583_v62, 16  ;;  %v840_v22 = vsel %vm4185_vm6, %v770_v63, %v839_v44  ;;  %v843_v24 = vsel %vm4079_vm2, %v771_v8, %v842_v56  ;;  %v783_v41 = vrot.slane %v781_v34, 7  ;;  %v568_v29 = vpop.permute.xlu0 %567  ;;  %v845_v35 = vld [vmem:[#allocation2 + $0x30] sm:$0xf]  ;;  %v848_v39 = vld [vmem:[#allocation2 + $0x34] sm:$0x1] }
  0xa1   : > { %v586_v31 = vmax.bf16 %v570_v21, %v4157_v52  ;;  %841 = vst [vmem:[#allocation2 + $0x28] sm:$0xf] %v840_v22  ;;  %844 = vst [vmem:[#allocation2 + $0x2c] sm:$0x1] %v843_v24  ;;  %v828_v32 = vsel %vm4185_vm6, %v754_v14, %v827_v59  ;;  %v831_v33 = vsel %vm4079_vm2, %v755_v15, %v830_v10  ;;  %v775_v36 = vrot.slane %v773_v17, 7 }
  0xa2   : > { %v585_v26 = vmax.bf16 %v568_v29, %v4165_v57  ;;  %829 = vst [vmem:[#allocation2 + $0x18] sm:$0xf] %v828_v32  ;;  %832 = vst [vmem:[#allocation2 + $0x1c] sm:$0x1] %v831_v33  ;;  %v786_v37 = vor.u32 %v784_v11, %v783_v41  ;;  %v787_v38 = vrot.slane %v783_v41, 4  ;;  %v4320_v62 = vrot.slane %v1519_v18, 5 }
  0xa3   : > { %v797_v40 = vshrl.u32 %v586_v31, 16  ;;  %v800_v52 = vshll.u32 %v586_v31, 16  ;;  %v778_v44 = vor.u32 %v776_v3, %v775_v36  ;;  %v779_v28 = vrot.slane %v775_v36, 4  ;;  %v863_v51 = vld [vmem:[#allocation2 + $0x48] sm:$0xf] }
  0xa4   : > { %v789_v7 = vshrl.u32 %v585_v26, 16  ;;  %v792_v48 = vshll.u32 %v585_v26, 16  ;;  %v852_v53 = vsel %vm4185_vm6, %v786_v37, %v851_v25  ;;  %v855_v56 = vsel %vm4079_vm2, %v787_v38, %v854_v5  ;;  %v866_v59 = vld [vmem:[#allocation2 + $0x4c] sm:$0x1]  ;;  %v1142_v60 = vld [vmem:[#allocation2 + $0x20] sm:$0xf] }
  0xa5   : > { %v799_v57 = vrot.slane %v797_v40, 7  ;;  %5457 = vst [vmem:[#allocation13_spill] sm:$0xff] %v4320_v62  ;;  %853 = vst [vmem:[#allocation2 + $0x38] sm:$0xf] %v852_v53  ;;  %v846_v63 = vsel %vm4185_vm6, %v778_v44, %v845_v35  ;;  %v849_v8 = vsel %vm4079_vm2, %v779_v28, %v848_v39  ;;  %v1140_v34 = vld [vmem:[#allocation2 + $0x10] sm:$0xf] }
  0xa6   : > { %856 = vst [vmem:[#allocation2 + $0x3c] sm:$0x1] %v855_v56  ;;  %v791_v10 = vrot.slane %v789_v7, 7  ;;  %v1369_v11 = vld [vmem:[#allocation2 + $0x10] sm:$0xf]  ;;  %v1202_v14 = vshrl.u32 %v1142_v60, 16  ;;  %v3549_v18 = vcombine.low %v4233_v9, %v1140_v34 }
  0xa7   : > { %847 = vst [vmem:[#allocation2 + $0x30] sm:$0xf] %v846_v63  ;;  %850 = vst [vmem:[#allocation2 + $0x34] sm:$0x1] %v849_v8  ;;  %v857_v15 = vld [vmem:[#allocation2 + $0x40] sm:$0xf]  ;;  %v802_v3 = vor.u32 %v800_v52, %v799_v57 }
  0xa8   : > { %v860_v17 = vld [vmem:[#allocation2 + $0x44] sm:$0x1]  ;;  %v803_v45 = vrot.slane %v799_v57, 4  ;;  %v1174_v21 = vshrl.u32 %v1140_v34, 16  ;;  %v794_v22 = vor.u32 %v792_v48, %v791_v10  ;;  %v795_v24 = vrot.slane %v791_v10, 4  ;;  %1699 = vrot.lane.b32.xlu0 %v3549_v18, %s3958_s2 }
  0xa9   : > { %v1177_v25 = vshll.u32 %v1140_v34, 16  ;;  %v1390_v41 = vshrl.u32 %v1369_v11, 16  ;;  %v864_v29 = vsel %vm4185_vm6, %v802_v3, %v863_v51  ;;  %v1393_v33 = vshll.u32 %v1369_v11, 16  ;;  %v1371_v5 = vld [vmem:[#allocation2 + $0x20] sm:$0xf] }
  0xaa   : > { %v867_v31 = vsel %vm4079_vm2, %v803_v45, %v866_v59  ;;  %v4332_v32 = vrot.slane %v1174_v21, 4  ;;  %v858_v9 = vsel %vm4185_vm6, %v794_v22, %v857_v15  ;;  %v861_v35 = vsel %vm4079_vm2, %v795_v24, %v860_v17  ;;  %865 = vst [vmem:[#allocation2 + $0x48] sm:$0xf] %v864_v29  ;;  %v1370_v26 = vld [vmem:[#allocation2 + $0x18] sm:$0xf] }
  0xab   : > { %868 = vst [vmem:[#allocation2 + $0x4c] sm:$0x1] %v867_v31  ;;  %v4338_v36 = vrot.slane %v1177_v25, 5  ;;  %v4340_v37 = vrot.slane %v1390_v41, 4  ;;  %v1141_v38 = vld [vmem:[#allocation2 + $0x18] sm:$0xf]  ;;  %v3564_v40 = vcombine.low %v1369_v11, %v1370_v26 }
  0xac   : > { %859 = vst [vmem:[#allocation2 + $0x40] sm:$0xf] %v858_v9  ;;  %862 = vst [vmem:[#allocation2 + $0x44] sm:$0x1] %v861_v35  ;;  %v4342_v39 = vrot.slane %v1393_v33, 5  ;;  %v1404_v52 = vshrl.u32 %v1370_v26, 16  ;;  %v3550_v7 = vcombine.low %v1141_v38, %v1142_v60 }
  0xad   : > { %v1407_v44 = vshll.u32 %v1370_v26, 16  ;;  %v1372_v6 = vld [vmem:[#allocation2 + $0x28] sm:$0xf]  ;;  %v4344_v28 = vrot.slane %v1202_v14, 4  ;;  %v1205_v0 = vshll.u32 %v1142_v60, 16  ;;  %v1188_v48 = vshrl.u32 %v1141_v38, 16  ;;  %1784 = vrot.lane.b32.xlu1 %v3564_v40, %s3959_s13 }
  0xae   : > { %v4347_v51 = vrot.slane %v1404_v52, 4  ;;  %v1191_v56 = vshll.u32 %v1141_v38, 16  ;;  %v1418_v59 = vshrl.u32 %v1371_v5, 16  ;;  %v1143_v57 = vld [vmem:[#allocation2 + $0x28] sm:$0xf]  ;;  %1701 = vrot.lane.b32.xlu0 %v3550_v7, %s3958_s2  ;;  %v1421_v10 = vshll.u32 %v1371_v5, 16 }
  0xaf   : > { %v4349_v53 = vrot.slane %v1407_v44, 5  ;;  %v4351_v63 = vrot.slane %v1205_v0, 5  ;;  %v4354_v8 = vrot.slane %v1188_v48, 4  ;;  %v1432_v34 = vshrl.u32 %v1372_v6, 16  ;;  %v1144_v60 = vld [vmem:[#allocation2 + $0x30] sm:$0xf] }
  0xb0   : > { %v4356_v11 = vrot.slane %v1191_v56, 5  ;;  %v4358_v14 = vrot.slane %v1418_v59, 4  ;;  %v1435_v15 = vshll.u32 %v1372_v6, 16  ;;  %v3565_v17 = vcombine.low %v1371_v5, %v1372_v6  ;;  %v1374_v3 = vld [vmem:[#allocation2 + $0x38] sm:$0xf] }
  0xb1   : > { %v4360_v45 = vrot.slane %v1421_v10, 5  ;;  %v4362_v18 = vrot.slane %v1432_v34, 4  ;;  %v1216_v21 = vshrl.u32 %v1143_v57, 16  ;;  %v1219_v22 = vshll.u32 %v1143_v57, 16  ;;  %v1373_v24 = vld [vmem:[#allocation2 + $0x30] sm:$0xf] }
  0xb2   : > { %v4364_v25 = vrot.slane %v1435_v15, 5  ;;  %1786 = vrot.lane.b32.xlu1 %v3565_v17, %s3959_s13  ;;  %v3551_v41 = vcombine.low %v1143_v57, %v1144_v60  ;;  %v1230_v29 = vshrl.u32 %v1144_v60, 16  ;;  %v1233_v31 = vshll.u32 %v1144_v60, 16  ;;  %v1145_v33 = vld [vmem:[#allocation2 + $0x38] sm:$0xf] }
  0xb3   : > { %v1529_v9 = vld [vmem:[#allocation2 + $0x10] sm:$0xe]  ;;  %v4367_v35 = vrot.slane %v1216_v21, 4  ;;  %v4369_v5 = vrot.slane %v1219_v22, 5  ;;  %v1460_v26 = vshrl.u32 %v1374_v3, 16  ;;  %v1463_v38 = vshll.u32 %v1374_v3, 16 }
  0xb4   : > { %v4371_v40 = vld [vmem:[#allocation2 + $0x40] sm:$0xf]  ;;  %v4373_v52 = vld [vmem:[#allocation2 + $0x14] sm:$0x1]  ;;  %v1530_v44 = vld [vmem:[#allocation2 + $0x18] sm:$0xe]  ;;  %1703 = vrot.lane.b32.xlu0 %v3551_v41, %s3958_s2  ;;  %v3566_v7 = vcombine.low %v1373_v24, %v1374_v3 }
  0xb5   : > { %v4376_v6 = vrot.slane %v1230_v29, 4  ;;  %v4378_v0 = vrot.slane %v1233_v31, 5  ;;  %v1446_v48 = vshrl.u32 %v1373_v24, 16  ;;  %v4380_v56 = vld [vmem:[#allocation2 + $0x1c] sm:$0x1]  ;;  %v4384_v10 = vrot.slane %v1460_v26, 4 }
  0xb6   : > { %v4382_v59 = vld [vmem:[#allocation2 + $0x14] sm:$0x1]  ;;  %v1300_v57 = vld [vmem:[#allocation2 + $0x10] sm:$0xe]  ;;  %v4386_v34 = vrot.slane %v1463_v38, 5  ;;  %v1449_v60 = vshll.u32 %v1373_v24, 16  ;;  %1788 = vrot.lane.b32.xlu1 %v3566_v7, %s3959_s13  ;;  %v3552_v22 = vcombine.low %v1145_v33, %v4371_v40  ;;  %v4401_v24 = vsel %vm4204_vm11, %v3523_v19, %v1367_v12 }
  0xb7   : > { %v1244_v15 = vshrl.u32 %v1145_v33, 16  ;;  %v4388_v17 = vld [vmem:[#allocation2 + $0x14] sm:$0x1]  ;;  %v1247_v21 = vshll.u32 %v1145_v33, 16  ;;  %v1258_v3 = vshrl.u32 %v4371_v40, 16  ;;  %5458 = vst [vmem:[#allocation14_spill] sm:$0xff] %v4401_v24 }
  0xb8   : > { %v4393_v41 = vld [vmem:[#allocation2 + $0x1c] sm:$0x1]  ;;  %v1067_v29 = vld [vmem:[#allocation2 + $0x10] sm:$0xe]  ;;  %v4403_v31 = vrot.slane %v1446_v48, 4  ;;  %v4405_v26 = vrot.slane %v1449_v60, 5  ;;  %1705 = vrot.lane.b32.xlu0 %v3552_v22, %s3958_s2 }
  0xb9   : > { %v4407_v38 = vrot.slane %v1244_v15, 4  ;;  %v3524_v33 = vrot.slane %v1529_v9, 9  ;;  %v1068_v7 = vld [vmem:[#allocation2 + $0x18] sm:$0xe]  ;;  %v4409_v4 = vrot.slane %v1247_v21, 5  ;;  %v1561_v47 = vrot.slane %v4373_v52, 5 }
  0xba   : > { %v3525_v2 = vrot.slane %v1530_v44, 9  ;;  %v4414_v23 = vld [vmem:[#allocation2 + $0x1c] sm:$0x1]  ;;  %v4416_v19 = vrot.slane %v1258_v3, 4  ;;  %v1565_v12 = vrot.slane %v4380_v56, 5  ;;  %v3515_v48 = vrot.slane %v1300_v57, 9 }
  0xbb   : > { %v1335_v60 = vrot.slane %v4382_v59, 5  ;;  %v4420_v9 = vld [vmem:[#allocation2 + $0x24] sm:$0x1]  ;;  %v1562_v15 = vsel %vm4204_vm11, %v3524_v33, %v1561_v47  ;;  %v3506_v21 = vrot.slane %v1067_v29, 9  ;;  %v1108_v22 = vrot.slane %v4388_v17, 5 }
  0xbc   : > { %5459 = vst [vmem:[#allocation15_spill] sm:$0xff] %v4416_v19  ;;  %v3507_v13 = vrot.slane %v1068_v7, 9  ;;  %v1301_v55 = vld [vmem:[#allocation2 + $0x18] sm:$0xe]  ;;  %v1566_v44 = vsel %vm4204_vm11, %v3525_v2, %v1565_v12  ;;  %v1112_v57 = vrot.slane %v4393_v41, 5  ;;  %v1339_v7 = vrot.slane %v4414_v23, 5 }
  0xbd   : > { %v1336_v3 = vsel %vm4204_vm11, %v3515_v48, %v1335_v60  ;;  %v1302_v49 = vld [vmem:[#allocation2 + $0x20] sm:$0xe]  ;;  %v3516_v24 = vrot.slane %v1301_v55, 9  ;;  %v4430_v1 = vld [vmem:[#allocation2 + $0x24] sm:$0x1]  ;;  %v3574_v50 = vcombine.low %v1562_v15, %v1566_v44  ;;  %v1109_v29 = vsel %vm4204_vm11, %v3506_v21, %v1108_v22 }
  0xbe   : > { %v3559_v33 = vcombine.low %v4267_v54, %v1336_v3  ;;  %v4436_v47 = vld [vmem:[#allocation2 + $0x2c] sm:$0x1]  ;;  %v1531_v2 = vld [vmem:[#allocation2 + $0x20] sm:$0xe]  ;;  %v1113_v12 = vsel %vm4204_vm11, %v3507_v13, %v1112_v57  ;;  %v3517_v48 = vrot.slane %v1302_v49, 9  ;;  %v1343_v60 = vrot.slane %v4420_v9, 5 }
  0xbf   : > { %v1532_v55 = vld [vmem:[#allocation2 + $0x28] sm:$0xe]  ;;  %v3526_v61 = vrot.slane %v1531_v2, 9  ;;  %1834 = vrot.lane.b32.xlu1 %v3574_v50, %s3960_s14  ;;  %v3545_v54 = vcombine.low %v1109_v29, %v1113_v12  ;;  %v1340_v15 = vsel %vm4204_vm11, %v3516_v24, %v1339_v7  ;;  %v1569_v21 = vrot.slane %v4430_v1, 5  ;;  %v4446_v44 = vld [vmem:[#allocation2 + $0x2c] sm:$0x1] }
  0xc0   : > { %1749 = vrot.lane.b32.xlu0 %v3559_v33, %s3961_s16  ;;  %v3527_v22 = vrot.slane %v1532_v55, 9  ;;  %v4448_v13 = vld [vmem:[#allocation2 + $0x34] sm:$0x1]  ;;  %v1344_v49 = vsel %vm4204_vm11, %v3517_v48, %v1343_v60  ;;  %v1573_v3 = vrot.slane %v4436_v47, 5  ;;  %v1303_v50 = vld [vmem:[#allocation2 + $0x28] sm:$0xe]  ;;  %v1396_v29 = vor.u32 %v4342_v39, %v4340_v37 }
  0xc1   : > { %v1304_v57 = vld [vmem:[#allocation2 + $0x30] sm:$0xe]  ;;  %v1347_v33 = vrot.slane %v4446_v44, 5  ;;  %v3560_v24 = vcombine.low %v1340_v15, %v1344_v49  ;;  %v1570_v7 = vsel %vm4204_vm11, %v3526_v61, %v1569_v21  ;;  %v3518_v2 = vrot.slane %v1303_v50, 9  ;;  %v4458_v55 = vld [vmem:[#allocation2 + $0x24] sm:$0x1] }
  0xc2   : > { %v3519_v12 = vrot.slane %v1304_v57, 9  ;;  %v4460_v20 = vld [vmem:[#allocation2 + $0x2c] sm:$0x1]  ;;  %v1574_v48 = vsel %vm4204_vm11, %v3527_v22, %v1573_v3  ;;  %v1351_v60 = vrot.slane %v4448_v13, 5  ;;  %v1069_v58 = vld [vmem:[#allocation2 + $0x20] sm:$0xe]  ;;  %v1410_v37 = vor.u32 %v4349_v53, %v4347_v51 }
  0xc3   : > { %v1070_v62 = vld [vmem:[#allocation2 + $0x28] sm:$0xe]  ;;  %v1116_v27 = vrot.slane %v4458_v55, 5  ;;  %1666 = vrot.lane.b32.xlu1 %v3545_v54, %s3956_s1  ;;  %v3575_v61 = vcombine.low %v1570_v7, %v1574_v48  ;;  %v1348_v39 = vsel %vm4204_vm11, %v3518_v2, %v1347_v33  ;;  %v3508_v15 = vrot.slane %v1069_v58, 9  ;;  %v4472_v22 = vld [vmem:[#allocation2 + $0x3c] sm:$0x1] }
  0xc4   : > { %1751 = vrot.lane.b32.xlu0 %v3560_v24, %s3961_s16  ;;  %v3509_v21 = vrot.slane %v1070_v62, 9  ;;  %5460 = vst [vmem:[#allocation16_spill] sm:$0xff] %v4472_v22  ;;  %v4474_v49 = vld [vmem:[#allocation2 + $0x44] sm:$0x1]  ;;  %v1352_v3 = vsel %vm4204_vm11, %v3519_v12, %v1351_v60  ;;  %v1120_v50 = vrot.slane %v4460_v20, 5  ;;  %v1355_v54 = vrot.slane %v4472_v22, 5 }
  0xc5   : > { %5461 = vst [vmem:[#allocation17_spill] sm:$0xff] %v4474_v49  ;;  %v1305_v51 = vld [vmem:[#allocation2 + $0x38] sm:$0xe]  ;;  %v1306_v53 = vld [vmem:[#allocation2 + $0x40] sm:$0xe]  ;;  %v3561_v24 = vcombine.low %v1348_v39, %v1352_v3  ;;  %v1117_v58 = vsel %vm4204_vm11, %v3508_v15, %v1116_v27  ;;  %v1359_v48 = vrot.slane %v4474_v49, 5  ;;  %v1424_v39 = vor.u32 %v4360_v45, %v4358_v14 }
  0xc6   : > { %v3520_v62 = vrot.slane %v1305_v51, 9  ;;  %v3521_v33 = vrot.slane %v1306_v53, 9  ;;  %v4484_v7 = vld [vmem:[#allocation2 + $0x34] sm:$0x1]  ;;  %v4486_v2 = vld [vmem:[#allocation2 + $0x3c] sm:$0x1]  ;;  %v1121_v12 = vsel %vm4204_vm11, %v3509_v21, %v1120_v50 }
  0xc7   : > { %v1533_v60 = vld [vmem:[#allocation2 + $0x30] sm:$0xe]  ;;  %v1534_v19 = vld [vmem:[#allocation2 + $0x38] sm:$0xe]  ;;  %v1577_v22 = vrot.slane %v4484_v7, 5  ;;  %1836 = vrot.lane.b32.xlu1 %v3575_v61, %s3960_s14  ;;  %v3546_v27 = vcombine.low %v1117_v58, %v1121_v12  ;;  %v1581_v57 = vrot.slane %v4486_v2, 5 }
  0xc8   : > { %1753 = vrot.lane.b32.xlu0 %v3561_v24, %s3961_s16  ;;  %v1356_v15 = vsel %vm4204_vm11, %v3520_v62, %v1355_v54  ;;  %v3528_v3 = vrot.slane %v1533_v60, 9  ;;  %v3529_v51 = vrot.slane %v1534_v19, 9  ;;  %v4498_v21 = vld [vmem:[#allocation2 + $0x34] sm:$0x1]  ;;  %v4500_v50 = vld [vmem:[#allocation2 + $0x3c] sm:$0x1]  ;;  %v1360_v53 = vsel %vm4204_vm11, %v3521_v33, %v1359_v48 }
  0xc9   : > { %v1397_v14 = vrot.slane %v1396_v29, 4  ;;  %v1399_v45 = vshll.u32 %v4373_v52, 16  ;;  %v1071_v61 = vld [vmem:[#allocation2 + $0x30] sm:$0xe]  ;;  %v3562_v24 = vcombine.low %v1356_v15, %v1360_v53  ;;  %v1411_v54 = vrot.slane %v1410_v37, 4 }
  0xca   : > { %v1578_v58 = vsel %vm4204_vm11, %v3528_v3, %v1577_v22  ;;  %v1413_v19 = vshll.u32 %v4380_v56, 16  ;;  %v1072_v62 = vld [vmem:[#allocation2 + $0x38] sm:$0xe]  ;;  %v4509_v12 = vld [vmem:[#allocation2 + $0x10] sm:$0xf]  ;;  %v1582_v60 = vsel %vm4204_vm11, %v3529_v51, %v1581_v57  ;;  %v3510_v48 = vrot.slane %v1071_v61, 9 }
  0xcb   : > { %v1401_v33 = vrot.slane %v1399_v45, 5  ;;  %v1124_v29 = vrot.slane %v4498_v21, 5  ;;  %v4514_v49 = vld [vmem:[#allocation2 + $0x18] sm:$0xf]  ;;  %1668 = vrot.lane.b32.xlu1 %v3546_v27, %s3956_s1  ;;  %v3576_v52 = vcombine.low %v1578_v58, %v1582_v60  ;;  %v3511_v22 = vrot.slane %v1072_v62, 9 }
  0xcc   : > { %1755 = vrot.lane.b32.xlu0 %v3562_v24, %s3961_s16  ;;  %v1415_v37 = vrot.slane %v1413_v19, 5  ;;  %v1128_v56 = vrot.slane %v4500_v50, 5  ;;  %v954_v3 = vshrl.u32 %v4509_v12, 16  ;;  %v957_v51 = vshll.u32 %v4509_v12, 16 }
  0xcd   : > { %v1402_v15 = vsel %vm4212_vm12, %v1397_v14, %v1401_v33  ;;  %v1125_v57 = vsel %vm4204_vm11, %v3510_v48, %v1124_v29  ;;  %v963_v45 = vshll.u32 %v4388_v17, 16  ;;  %v968_v61 = vshrl.u32 %v4514_v49, 16  ;;  %v1376_v29 = vld [vmem:[#allocation2 + $0x48] sm:$0xf] }
  0xce   : > { %v1416_v27 = vsel %vm4212_vm12, %v1411_v54, %v1415_v37  ;;  %v1129_v53 = vsel %vm4204_vm11, %v3511_v22, %v1128_v56  ;;  %v5462_v24 = vshll.u32 %v4371_v40, 16  ;;  %v956_v19 = vrot.slane %v954_v3, 4 }
  0xcf   : > { %v3569_v58 = vcombine.low %v1402_v15, %v1416_v27  ;;  %v959_v62 = vrot.slane %v957_v51, 5  ;;  %1838 = vrot.lane.b32.xlu1 %v3576_v52, %s3960_s14  ;;  %v3547_v60 = vcombine.low %v1125_v57, %v1129_v53  ;;  %v965_v33 = vrot.slane %v963_v45, 5 }
  0xd0   : > { %v4533_v14 = vrot.slane %v5462_v24, 5  ;;  %v970_v48 = vrot.slane %v968_v61, 4  ;;  %v971_v54 = vshll.u32 %v4514_v49, 16  ;;  %v977_v37 = vshll.u32 %v4393_v41, 16 }
  0xd1   : > { %1809 = vrot.lane.b32.xlu0 %v3569_v58, %s3962_s18  ;;  %v960_v17 = vor.u32 %v959_v62, %v956_v19  ;;  %v5463_v40 = vor.u32 %v4338_v36, %v4332_v32  ;;  %v1183_v56 = vshll.u32 %v4382_v59, 16  ;;  %v1425_v52 = vrot.slane %v1424_v39, 4  ;;  %v1375_v36 = vld [vmem:[#allocation2 + $0x40] sm:$0xf] }
  0xd2   : > { %v973_v15 = vrot.slane %v971_v54, 5  ;;  %v1427_v57 = vshll.u32 %v4430_v1, 16  ;;  %v1438_v3 = vor.u32 %v4364_v25, %v4362_v18  ;;  %v1441_v53 = vshll.u32 %v4436_v47, 16  ;;  %v4552_v25 = vld [vmem:[#allocation2 + $0x20] sm:$0xf] }
  0xd3   : > { %v1181_v22 = vrot.slane %v5463_v40, 4  ;;  %v961_v51 = vrot.slane %v960_v17, 4  ;;  %v1185_v27 = vrot.slane %v1183_v56, 5  ;;  %v1488_v45 = vshrl.u32 %v1376_v29, 16  ;;  %1670 = vrot.lane.b32.xlu1 %v3547_v60, %s3956_s1 }
  0xd4   : > { %v974_v41 = vor.u32 %v973_v15, %v970_v48  ;;  %v1429_v61 = vrot.slane %v1427_v57, 5  ;;  %v1439_v32 = vrot.slane %v1438_v3, 4  ;;  %v1491_v24 = vshll.u32 %v1376_v29, 16 }
  0xd5   : > { %v966_v59 = vsel %vm4212_vm12, %v961_v51, %v965_v33  ;;  %v979_v39 = vrot.slane %v977_v37, 5  ;;  %v1186_v1 = vsel %vm4212_vm12, %v1181_v22, %v1185_v27  ;;  %v1443_v18 = vrot.slane %v1441_v53, 5  ;;  %v4567_v37 = vld [vmem:[#allocation2 + $0x28] sm:$0xf] }
  0xd6   : > { %v975_v58 = vrot.slane %v974_v41, 4  ;;  %v5464_v47 = vsel %vm4212_vm12, %v4252_v42, %v4254_v43  ;;  %v1430_v62 = vsel %vm4212_vm12, %v1425_v52, %v1429_v61  ;;  %v4561_v60 = vrot.slane %v1488_v45, 4 }
  0xd7   : > { %v3554_v19 = vcombine.low %v5464_v47, %v1186_v1  ;;  %v1444_v33 = vsel %vm4212_vm12, %v1439_v32, %v1443_v18  ;;  %v4565_v48 = vrot.slane %v1491_v24, 5  ;;  %v3567_v54 = vcombine.low %v1375_v36, %v1376_v29  ;;  %v4584_v32 = vld [vmem:[#allocation2 + $0x48] sm:$0xf] }
  0xd8   : > { %v1474_v17 = vshrl.u32 %v1375_v36, 16  ;;  %v980_v40 = vsel %vm4212_vm12, %v975_v58, %v979_v39  ;;  %v1477_v42 = vshll.u32 %v1375_v36, 16  ;;  %v982_v43 = vshrl.u32 %v4552_v25, 16  ;;  %v4589_v39 = vld [vmem:[#allocation2 + $0x44] sm:$0x1] }
  0xd9   : > { %1724 = vrot.lane.b32.xlu1 %v3554_v19, %s3963_s21  ;;  %v985_v22 = vshll.u32 %v4552_v25, 16  ;;  %v3540_v56 = vcombine.low %v966_v59, %v980_v40  ;;  %v3570_v15 = vcombine.low %v1430_v62, %v1444_v33  ;;  %v991_v29 = vshll.u32 %v4458_v55, 16  ;;  %v1536_v62 = vld [vmem:[#allocation2 + $0x48] sm:$0xe] }
  0xda   : > { %v4574_v52 = vrot.slane %v1474_v17, 4  ;;  %v984_v57 = vrot.slane %v982_v43, 4  ;;  %v996_v51 = vshrl.u32 %v4567_v37, 16  ;;  %v999_v27 = vshll.u32 %v4567_v37, 16  ;;  %v4599_v17 = vld [vmem:[#allocation2 + $0x4c] sm:$0x1] }
  0xdb   : > { %v987_v3 = vrot.slane %v985_v22, 5  ;;  %1641 = vrot.lane.b32.xlu0 %v3540_v56, %s3957_s27  ;;  %v993_v53 = vrot.slane %v991_v29, 5  ;;  %v1005_v45 = vshll.u32 %v4460_v20, 16  ;;  %v1194_v41 = vor.u32 %v4356_v11, %v4354_v8  ;;  %v1535_v8 = vld [vmem:[#allocation2 + $0x40] sm:$0xe] }
  0xdc   : > { %v1197_v61 = vshll.u32 %v4414_v23, 16  ;;  %v998_v36 = vrot.slane %v996_v51, 4  ;;  %v1001_v24 = vrot.slane %v999_v27, 5  ;;  %v1208_v59 = vor.u32 %v4351_v63, %v4344_v28 }
  0xdd   : > { %1790 = vrot.lane.b32.xlu1 %v3567_v54, %s3959_s13  ;;  %v988_v55 = vor.u32 %v987_v3, %v984_v57  ;;  %v1007_v1 = vrot.slane %v1005_v45, 5  ;;  %v1195_v18 = vrot.slane %v1194_v41, 4  ;;  %v1211_v58 = vshll.u32 %v4420_v9, 16 }
  0xde   : > { %v1199_v20 = vrot.slane %v1197_v61, 5  ;;  %v1002_v23 = vor.u32 %v1001_v24, %v998_v36  ;;  %v1209_v47 = vrot.slane %v1208_v59, 4  ;;  %v1272_v19 = vshrl.u32 %v4584_v32, 16 }
  0xdf   : > { %v989_v11 = vrot.slane %v988_v55, 4  ;;  %1811 = vrot.lane.b32.xlu0 %v3570_v15, %s3962_s18  ;;  %v4594_v33 = vrot.slane %v1477_v42, 5  ;;  %v1213_v63 = vrot.slane %v1211_v58, 5  ;;  %v1275_v54 = vshll.u32 %v4584_v32, 16 }
  0xe0   : > { %v1200_v28 = vsel %vm4212_vm12, %v1195_v18, %v1199_v20  ;;  %v1003_v40 = vrot.slane %v1002_v23, 4  ;;  %v3553_v43 = vcombine.low %v4584_v32, %v4242_v16  ;;  %v3530_v22 = vrot.slane %v1535_v8, 9 }
  0xe1   : > { %v994_v9 = vsel %vm4212_vm12, %v989_v11, %v993_v53  ;;  %v1214_v42 = vsel %vm4212_vm12, %v1209_v47, %v1213_v63  ;;  %v4607_v56 = vrot.slane %v1272_v19, 4  ;;  %v1585_v15 = vrot.slane %v4589_v39, 5 }
  0xe2   : > { %v3531_v29 = vrot.slane %v1536_v62, 9  ;;  %v1008_v57 = vsel %vm4212_vm12, %v1003_v40, %v1007_v1  ;;  %v3555_v3 = vcombine.low %v1200_v28, %v1214_v42  ;;  %v1589_v51 = vrot.slane %v4599_v17, 5  ;;  %v920_v42 = vld [vmem:[#allocation2 + $0x44] sm:$0x1] }
  0xe3   : > { %v1452_v27 = vor.u32 %v4405_v26, %v4403_v31  ;;  %v3541_v53 = vcombine.low %v994_v9, %v1008_v57  ;;  %v1586_v16 = vsel %vm4204_vm11, %v3530_v22, %v1585_v15  ;;  %v1455_v45 = vshll.u32 %v4484_v7, 16  ;;  %v4626_v26 = vld [vmem:[#allocation2 + $0x30] sm:$0xf]  ;;  %v1073_v15 = vld [vmem:[#allocation2 + $0x40] sm:$0xe] }
  0xe4   : > { %v1466_v41 = vor.u32 %v4386_v34, %v4384_v10  ;;  %1726 = vrot.lane.b32.xlu1 %v3555_v3, %s3963_s21  ;;  %v1590_v61 = vsel %vm4204_vm11, %v3531_v29, %v1589_v51  ;;  %v1469_v36 = vshll.u32 %v4486_v2, 16  ;;  %v1222_v31 = vor.u32 %v4369_v5, %v4367_v35  ;;  %v4635_v5 = vld [vmem:[#allocation2 + $0x38] sm:$0xf] }
  0xe5   : > { %v1453_v55 = vrot.slane %v1452_v27, 4  ;;  %1643 = vrot.lane.b32.xlu0 %v3541_v53, %s3957_s27  ;;  %v3577_v24 = vcombine.low %v1586_v16, %v1590_v61  ;;  %v1457_v7 = vrot.slane %v1455_v45, 5  ;;  %v1225_v10 = vshll.u32 %v4446_v44, 16  ;;  %v1074_v27 = vld [vmem:[#allocation2 + $0x48] sm:$0xe] }
  0xe6   : > { %v1467_v59 = vrot.slane %v1466_v41, 4  ;;  %v1471_v34 = vrot.slane %v1469_v36, 5  ;;  %v1223_v1 = vrot.slane %v1222_v31, 4  ;;  %v1236_v18 = vor.u32 %v4378_v0, %v4376_v6 }
  0xe7   : > { %v1239_v20 = vshll.u32 %v4448_v13, 16  ;;  %v1458_v2 = vsel %vm4212_vm12, %v1453_v55, %v1457_v7  ;;  %v1227_v35 = vrot.slane %v1225_v10, 5  ;;  %v1010_v58 = vshrl.u32 %v4626_v26, 16 }
  0xe8   : > { %v1013_v8 = vshll.u32 %v4626_v26, 16  ;;  %1840 = vrot.lane.b32.xlu1 %v3577_v24, %s3960_s14  ;;  %v1472_v44 = vsel %vm4212_vm12, %v1467_v59, %v1471_v34  ;;  %v1237_v11 = vrot.slane %v1236_v18, 4  ;;  %v1019_v6 = vshll.u32 %v4498_v21, 16  ;;  %v5465_v34 = vld [vmem:[#allocation16_spill] sm:$0xff]  ;;  %v4672_v18 = vld [vmem:[#allocation2 + $0x40] sm:$0xf] }
  0xe9   : > { %v1241_v23 = vrot.slane %v1239_v20, 5  ;;  %1707 = vrot.lane.b32.xlu0 %v3553_v43, %s3958_s2  ;;  %v3571_v0 = vcombine.low %v1458_v2, %v1472_v44  ;;  %v1228_v13 = vsel %vm4212_vm12, %v1223_v1, %v1227_v35  ;;  %v1012_v47 = vrot.slane %v1010_v58, 4  ;;  %v4680_v35 = vld [vmem:[#allocation2 + $0x48] sm:$0xf]  ;;  %s3970_s2 = smov [#allocation4]  }
  0xea   : > { %v1015_v19 = vrot.slane %v1013_v8, 5  ;;  %v1021_v28 = vrot.slane %v1019_v6, 5  ;;  %v1024_v63 = vshrl.u32 %v4635_v5, 16  ;;  %v1027_v9 = vshll.u32 %v4635_v5, 16 }
  0xeb   : > { %v1242_v62 = vsel %vm4212_vm12, %v1237_v11, %v1241_v23  ;;  %v1033_v21 = vshll.u32 %v4500_v50, 16  ;;  %v1480_v43 = vor.u32 %v4594_v33, %v4574_v52  ;;  %v1483_v3 = vshll.u32 %v4589_v39, 16  ;;  %v921_v52 = vld [vmem:[#allocation2 + $0x4c] sm:$0x1]  ;;  %v4682_v23 = vld [vmem:[#allocation2 + $0x5c] sm:$0x1] }
  0xec   : > { %v3556_v40 = vcombine.low %v1228_v13, %v1242_v62  ;;  %v1016_v22 = vor.u32 %v1015_v19, %v1012_v47  ;;  %v1026_v29 = vrot.slane %v1024_v63, 4  ;;  %v1029_v57 = vrot.slane %v1027_v9, 5  ;;  %v5468_v63 = vld [vmem:[#allocation12_spill] sm:$0xff]  ;;  %v5469_v9 = vld [vmem:[#allocation13_spill] sm:$0xff] }
  0xed   : > { %v1494_v51 = vor.u32 %v4565_v48, %v4561_v60  ;;  %1813 = vrot.lane.b32.xlu0 %v3571_v0, %s3962_s18  ;;  %v1035_v16 = vrot.slane %v1033_v21, 5  ;;  %v1481_v50 = vrot.slane %v1480_v43, 4  ;;  %v1497_v45 = vshll.u32 %v4599_v17, 16 }
  0xee   : > { %1728 = vrot.lane.b32.xlu1 %v3556_v40, %s3963_s21  ;;  %v1017_v53 = vrot.slane %v1016_v22, 4  ;;  %v1030_v33 = vor.u32 %v1029_v57, %v1026_v29  ;;  %v1485_v41 = vrot.slane %v1483_v3, 5  ;;  %v3512_v55 = vrot.slane %v1073_v15, 9 }
  0xef   : > { %v1495_v61 = vrot.slane %v1494_v51, 4  ;;  %v1277_v39 = vrot.slane %v1275_v54, 5  ;;  %v1499_v36 = vrot.slane %v1497_v45, 5  ;;  %v1132_v60 = vrot.slane %v920_v42, 5  ;;  %v5466_v54 = vld [vmem:[#allocation15_spill] sm:$0xff] }
  0xf0   : > { %v3513_v48 = vrot.slane %v1074_v27, 9  ;;  %v1022_v31 = vsel %vm4212_vm12, %v1017_v53, %v1021_v28  ;;  %v1031_v24 = vrot.slane %v1030_v33, 4  ;;  %v1136_v7 = vrot.slane %v921_v52, 5  ;;  %v1307_v51 = vld [vmem:[#allocation2 + $0x48] sm:$0xe] }
  0xf1   : > { %v1250_v59 = vor.u32 %v4409_v4, %v4407_v38  ;;  %v1486_v17 = vsel %vm4212_vm12, %v1481_v50, %v1485_v41  ;;  %v1133_v10 = vsel %vm4204_vm11, %v3512_v55, %v1132_v60  ;;  %v1253_v32 = vshll.u32 %v5465_v34, 16  ;;  %v1157_v50 = vld [vmem:[#allocation2 + $0x4c] sm:$0x1]  ;;  %v1538_v55 = vld [vmem:[#allocation2 + $0x58] sm:$0xe] }
  0xf2   : > { %v1264_v1 = vor.u32 %v4533_v14, %v5466_v54  ;;  %v1036_v20 = vsel %vm4212_vm12, %v1031_v24, %v1035_v16  ;;  %v1500_v2 = vsel %vm4212_vm12, %v1495_v61, %v1499_v36  ;;  %v1137_v4 = vsel %vm4204_vm11, %v3513_v48, %v1136_v7  ;;  %v5467_v14 = vld [vmem:[#allocation17_spill] sm:$0xff]  ;;  %v3870_v48 = vld [vmem:[#allocation2 + $0x50] sm:$0xf] }
  0xf3   : > { %v1251_v38 = vrot.slane %v1250_v59, 4  ;;  %v3542_v58 = vcombine.low %v1022_v31, %v1036_v20  ;;  %v3548_v8 = vcombine.low %v1133_v10, %v1137_v4  ;;  %v1255_v44 = vrot.slane %v1253_v32, 5  ;;  %v3846_v36 = vld [vmem:[%s5425_s3] sm:$0xff]   ;;  %v3871_v31 = vld [vmem:[#allocation2 + $0x58] sm:$0xf] }
  0xf4   : > { %v1265_v11 = vrot.slane %v1264_v1, 4  ;;  %v1267_v6 = vshll.u32 %v5467_v14, 16  ;;  %v1038_v0 = vshrl.u32 %v4672_v18, 16  ;;  %v1041_v13 = vshll.u32 %v4672_v18, 16  ;;  %v5472_v14 = vld [vmem:[#allocation11_spill] sm:$0xff] }
  0xf5   : > { %v1047_v47 = vshll.u32 %v920_v42, 16  ;;  %1645 = vrot.lane.b32.xlu0 %v3542_v58, %s3957_s27  ;;  %1672 = vrot.lane.b32.xlu1 %v3548_v8, %s3956_s1  ;;  %v1052_v19 = vshrl.u32 %v4680_v35, 16  ;;  %v1055_v62 = vshll.u32 %v4680_v35, 16  ;;  %v1061_v28 = vshll.u32 %v921_v52, 16 }
  0xf6   : > { %v1522_v40 = vor.u32 %v5469_v9, %v5468_v63  ;;  %v1269_v22 = vrot.slane %v1267_v6, 5  ;;  %v1040_v21 = vrot.slane %v1038_v0, 4  ;;  %v1043_v43 = vrot.slane %v1041_v13, 5  ;;  %v5473_v6 = vld [vmem:[#allocation9_spill] sm:$0xff] }
  0xf7   : > { %v1525_v15 = vshll.u32 %v4682_v23, 16  ;;  %v3572_v29 = vcombine.low %v1486_v17, %v1500_v2  ;;  %v1256_v42 = vsel %vm4212_vm12, %v1251_v38, %v1255_v44  ;;  %v1054_v57 = vrot.slane %v1052_v19, 4  ;;  %v5470_v2 = vld [vmem:[#allocation8_spill] sm:$0xff]  ;;  %v3848_v44 = vld [vmem:[%s5425_s3 + $0x8] sm:$0xff]  }
  0xf8   : > { %v1057_v3 = vrot.slane %v1055_v62, 5  ;;  %v1270_v27 = vsel %vm4212_vm12, %v1265_v11, %v1269_v22  ;;  %v1044_v53 = vor.u32 %v1043_v43, %v1040_v21  ;;  %v1049_v16 = vrot.slane %v1047_v47, 5  ;;  %v3849_v13 = vld [vmem:[%s5425_s3 + $0x10] ss:$0 sps:$4 sm:$0x33]  }
  0xf9   : > { %v1278_v45 = vor.u32 %v1277_v39, %v4607_v56  ;;  %1815 = vrot.lane.b32.xlu0 %v3572_v29, %s3962_s18  ;;  %v3557_v52 = vcombine.low %v1256_v42, %v1270_v27  ;;  %v1063_v41 = vrot.slane %v1061_v28, 5  ;;  %v1281_v61 = vshll.u32 %v1157_v50, 16  ;;  %v5475_v28 = vld [vmem:[#allocation7_spill] sm:$0xff] }
  0xfa   : > { %v1058_v33 = vor.u32 %v1057_v3, %v1054_v57  ;;  %v1045_v60 = vrot.slane %v1044_v53, 4  ;;  %v3568_v24 = vcombine.low %v3870_v48, %v3871_v31  ;;  %v3522_v7 = vrot.slane %v1307_v51, 9  ;;  %v5478_v57 = vld [vmem:[#allocation14_spill] sm:$0xff] }
  0xfb   : > { %v1279_v59 = vrot.slane %v1278_v45, 4  ;;  %1730 = vrot.lane.b32.xlu1 %v3557_v52, %s3963_s21  ;;  %v1363_v39 = vrot.slane %v1157_v50, 5  ;;  %v1283_v17 = vrot.slane %v1281_v61, 5  ;;  %v3533_v34 = vrot.slane %v1538_v55, 9  ;;  %v1665_v50 = vpop.permute.xlu1 %1664 }
  0xfc   : > { %v1059_v56 = vrot.slane %v1058_v33, 4  ;;  %v1050_v10 = vsel %vm4212_vm12, %v1045_v60, %v1049_v16  ;;  %v1597_v32 = vrot.slane %v4682_v23, 5  ;;  %v3964_v54 = vmov 0.0   ;;  %v1640_v16 = vpop.permute.xlu0 %1639 }
  0xfd   : > { %3718 = vmatprep.subr.bf16.mxu0 %v3964_v54  ;;  %v3535_v1 = vcombine.low %v4509_v12, %v4514_v49  ;;  %v5471_v4 = vshll.u32 %v5470_v2, 16  ;;  %v1523_v58 = vrot.slane %v1522_v40, 4  ;;  %v1527_v8 = vrot.slane %v1525_v15, 5  ;;  %3724 = vmatprep.mubr.msk.bf16.mxu0 %vm3965_vm14, %v3964_v54  ;;  %v5477_v15 = vld [vmem:[#allocation10_spill] sm:$0xff] }
  0xfe   : > { %v1064_v20 = vsel %vm4212_vm12, %v1059_v56, %v1063_v41  ;;  %3719 = vmatpush3.bf16.msra.mxu0 %v3846_v36  ;;  %v1284_v23 = vsel %vm4212_vm12, %v1279_v59, %v1283_v17  ;;  %v1298_v0 = vsel %vm4212_vm12, %v5473_v6, %v5472_v14  ;;  %v3536_v47 = vcombine.low %v4552_v25, %v4567_v37  ;;  %v3873_v17 = vld [vmem:[#allocation2 + $0x8] sm:$0xf] }
  0xff   : > { %v1513_v38 = vrot.slane %v5471_v4, 5  ;;  %v3543_v11 = vcombine.low %v1050_v10, %v1064_v20  ;;  %3720 = vmatprep.subr.bf16.mxu0 %v3964_v54  ;;  %1792 = vrot.lane.b32.xlu1 %v3568_v24, %s3959_s13  ;;  %v1364_v19 = vsel %vm4204_vm11, %v3522_v7, %v1363_v39  ;;  %v5474_v62 = vrot.slane %v5470_v2, 5  ;;  %v3872_v39 = vld [vmem:[#allocation2] sm:$0xf] }
 0x100   : > { %v5476_v63 = vrot.slane %v5475_v28, 9  ;;  %v1598_v40 = vsel %vm4204_vm11, %v3533_v34, %v1597_v32  ;;  %v3537_v22 = vcombine.low %v4626_v26, %v4635_v5  ;;  %v3538_v21 = vcombine.low %v4672_v18, %v4680_v35 }
 0x101   : > { %1647 = vrot.lane.b32.xlu0 %v3543_v11, %s3957_s27  ;;  %v3558_v43 = vcombine.low %v1284_v23, %v1298_v0  ;;  %v1514_v29 = vsel %vm4212_vm12, %v5477_v15, %v1513_v38  ;;  %v1528_v42 = vsel %vm4212_vm12, %v1523_v58, %v1527_v8  ;;  %v3563_v3 = vcombine.low %v1364_v19, %v5478_v57  ;;  %s3967_s27 = smov 40  }
 0x102   : > { %v1594_v9 = vsel %vm4204_vm11, %v5476_v63, %v5474_v62  ;;  %3721 = vmatpush3.bf16.msra.mxu0 %v3848_v44  ;;  %v1970_v51 = vsel %vm1968_vm13, %v3849_v13, 0  ;;  %v3573_v53 = vcombine.low %v1514_v29, %v1528_v42  ;;  %v3534_v10 = vcombine.low %v3872_v39, %v3873_v17  ;;  %vm4828_vm13 = vmand %vm2089_vm10, %vm630_vm1 }
 0x103   : > { %3722 = vmatprep.subr.bf16.mxu0 %v3964_v54  ;;  %1732 = vrot.lane.b32.xlu1 %v3558_v43, %s3963_s21  ;;  %v3578_v27 = vcombine.low %v1594_v9, %v1598_v40  ;;  %vm1871_vm2 = vcmask 97280   ;;  %vm1904_vm6 = vcmask 195584   ;;  %vm2282_vm1 = vcmask 60416  }
 0x104   : > { %v1847_v20 = vsel %vm1844_vm15, %v3534_v10, %v1640_v16 }
 0x105   : > { %1757 = vrot.lane.b32.xlu0 %v3563_v3, %s3961_s16  ;;  %v1862_v4 = vsel %vm1860_vm0, %v1847_v20, %v1665_v50 }
 0x106   : > { %3723 = vmatpush3.bf16.msra.mxu0 %v1970_v51 }
 0x107   : > { %1842 = vrot.lane.b32.xlu1 %v3578_v27, %s3960_s14 }
 0x109   : > { %1817 = vrot.lane.b32.xlu0 %v3573_v53, %s3962_s18 }
 0x11a   : > { %v1700_v45 = vpop.permute.xlu0 %1699 }
 0x11b   : > { %v1873_v58 = vsel %vm1871_vm2, %v1862_v4, %v1700_v45 }
 0x11f   : > { %v1785_v52 = vpop.permute.xlu1 %1784 }
 0x120   : > { %v1702_v33 = vpop.permute.xlu0 %1701 }
 0x124   : > { %v1787_v41 = vpop.permute.xlu1 %1786 }
 0x126   : > { %v1704_v61 = vpop.permute.xlu0 %1703 }
 0x128   : > { %v1789_v55 = vpop.permute.xlu1 %1788 }
 0x12a   : > { %v4758_v36 = vpop.permute.xlu0 %1705 }
 0x131   : > { %v1835_v60 = vpop.permute.xlu1 %1834 }
 0x132   : > { %v1750_v48 = vpop.permute.xlu0 %1749 }
 0x135   : > { %v1667_v31 = vpop.permute.xlu1 %1666 }
 0x136   : > { %v1752_v24 = vpop.permute.xlu0 %1751 }
 0x139   : > { %v1837_v7 = vpop.permute.xlu1 %1836 }
 0x13a   : > { %v1754_v59 = vpop.permute.xlu0 %1753 }
 0x13d   : > { %v1669_v56 = vpop.permute.xlu1 %1668 }
 0x13e   : > { %v1756_v34 = vpop.permute.xlu0 %1755 }
 0x141   : > { %v1839_v32 = vpop.permute.xlu1 %1838 }
 0x143   : > { %v1810_v38 = vpop.permute.xlu0 %1809 }
 0x145   : > { %v1671_v2 = vpop.permute.xlu1 %1670 }
 0x14b   : > { %v1725_v8 = vpop.permute.xlu1 %1724 }
 0x14c   : > { %v1884_v44 = vsel %vm1882_vm4, %v1873_v58, %v1725_v8 }
 0x14d   : > { %v1895_v11 = vsel %vm1893_vm5, %v1884_v44, %v1750_v48  ;;  %v1642_v23 = vpop.permute.xlu0 %1641  ;;  %v2094_v44 = vld [vmem:[#allocation3 + $0x8] sm:$0x1] }
 0x14e   : > { %v1906_v14 = vsel %vm1904_vm6, %v1895_v11, %v1785_v52  ;;  %v1850_v13 = vsel %vm1844_vm15, %v3535_v1, %v1642_v23  ;;  %v2125_v11 = vld [vmem:[#allocation3 + $0xc] sm:$0x1]  ;;  %v2095_v23 = vsel %vm4828_vm13, 0, %v2094_v44 }
 0x14f   : > { %v1917_v6 = vsel %vm1915_vm7, %v1906_v14, %v1810_v38  ;;  %v1791_v19 = vpop.permute.xlu1 %1790  ;;  %v1864_v28 = vsel %vm1860_vm0, %v1850_v13, %v1667_v31  ;;  %2096 = vst [vmem:[#allocation3 + $0x8] sm:$0x1] %v2095_v23 }
 0x150   : > { %v1928_v0 = vsel %vm1926_vm8, %v1917_v6, %v1835_v60  ;;  %v1875_v9 = vsel %vm1871_vm2, %v1864_v28, %v1702_v33  ;;  %v2097_v6 = vld [vmem:[#allocation3 + $0x10] sm:$0x1]  ;;  %v2131_v28 = vld [vmem:[#allocation3 + $0x1c] sm:$0x1] }
 0x151   : > { %3725 = vmatmul.mubr.msk.bf16.vlgmr.msra.gmra.mrb[0].mxu0 %vm1957_vm9, %v1928_v0  ;;  %v1812_v62 = vpop.permute.xlu0 %1811  ;;  %v2128_v0 = vld [vmem:[#allocation3 + $0x14] sm:$0x1]  ;;  %v2098_v13 = vsel %vm4828_vm13, 0, %v2097_v6 }
 0x152   : > { %3728 = vmatprep.mubr.msk.bf16.mxu0 %vm3965_vm14, %v3964_v54  ;;  %2099 = vst [vmem:[#allocation3 + $0x10] sm:$0x1] %v2098_v13 }
 0x156   : > { %v1727_v63 = vpop.permute.xlu1 %1726 }
 0x157   : > { %v1644_v40 = vpop.permute.xlu0 %1643  ;;  %v1886_v43 = vsel %vm1882_vm4, %v1875_v9, %v1727_v63 }
 0x158   : > { %v1897_v15 = vsel %vm1893_vm5, %v1886_v43, %v1752_v24  ;;  %v1853_v49 = vsel %vm1844_vm15, %v3536_v47, %v1644_v40  ;;  %v2103_v40 = vld [vmem:[#allocation3 + $0x20] sm:$0x1]  ;;  %v2134_v43 = vld [vmem:[#allocation3 + $0x24] sm:$0x1] }
 0x159   : > { %v1908_v12 = vsel %vm1904_vm6, %v1897_v15, %v1787_v41  ;;  %v1866_v3 = vsel %vm1860_vm0, %v1853_v49, %v1669_v56  ;;  %v2104_v15 = vsel %vm4828_vm13, 0, %v2103_v40 }
 0x15a   : > { %v1841_v1 = vpop.permute.xlu1 %1840  ;;  %v1919_v29 = vsel %vm1915_vm7, %v1908_v12, %v1812_v62  ;;  %v1877_v25 = vsel %vm1871_vm2, %v1866_v3, %v1704_v61  ;;  %v2100_v62 = vld [vmem:[#allocation3 + $0x18] sm:$0x1]  ;;  %2105 = vst [vmem:[#allocation3 + $0x20] sm:$0x1] %v2104_v15  ;;  %v2106_v12 = vld [vmem:[#allocation3 + $0x28] sm:$0x1] }
 0x15b   : > { %v1708_v42 = vpop.permute.xlu0 %1707  ;;  %v1930_v57 = vsel %vm1926_vm8, %v1919_v29, %v1837_v7  ;;  %v2101_v63 = vsel %vm4828_vm13, 0, %v2100_v62  ;;  %v2137_v29 = vld [vmem:[#allocation3 + $0x2c] sm:$0x1]  ;;  %v2140_v3 = vld [vmem:[#allocation3 + $0x34] sm:$0x1] }
 0x15c   : > { %3729 = vmatmul.mubr.msk.bf16.gmra.mrb[4].mxu0 %vm1957_vm9, %v1930_v57  ;;  %2102 = vst [vmem:[#allocation3 + $0x18] sm:$0x1] %v2101_v63  ;;  %v2109_v57 = vld [vmem:[#allocation3 + $0x30] sm:$0x1] }
 0x15d   : > { %3732 = vmatprep.mubr.msk.bf16.mxu0 %vm3965_vm14, %v3964_v54 }
 0x15f   : > { %v1814_v47 = vpop.permute.xlu0 %1813 }
 0x160   : > { %v1729_v51 = vpop.permute.xlu1 %1728 }
 0x161   : > { %v1888_v37 = vsel %vm1882_vm4, %v1877_v25, %v1729_v51  ;;  %v2110_v51 = vsel %vm4828_vm13, 0, %v2109_v57 }
 0x162   : > { %v1899_v27 = vsel %vm1893_vm5, %v1888_v37, %v1754_v59  ;;  %2111 = vst [vmem:[#allocation3 + $0x30] sm:$0x1] %v2110_v51  ;;  %v2112_v37 = vld [vmem:[#allocation3 + $0x38] sm:$0x1] }
 0x163   : > { %v1910_v53 = vsel %vm1904_vm6, %v1899_v27, %v1789_v55  ;;  %v2113_v27 = vsel %vm4828_vm13, 0, %v2112_v37 }
 0x164   : > { %v1921_v16 = vsel %vm1915_vm7, %v1910_v53, %v1814_v47  ;;  %v2143_v47 = vld [vmem:[#allocation3 + $0x3c] sm:$0x1]  ;;  %2114 = vst [vmem:[#allocation3 + $0x38] sm:$0x1] %v2113_v27 }
 0x165   : > { %v1932_v50 = vsel %vm1926_vm8, %v1921_v16, %v1839_v32  ;;  %v2115_v16 = vld [vmem:[#allocation3 + $0x40] sm:$0x1] }
 0x166   : > { %3733 = vmatmul.mubr.msk.bf16.gmra.mrb[8].mxu0 %vm1957_vm9, %v1932_v50  ;;  %v2146_v50 = vld [vmem:[#allocation3 + $0x44] sm:$0x1] }
 0x167   : > { %3736 = vmatprep.mubr.msk.bf16.mxu0 %vm3965_vm14, %v3964_v54  ;;  %v1646_v45 = vpop.permute.xlu0 %1645  ;;  %v1673_v52 = vpop.permute.xlu1 %1672 }
 0x168   : > { %v1856_v33 = vsel %vm1844_vm15, %v3537_v22, %v1646_v45  ;;  %v2116_v45 = vsel %vm4828_vm13, 0, %v2115_v16 }
 0x169   : > { %v1868_v41 = vsel %vm1860_vm0, %v1856_v33, %v1671_v2  ;;  %v2122_v2 = vld [vmem:[#allocation3 + $0x4] sm:$0x1]  ;;  %2117 = vst [vmem:[#allocation3 + $0x40] sm:$0x1] %v2116_v45  ;;  %v2118_v33 = vld [vmem:[#allocation3 + $0x48] sm:$0x1] }
 0x16a   : > { %v1879_v60 = vsel %vm1871_vm2, %v1868_v41, %v4758_v36  ;;  %v2119_v41 = vsel %vm4828_vm13, 0, %v2118_v33 }
 0x16b   : > { %v1816_v61 = vpop.permute.xlu0 %1815  ;;  %2120 = vst [vmem:[#allocation3 + $0x48] sm:$0x1] %v2119_v41 }
 0x16d   : > { %v1731_v55 = vpop.permute.xlu1 %1730 }
 0x16e   : > { %v1890_v48 = vsel %vm1882_vm4, %v1879_v60, %v1731_v55  ;;  %v4881_v60 = vld [vmem:[%s5426_s4] ss:$0 sm:$0xff] }
 0x16f   : > { %v1901_v31 = vsel %vm1893_vm5, %v1890_v48, %v1756_v34 }
 0x170   : > { %v1912_v24 = vsel %vm1904_vm6, %v1901_v31, %v1791_v19  ;;  %v4886_v31 = vld [vmem:[%s5427_s5] ss:$0 sm:$0xff] }
 0x171   : > { %v1793_v7 = vpop.permute.xlu1 %1792  ;;  %v1923_v59 = vsel %vm1915_vm7, %v1912_v24, %v1816_v61  ;;  %v2149_v61 = vld [vmem:[#allocation3 + $0x4c] sm:$0x1] }
 0x172   : > { %v1934_v26 = vsel %vm1926_vm8, %v1923_v59, %v1841_v1  ;;  %v2107_v1 = vsel %vm4828_vm13, 0, %v2106_v12 }
 0x173   : > { %v1648_v56 = vpop.permute.xlu0 %1647  ;;  %3737 = vmatmul.mubr.msk.bf16.gmra.mrb[12].mxu0 %vm1957_vm9, %v1934_v26  ;;  %2108 = vst [vmem:[#allocation3 + $0x28] sm:$0x1] %v2107_v1 }
 0x174   : > { %v1859_v5 = vsel %vm1844_vm15, %v3538_v21, %v1648_v56  ;;  %3740 = vmatprep.mubr.msk.bf16.mxu0 %vm3965_vm14, %v3964_v54  ;;  %v2091_v54 = vld [vmem:[#allocation3] sm:$0x1]  ;;  %vm4836_vm14 = vmand %vm2089_vm10, %vm668_vm3 }
 0x175   : > { %v1870_v22 = vsel %vm1860_vm0, %v1859_v5, %v1673_v52  ;;  %v1733_v36 = vpop.permute.xlu1 %1732  ;;  %v2092_v38 = vsel %vm4828_vm13, 0, %v2091_v54  ;;  %v2123_v8 = vsel %vm4836_vm14, 0, %v2122_v2  ;;  %v2126_v14 = vsel %vm4836_vm14, 0, %v2125_v11  ;;  %vm4894_vm15 = vmand %vm2282_vm1, %vm668_vm3 }
 0x176   : > { %v1881_v39 = vsel %vm1871_vm2, %v1870_v22, %v1708_v42  ;;  %2093 = vst [vmem:[#allocation3] sm:$0x1] %v2092_v38  ;;  %2124 = vst [vmem:[#allocation3 + $0x4] sm:$0x1] %v2123_v8  ;;  %v2129_v19 = vsel %vm4836_vm14, 0, %v2128_v0  ;;  %v2132_v9 = vsel %vm4836_vm14, 0, %v2131_v28 }
 0x177   : > { %v1758_v17 = vpop.permute.xlu0 %1757  ;;  %v1892_v10 = vsel %vm1882_vm4, %v1881_v39, %v1733_v36  ;;  %2127 = vst [vmem:[#allocation3 + $0xc] sm:$0x1] %v2126_v14  ;;  %2130 = vst [vmem:[#allocation3 + $0x14] sm:$0x1] %v2129_v19  ;;  %v2135_v49 = vsel %vm4836_vm14, 0, %v2134_v43  ;;  %v2138_v42 = vsel %vm4836_vm14, 0, %v2137_v29 }
 0x178   : > { %v1903_v34 = vsel %vm1893_vm5, %v1892_v10, %v1758_v17  ;;  %2133 = vst [vmem:[#allocation3 + $0x1c] sm:$0x1] %v2132_v9  ;;  %2136 = vst [vmem:[#allocation3 + $0x24] sm:$0x1] %v2135_v49  ;;  %v2141_v25 = vsel %vm4836_vm14, 0, %v2140_v3  ;;  %v2144_v53 = vsel %vm4836_vm14, 0, %v2143_v47 }
 0x179   : > { %v1914_v32 = vsel %vm1904_vm6, %v1903_v34, %v1793_v7  ;;  %v1843_v18 = vpop.permute.xlu1 %1842  ;;  %2139 = vst [vmem:[#allocation3 + $0x2c] sm:$0x1] %v2138_v42  ;;  %2142 = vst [vmem:[#allocation3 + $0x34] sm:$0x1] %v2141_v25  ;;  %v2147_v52 = vsel %vm4836_vm14, 0, %v2146_v50  ;;  %v2150_v55 = vsel %vm4836_vm14, 0, %v2149_v61 }
 0x17a   : > { %2145 = vst [vmem:[#allocation3 + $0x3c] sm:$0x1] %v2144_v53  ;;  %2148 = vst [vmem:[#allocation3 + $0x44] sm:$0x1] %v2147_v52  ;;  %v2290_v14 = vld [vmem:[#allocation3 + $0x8] sm:$0xf] }
 0x17b   : > { %v1818_v35 = vpop.permute.xlu0 %1817  ;;  %2151 = vst [vmem:[#allocation3 + $0x4c] sm:$0x1] %v2150_v55  ;;  %v5485_v43 = vmov 0   ;;  %v2296_v47 = vld [vmem:[#allocation3 + $0x10] sm:$0xf]  ;;  %vm3222_vm3 = vcmask 1043456  }
 0x17c   : > { %v1925_v21 = vsel %vm1915_vm7, %v1914_v32, %v1818_v35  ;;  %v2302_v55 = vld [vmem:[#allocation3 + $0x18] sm:$0xf]  ;;  %vm3159_vm2 = vcmask 457728   ;;  %vm3168_vm5 = vcmask 523264   ;;  %vm3213_vm7 = vcmask 588800  }
 0x17d   : > { %v1936_v20 = vsel %vm1926_vm8, %v1925_v21, %v1843_v18  ;;  %v2287_v54 = vld [vmem:[#allocation3 + $0x4] sm:$0x1] }
 0x17e   : > { %3741 = vmatmul.mubr.msk.bf16.gmra.mrb[16].mxu0 %vm1957_vm9, %v1936_v20  ;;  %v2284_v20 = vld [vmem:[#allocation3] sm:$0xf]  ;;  %v2293_v6 = vld [vmem:[#allocation3 + $0xc] sm:$0x1]  ;;  %v2299_v27 = vld [vmem:[#allocation3 + $0x14] sm:$0x1] }
 0x224   : > { %v2006_v48 = vpop.f32.mrb[0].mxu0 }
 0x225   : > { %v2052_v24 = vmul.f32 %v4881_v60, %v2006_v48  ;;  %v3726_v7 = vpop.f32.mrb[1].mxu0  ;;  %v2305_v48 = vld [vmem:[#allocation3 + $0x1c] sm:$0x1] }
 0x226   : > { %v2009_v59 = vpop.f32.mrb[2].mxu0 }
 0x227   : > { %v2069_v56 = vadd.f32 %v4886_v31, %v2052_v24  ;;  %v2053_v26 = vmul.f32 %v4881_v60, %v2009_v59  ;;  %v3727_v5 = vpop.f32.mrb[3].mxu0 }
 0x229   : > { %v2079_v22 = vmax.f32 %v2069_v56, 0.0  ;;  %v2070_v36 = vadd.f32 %v4886_v31, %v2053_v26 }
 0x22b   : > { %v3690_v39 = vpack.c.bf16 %v2079_v22, %v2079_v22  ;;  %v2080_v17 = vmax.f32 %v2070_v36, 0.0 }
 0x22d   : > { %v2183_v10 = vshrl.u32 %v3690_v39, 16  ;;  %v3691_v34 = vpack.c.bf16 %v2080_v17, %v2080_v17  ;;  %v2186_v18 = vshll.u32 %v3690_v39, 16 }
 0x22f   : > { %v2185_v32 = vrot.slane %v2183_v10, 7  ;;  %v2191_v35 = vshrl.u32 %v3691_v34, 16  ;;  %v2194_v2 = vshll.u32 %v3691_v34, 16  ;;  %v2014_v38 = vpop.f32.mrb[4].mxu0 }
 0x230   : > { %v2054_v11 = vmul.f32 %v4881_v60, %v2014_v38  ;;  %v3730_v23 = vpop.f32.mrb[5].mxu0 }
 0x231   : > { %v2188_v58 = vor.u32 %v2186_v18, %v2185_v32  ;;  %v2189_v8 = vrot.slane %v2185_v32, 4  ;;  %v2193_v44 = vrot.slane %v2191_v35, 7  ;;  %v2017_v0 = vpop.f32.mrb[6].mxu0 }
 0x232   : > { %v3731_v63 = vpop.f32.mrb[7].mxu0  ;;  %v2071_v9 = vadd.f32 %v4886_v31, %v2054_v11  ;;  %v2055_v40 = vmul.f32 %v4881_v60, %v2017_v0 }
 0x233   : > { %v2285_v13 = vsel %vm4894_vm15, %v2188_v58, %v2284_v20  ;;  %v2288_v19 = vsel %vm4828_vm13, %v2189_v8, %v2287_v54  ;;  %v2196_v62 = vor.u32 %v2194_v2, %v2193_v44  ;;  %v2197_v28 = vrot.slane %v2193_v44, 4  ;;  %v2308_v63 = vld [vmem:[#allocation3 + $0x20] sm:$0xf] }
 0x234   : > { %2286 = vst [vmem:[#allocation3] sm:$0xf] %v2285_v13  ;;  %2289 = vst [vmem:[#allocation3 + $0x4] sm:$0x1] %v2288_v19  ;;  %v2081_v12 = vmax.f32 %v2071_v9, 0.0  ;;  %v2072_v1 = vadd.f32 %v4886_v31, %v2055_v40 }
 0x235   : > { %2349 = vst.msk [vmem:[#allocation3] sm:$0xf] %vm2282_vm1, %v5485_v43  ;;  %v2291_v15 = vsel %vm4894_vm15, %v2196_v62, %v2290_v14  ;;  %v2294_v49 = vsel %vm4828_vm13, %v2197_v28, %v2293_v6 }
 0x236   : > { %2351 = vst.msk [vmem:[#allocation3 + $0x4] sm:$0x1] %vm2089_vm10, %v5485_v43  ;;  %2292 = vst [vmem:[#allocation3 + $0x8] sm:$0xf] %v2291_v15  ;;  %v3692_v29 = vpack.c.bf16 %v2081_v12, %v2081_v12  ;;  %v2082_v42 = vmax.f32 %v2072_v1, 0.0 }
 0x237   : > { %2295 = vst [vmem:[#allocation3 + $0xc] sm:$0x1] %v2294_v49  ;;  %v2311_v1 = vld [vmem:[#allocation3 + $0x24] sm:$0x1] }
 0x238   : > { %v2199_v3 = vshrl.u32 %v3692_v29, 16  ;;  %v3693_v51 = vpack.c.bf16 %v2082_v42, %v2082_v42  ;;  %v2202_v50 = vshll.u32 %v3692_v29, 16 }
 0x239   : > { %v2022_v57 = vpop.f32.mrb[8].mxu0 }
 0x23a   : > { %v2056_v25 = vmul.f32 %v4881_v60, %v2022_v57  ;;  %v3734_v37 = vpop.f32.mrb[9].mxu0  ;;  %v2201_v16 = vrot.slane %v2199_v3, 7  ;;  %v2207_v45 = vshrl.u32 %v3693_v51, 16  ;;  %v2210_v61 = vshll.u32 %v3693_v51, 16  ;;  %v2314_v3 = vld [vmem:[#allocation3 + $0x28] sm:$0xf] }
 0x23b   : > { %v2025_v53 = vpop.f32.mrb[10].mxu0 }
 0x23c   : > { %v2073_v52 = vadd.f32 %v4886_v31, %v2056_v25  ;;  %v3735_v33 = vpop.f32.mrb[11].mxu0  ;;  %v2057_v24 = vmul.f32 %v4881_v60, %v2025_v53  ;;  %v2483_v7 = vld [vmem:[#allocation3] sm:$0xe]  ;;  %v2204_v56 = vor.u32 %v2202_v50, %v2201_v16  ;;  %v2205_v26 = vrot.slane %v2201_v16, 4  ;;  %v2317_v50 = vld [vmem:[#allocation3 + $0x2c] sm:$0x1] }
 0x23d   : > { %v4916_v41 = vld [vmem:[#allocation3 + $0x4] sm:$0x1]  ;;  %v2484_v59 = vld [vmem:[#allocation3 + $0x8] sm:$0xe]  ;;  %v2209_v5 = vrot.slane %v2207_v45, 7  ;;  %v3599_v17 = vrot.slane %v2483_v7, 9 }
 0x23e   : > { %v2083_v22 = vmax.f32 %v2073_v52, 0.0  ;;  %v4919_v36 = vld [vmem:[#allocation3 + $0xc] sm:$0x1]  ;;  %v2074_v39 = vadd.f32 %v4886_v31, %v2057_v24  ;;  %v2509_v10 = vrot.slane %v4916_v41, 5  ;;  %v3600_v34 = vrot.slane %v2484_v59, 9 }
 0x23f   : > { %v4923_v32 = vld [vmem:[#allocation3 + $0x8] sm:$0xf]  ;;  %v2297_v18 = vsel %vm4894_vm15, %v2204_v56, %v2296_v47  ;;  %v2300_v35 = vsel %vm4828_vm13, %v2205_v26, %v2299_v27  ;;  %v2212_v20 = vor.u32 %v2210_v61, %v2209_v5  ;;  %v2213_v54 = vrot.slane %v2209_v5, 4  ;;  %v4932_v44 = vld [vmem:[#allocation3] sm:$0xf] }
 0x240   : > { %2298 = vst [vmem:[#allocation3 + $0x10] sm:$0xf] %v2297_v18  ;;  %2301 = vst [vmem:[#allocation3 + $0x14] sm:$0x1] %v2300_v35  ;;  %v3694_v2 = vpack.c.bf16 %v2083_v22, %v2083_v22  ;;  %v2084_v38 = vmax.f32 %v2074_v39, 0.0  ;;  %v2510_v58 = vsel %vm4204_vm11, %v3599_v17, %v2509_v10  ;;  %v2513_v8 = vrot.slane %v4919_v36, 5 }
 0x241   : > { %v2303_v11 = vsel %vm4894_vm15, %v2212_v20, %v2302_v55  ;;  %v2306_v23 = vsel %vm4828_vm13, %v2213_v54, %v2305_v48  ;;  %v2557_v14 = vshrl.u32 %v4923_v32, 16  ;;  %v2560_v6 = vshll.u32 %v4923_v32, 16  ;;  %v4942_v28 = vld [vmem:[#allocation3 + $0x8] sm:$0xf] }
 0x242   : > { %2304 = vst [vmem:[#allocation3 + $0x18] sm:$0xf] %v2303_v11  ;;  %2307 = vst [vmem:[#allocation3 + $0x1c] sm:$0x1] %v2306_v23  ;;  %v2215_v0 = vshrl.u32 %v3694_v2, 16  ;;  %v2218_v13 = vshll.u32 %v3694_v2, 16  ;;  %v3695_v19 = vpack.c.bf16 %v2084_v38, %v2084_v38  ;;  %v2514_v62 = vsel %vm4204_vm11, %v3600_v34, %v2513_v8 }
 0x243   : > { %v3631_v9 = vcombine.low %v2510_v58, %v2514_v62  ;;  %v4944_v40 = vrot.slane %v2557_v14, 4  ;;  %v4946_v15 = vrot.slane %v2560_v6, 5  ;;  %v2372_v49 = vshrl.u32 %v4932_v44, 16 }
 0x244   : > { %v2217_v12 = vrot.slane %v2215_v0, 7  ;;  %v2223_v29 = vshrl.u32 %v3695_v19, 16  ;;  %v2226_v42 = vshll.u32 %v3695_v19, 16  ;;  %v2375_v57 = vshll.u32 %v4932_v44, 16 }
 0x245   : > { %2961 = vrot.lane.b32.xlu0 %v3631_v9, %s3963_s21  ;;  %v4951_v51 = vrot.slane %v2372_v49, 4  ;;  %v2381_v25 = vshll.u32 %v4916_v41, 16  ;;  %v2386_v37 = vshrl.u32 %v4942_v28, 16  ;;  %v2389_v47 = vshll.u32 %v4942_v28, 16 }
 0x246   : > { %v2220_v27 = vor.u32 %v2218_v13, %v2217_v12  ;;  %v2221_v53 = vrot.slane %v2217_v12, 4  ;;  %v2225_v16 = vrot.slane %v2223_v29, 7  ;;  %v2030_v45 = vpop.f32.mrb[12].mxu0  ;;  %v4956_v52 = vrot.slane %v2375_v57, 5 }
 0x247   : > { %v2058_v33 = vmul.f32 %v4881_v60, %v2030_v45  ;;  %v3738_v61 = vpop.f32.mrb[13].mxu0  ;;  %v2541_v55 = vld [vmem:[#allocation3 + $0x10] sm:$0xf]  ;;  %v4959_v24 = vrot.slane %v2381_v25, 5  ;;  %v2563_v41 = vor.u32 %v4946_v15, %v4944_v40  ;;  %v3623_v7 = vcombine.low %v4932_v44, %v4942_v28  ;;  %v4976_v58 = vld [vmem:[#allocation3 + $0x14] sm:$0x1] }
 0x248   : > { %v2725_v48 = vld [vmem:[#allocation3 + $0x10] sm:$0xf]  ;;  %v2309_v59 = vsel %vm4894_vm15, %v2220_v27, %v2308_v63  ;;  %v2312_v56 = vsel %vm4828_vm13, %v2221_v53, %v2311_v1  ;;  %v2228_v26 = vor.u32 %v2226_v42, %v2225_v16  ;;  %v2229_v5 = vrot.slane %v2225_v16, 4  ;;  %v2033_v22 = vpop.f32.mrb[14].mxu0 }
 0x249   : > { %2310 = vst [vmem:[#allocation3 + $0x20] sm:$0xf] %v2309_v59  ;;  %2313 = vst [vmem:[#allocation3 + $0x24] sm:$0x1] %v2312_v56  ;;  %v2075_v39 = vadd.f32 %v4886_v31, %v2058_v33  ;;  %v2059_v17 = vmul.f32 %v4881_v60, %v2033_v22  ;;  %v3739_v10 = vpop.f32.mrb[15].mxu0  ;;  %v3635_v34 = vcombine.low %v4923_v32, %v2541_v55  ;;  %v2571_v18 = vshrl.u32 %v2541_v55, 16 }
 0x24a   : > { %v2726_v35 = vld [vmem:[#allocation3 + $0x18] sm:$0xf]  ;;  %v2315_v20 = vsel %vm4894_vm15, %v2228_v26, %v2314_v3  ;;  %v2318_v54 = vsel %vm4828_vm13, %v2229_v5, %v2317_v50  ;;  %v2574_v2 = vshll.u32 %v2541_v55, 16  ;;  %v2742_v38 = vshrl.u32 %v2725_v48, 16  ;;  %v2485_v8 = vld [vmem:[#allocation3 + $0x10] sm:$0xe] }
 0x24b   : > { %2316 = vst [vmem:[#allocation3 + $0x28] sm:$0xf] %v2315_v20  ;;  %2319 = vst [vmem:[#allocation3 + $0x2c] sm:$0x1] %v2318_v54  ;;  %v2085_v11 = vmax.f32 %v2075_v39, 0.0  ;;  %v2076_v23 = vadd.f32 %v4886_v31, %v2059_v17  ;;  %2989 = vrot.lane.b32.xlu0 %v3635_v34, %s3959_s13  ;;  %v4980_v32 = vrot.slane %v2571_v18, 4  ;;  %v3647_v19 = vcombine.low %v2725_v48, %v2726_v35 }
 0x24c   : > { %v2745_v14 = vshll.u32 %v2725_v48, 16  ;;  %v2486_v6 = vld [vmem:[#allocation3 + $0x18] sm:$0xe]  ;;  %v4982_v0 = vrot.slane %v2574_v2, 5  ;;  %v4984_v13 = vrot.slane %v2742_v38, 4  ;;  %v2756_v62 = vshrl.u32 %v2726_v35, 16 }
 0x24d   : > { %v3696_v63 = vpack.c.bf16 %v2085_v11, %v2085_v11  ;;  %v2086_v9 = vmax.f32 %v2076_v23, 0.0  ;;  %v2759_v12 = vshll.u32 %v2726_v35, 16  ;;  %v4988_v1 = vld [vmem:[#allocation3 + $0x1c] sm:$0x1]  ;;  %v3601_v42 = vrot.slane %v2485_v8, 9  ;;  %v3862_v50 = vld [vmem:[%s5428_s6] sm:$0xff]  }
 0x24e   : > { %v4986_v49 = vrot.slane %v2745_v14, 5  ;;  %v4990_v29 = vrot.slane %v2756_v62, 4  ;;  %v2517_v57 = vrot.slane %v4976_v58, 5  ;;  %v3602_v3 = vrot.slane %v2486_v6, 9  ;;  %v2320_v56 = vld [vmem:[#allocation3 + $0x30] sm:$0xf]  ;;  %3744 = vmatprep.subr.bf16.mxu1 %v3862_v50 }
 0x24f   : > { %v2231_v25 = vshrl.u32 %v3696_v63, 16  ;;  %v2234_v27 = vshll.u32 %v3696_v63, 16  ;;  %v3697_v53 = vpack.c.bf16 %v2086_v9, %v2086_v9  ;;  %3057 = vrot.lane.b32.xlu0 %v3647_v19, %s3966_s23  ;;  %v4994_v16 = vrot.slane %v2759_v12, 5  ;;  %v2323_v17 = vld [vmem:[#allocation3 + $0x34] sm:$0x1]  ;;  %3745 = vmatpush3.bf16.msra.mxu1 %v3862_v50 }
 0x250   : > { %v2518_v33 = vsel %vm4204_vm11, %v3601_v42, %v2517_v57  ;;  %v2521_v61 = vrot.slane %v4988_v1, 5  ;;  %v2378_v55 = vor.u32 %v4956_v52, %v4951_v51  ;;  %v2388_v48 = vrot.slane %v2386_v37, 4  ;;  %v2326_v38 = vld [vmem:[#allocation3 + $0x38] sm:$0xf]  ;;  %v2329_v8 = vld [vmem:[#allocation3 + $0x3c] sm:$0x1] }
 0x251   : > { %v2038_v45 = vpop.f32.mrb[16].mxu0  ;;  %v2233_v59 = vrot.slane %v2231_v25, 7  ;;  %v2239_v26 = vshrl.u32 %v3697_v53, 16  ;;  %v2242_v5 = vshll.u32 %v3697_v53, 16  ;;  %v2391_v51 = vrot.slane %v2389_v47, 5 }
 0x252   : > { %v2060_v22 = vmul.f32 %v4881_v60, %v2038_v45  ;;  %v3742_v39 = vpop.f32.mrb[17].mxu0  ;;  %v2522_v34 = vsel %vm4204_vm11, %v3602_v3, %v2521_v61  ;;  %v2379_v18 = vrot.slane %v2378_v55, 4  ;;  %v2395_v52 = vshll.u32 %v4919_v36, 16  ;;  %v2542_v47 = vld [vmem:[#allocation3 + $0x18] sm:$0xf] }
 0x253   : > { %v2041_v10 = vpop.f32.mrb[18].mxu0  ;;  %v2236_v37 = vor.u32 %v2234_v27, %v2233_v59  ;;  %v2237_v35 = vrot.slane %v2233_v59, 4  ;;  %v2241_v20 = vrot.slane %v2239_v26, 7  ;;  %v3632_v23 = vcombine.low %v2518_v33, %v2522_v34  ;;  %v2543_v9 = vld [vmem:[#allocation3 + $0x20] sm:$0xf] }
 0x254   : > { %v2077_v54 = vadd.f32 %v4886_v31, %v2060_v22  ;;  %v3743_v2 = vpop.f32.mrb[19].mxu0  ;;  %v2061_v11 = vmul.f32 %v4881_v60, %v2041_v10  ;;  %v2384_v14 = vsel %vm4212_vm12, %v2379_v18, %v4959_v24  ;;  %v2392_v6 = vor.u32 %v2391_v51, %v2388_v48  ;;  %v3863_v60 = vld [vmem:[%s5428_s6 + $0x8] sm:$0xff]   ;;  %v2669_v48 = vld [vmem:[#allocation3 + $0x10] sm:$0xe]  ;;  %v5038_v22 = vld [vmem:[#allocation3 + $0x14] sm:$0x1] }
 0x255   : > { %v2321_v36 = vsel %vm4894_vm15, %v2236_v37, %v2320_v56  ;;  %v2324_v19 = vsel %vm4828_vm13, %v2237_v35, %v2323_v17  ;;  %v2244_v62 = vor.u32 %v2242_v5, %v2241_v20  ;;  %v2245_v63 = vrot.slane %v2241_v20, 4  ;;  %2963 = vrot.lane.b32.xlu1 %v3632_v23, %s3963_s21  ;;  %v5030_v50 = vld [vmem:[#allocation3 + $0xc] sm:$0x1]  ;;  %3746 = vmatprep.subr.bf16.mxu1 %v3863_v60  ;;  %v2668_v55 = vld [vmem:[#allocation3 + $0x8] sm:$0xe] }
 0x256   : > { %2322 = vst [vmem:[#allocation3 + $0x30] sm:$0xf] %v2321_v36  ;;  %2325 = vst [vmem:[#allocation3 + $0x34] sm:$0x1] %v2324_v19  ;;  %v2087_v12 = vmax.f32 %v2077_v54, 0.0  ;;  %v2078_v24 = vadd.f32 %v4886_v31, %v2061_v11  ;;  %v2393_v42 = vrot.slane %v2392_v6, 4  ;;  %v3636_v61 = vcombine.low %v2542_v47, %v2543_v9  ;;  %3747 = vmatpush3.bf16.msra.mxu1 %v3863_v60 }
 0x257   : > { %v2397_v57 = vrot.slane %v2395_v52, 5  ;;  %v2327_v3 = vsel %vm4894_vm15, %v2244_v62, %v2326_v38  ;;  %v2330_v25 = vsel %vm4828_vm13, %v2245_v63, %v2329_v8  ;;  %v2585_v27 = vshrl.u32 %v2542_v47, 16  ;;  %v2727_v18 = vld [vmem:[#allocation3 + $0x20] sm:$0xf]  ;;  %v2728_v54 = vld [vmem:[#allocation3 + $0x28] sm:$0xf] }
 0x258   : > { %v2588_v53 = vshll.u32 %v2542_v47, 16  ;;  %2328 = vst [vmem:[#allocation3 + $0x38] sm:$0xf] %v2327_v3  ;;  %2331 = vst [vmem:[#allocation3 + $0x3c] sm:$0x1] %v2330_v25  ;;  %v3698_v45 = vpack.c.bf16 %v2087_v12, %v2087_v12  ;;  %v2088_v33 = vmax.f32 %v2078_v24, 0.0  ;;  %v3648_v12 = vcombine.low %v2727_v18, %v2728_v54 }
 0x259   : > { %v2398_v31 = vsel %vm4212_vm12, %v2393_v42, %v2397_v57  ;;  %v5034_v56 = vrot.slane %v2585_v27, 4  ;;  %v2599_v5 = vshrl.u32 %v2543_v9, 16  ;;  %2991 = vrot.lane.b32.xlu1 %v3636_v61, %s3959_s13  ;;  %v2602_v34 = vshll.u32 %v2543_v9, 16  ;;  %v2332_v51 = vld [vmem:[#allocation3 + $0x40] sm:$0xf] }
 0x25a   : > { %v3627_v59 = vcombine.low %v2384_v14, %v2398_v31  ;;  %v5036_v26 = vrot.slane %v2588_v53, 5  ;;  %v2247_v39 = vshrl.u32 %v3698_v45, 16  ;;  %v2250_v17 = vshll.u32 %v3698_v45, 16  ;;  %v2335_v38 = vld [vmem:[#allocation3 + $0x44] sm:$0x1] }
 0x25b   : > { %v3699_v10 = vpack.c.bf16 %v2088_v33, %v2088_v33  ;;  %v5042_v52 = vrot.slane %v2599_v5, 4  ;;  %v3607_v37 = vrot.slane %v2668_v55, 9  ;;  %v2694_v35 = vrot.slane %v5030_v50, 5  ;;  %v2338_v14 = vld [vmem:[#allocation3 + $0x48] sm:$0xf] }
 0x25c   : > { %2941 = vrot.lane.b32.xlu0 %v3627_v59, %s3956_s1  ;;  %v3608_v20 = vrot.slane %v2669_v48, 9  ;;  %v2249_v2 = vrot.slane %v2247_v39, 7  ;;  %v5045_v23 = vrot.slane %v2602_v34, 5  ;;  %v2341_v6 = vld [vmem:[#allocation3 + $0x4c] sm:$0x1]  ;;  %v2698_v36 = vrot.slane %v5038_v22, 5 }
 0x25d   : > { %v2255_v8 = vshrl.u32 %v3699_v10, 16  ;;  %v2258_v11 = vshll.u32 %v3699_v10, 16  ;;  %v2695_v47 = vsel %vm4204_vm11, %v3607_v37, %v2694_v35  ;;  %v2770_v19 = vshrl.u32 %v2727_v18, 16  ;;  %v5050_v24 = vld [vmem:[#allocation3 + $0x14] sm:$0x1]  ;;  %3059 = vrot.lane.b32.xlu1 %v3648_v12, %s3966_s23 }
 0x25e   : > { %v2773_v62 = vshll.u32 %v2727_v18, 16  ;;  %v2252_v63 = vor.u32 %v2250_v17, %v2249_v2  ;;  %v2253_v9 = vrot.slane %v2249_v2, 4  ;;  %v2853_v42 = vld [vmem:[#allocation3 + $0x10] sm:$0xe]  ;;  %v2699_v57 = vsel %vm4204_vm11, %v3608_v20, %v2698_v36  ;;  %v2854_v53 = vld [vmem:[#allocation3 + $0x18] sm:$0xe] }
 0x25f   : > { %v2257_v60 = vrot.slane %v2255_v8, 7  ;;  %v5054_v3 = vrot.slane %v2770_v19, 4  ;;  %v2784_v27 = vshrl.u32 %v2728_v54, 16  ;;  %v5063_v55 = vld [vmem:[#allocation3 + $0x1c] sm:$0x1]  ;;  %v3643_v59 = vcombine.low %v2695_v47, %v2699_v57 }
 0x260   : > { %v5056_v25 = vrot.slane %v2773_v62, 5  ;;  %v2333_v45 = vsel %vm4894_vm15, %v2252_v63, %v2332_v51  ;;  %v2336_v33 = vsel %vm4828_vm13, %v2253_v9, %v2335_v38  ;;  %v5065_v48 = vld [vmem:[#allocation3 + $0x10] sm:$0xf]  ;;  %v2787_v39 = vshll.u32 %v2728_v54, 16  ;;  %v5069_v10 = vld [vmem:[#allocation3 + $0x18] sm:$0xf] }
 0x261   : > { %v2260_v31 = vor.u32 %v2258_v11, %v2257_v60  ;;  %v2261_v61 = vrot.slane %v2257_v60, 4  ;;  %2334 = vst [vmem:[#allocation3 + $0x40] sm:$0xf] %v2333_v45  ;;  %2337 = vst [vmem:[#allocation3 + $0x44] sm:$0x1] %v2336_v33  ;;  %v5067_v5 = vrot.slane %v2784_v27, 4  ;;  %3029 = vrot.lane.b32.xlu0 %v3643_v59, %s3967_s27  ;;  %v2577_v33 = vor.u32 %v4982_v0, %v4980_v32 }
 0x262   : > { %v3615_v17 = vrot.slane %v2853_v42, 9  ;;  %v2879_v51 = vrot.slane %v5050_v24, 5  ;;  %v3616_v37 = vrot.slane %v2854_v53, 9  ;;  %v5077_v35 = vrot.slane %v2787_v39, 5  ;;  %v5091_v11 = vld [vmem:[#allocation3 + $0x1c] sm:$0x1] }
 0x263   : > { %v2339_v34 = vsel %vm4894_vm15, %v2260_v31, %v2338_v14  ;;  %v2342_v18 = vsel %vm4828_vm13, %v2261_v61, %v2341_v6  ;;  %v2883_v20 = vrot.slane %v5063_v55, 5  ;;  %v2400_v54 = vshrl.u32 %v5065_v48, 16  ;;  %v3865_v14 = vld [vmem:[%s5428_s6 + $0x10] sm:$0xff]   ;;  %v2670_v19 = vld [vmem:[#allocation3 + $0x18] sm:$0xe] }
 0x264   : > { %2340 = vst [vmem:[#allocation3 + $0x48] sm:$0xf] %v2339_v34  ;;  %2343 = vst [vmem:[#allocation3 + $0x4c] sm:$0x1] %v2342_v18  ;;  %v2403_v21 = vshll.u32 %v5065_v48, 16  ;;  %v2880_v4 = vsel %vm4204_vm11, %v3615_v17, %v2879_v51  ;;  %v2409_v2 = vshll.u32 %v4976_v58, 16  ;;  %3748 = vmatprep.subr.bf16.mxu1 %v3865_v14  ;;  %v2748_v0 = vor.u32 %v4986_v49, %v4984_v13 }
 0x265   : > { %2353 = vst.msk [vmem:[#allocation3 + $0x48] sm:$0xf] %vm2282_vm1, %v5485_v43  ;;  %v2414_v38 = vshrl.u32 %v5069_v10, 16  ;;  %v2417_v8 = vshll.u32 %v5069_v10, 16  ;;  %v2884_v6 = vsel %vm4204_vm11, %v3616_v37, %v2883_v20  ;;  %v2402_v47 = vrot.slane %v2400_v54, 4  ;;  %v3866_v58 = vld [vmem:[%s5428_s6 + $0x18] sm:$0xff]   ;;  %3749 = vmatpush3.bf16.msra.mxu1 %v3865_v14 }
 0x266   : > { %2354 = vst.msk [vmem:[#allocation3 + $0x4c] sm:$0x1] %vm2089_vm10, %v5485_v43  ;;  %v2405_v43 = vrot.slane %v2403_v21, 5  ;;  %v2423_v36 = vshll.u32 %v4988_v1, 16  ;;  %v3655_v62 = vcombine.low %v2880_v4, %v2884_v6  ;;  %v2411_v63 = vrot.slane %v2409_v2, 5  ;;  %3750 = vmatprep.subr.bf16.mxu1 %v3866_v58 }
 0x267   : > { %v2416_v9 = vrot.slane %v2414_v38, 4  ;;  %v2419_v60 = vrot.slane %v2417_v8, 5  ;;  %v2671_v12 = vld [vmem:[#allocation3 + $0x20] sm:$0xe]  ;;  %v2564_v27 = vrot.slane %v2563_v41, 4  ;;  %v2566_v53 = vshll.u32 %v5030_v50, 16 }
 0x268   : > { %v2406_v42 = vor.u32 %v2405_v43, %v2402_v47  ;;  %v2425_v57 = vrot.slane %v2423_v36, 5  ;;  %v2551_v1 = vld [vmem:[#allocation3 + $0x24] sm:$0x1]  ;;  %3097 = vrot.lane.b32.xlu0 %v3655_v62, %s3968_s25  ;;  %v2580_v31 = vshll.u32 %v5038_v22, 16  ;;  %v3609_v61 = vrot.slane %v2670_v19, 9 }
 0x269   : > { %v2420_v45 = vor.u32 %v2419_v60, %v2416_v9  ;;  %v2568_v39 = vrot.slane %v2566_v53, 5  ;;  %v2702_v40 = vrot.slane %v5091_v11, 5  ;;  %v3610_v15 = vrot.slane %v2671_v12, 9  ;;  %3751 = vmatpush3.bf16.msra.mxu1 %v3866_v58  ;;  %v2855_v21 = vld [vmem:[#allocation3 + $0x20] sm:$0xe] }
 0x26a   : > { %v2407_v59 = vrot.slane %v2406_v42, 4  ;;  %v2578_v50 = vrot.slane %v2577_v33, 4  ;;  %v2582_v17 = vrot.slane %v2580_v31, 5  ;;  %v2706_v34 = vrot.slane %v2551_v1, 5  ;;  %v2735_v47 = vld [vmem:[#allocation3 + $0x24] sm:$0x1] }
 0x26b   : > { %v2421_v41 = vrot.slane %v2420_v45, 4  ;;  %v2569_v51 = vsel %vm4212_vm12, %v2564_v27, %v2568_v39  ;;  %v2703_v32 = vsel %vm4204_vm11, %v3609_v61, %v2702_v40  ;;  %v2751_v54 = vshll.u32 %v5050_v24, 16  ;;  %v2736_v43 = vld [vmem:[#allocation3 + $0x2c] sm:$0x1]  ;;  %v2856_v58 = vld [vmem:[#allocation3 + $0x28] sm:$0xe] }
 0x26c   : > { %v2412_v18 = vsel %vm4212_vm12, %v2407_v59, %v2411_v63  ;;  %v2583_v37 = vsel %vm4212_vm12, %v2578_v50, %v2582_v17  ;;  %v2707_v20 = vsel %vm4204_vm11, %v3610_v15, %v2706_v34  ;;  %v2749_v8 = vrot.slane %v2748_v0, 4  ;;  %v2367_v45 = vld [vmem:[#allocation3 + $0x24] sm:$0x1]  ;;  %v2368_v33 = vld [vmem:[#allocation3 + $0x2c] sm:$0x1] }
 0x26d   : > { %v2426_v22 = vsel %vm4212_vm12, %v2421_v41, %v2425_v57  ;;  %v3639_v2 = vcombine.low %v2569_v51, %v2583_v37  ;;  %v3644_v38 = vcombine.low %v2703_v32, %v2707_v20  ;;  %v2753_v14 = vrot.slane %v2751_v54, 5  ;;  %v2488_v31 = vld [vmem:[#allocation3 + $0x28] sm:$0xe]  ;;  %v5151_v39 = vld [vmem:[#allocation3 + $0x20] sm:$0xf] }
 0x26e   : > { %v3628_v4 = vcombine.low %v2412_v18, %v2426_v22  ;;  %v2762_v13 = vor.u32 %v4994_v16, %v4990_v29  ;;  %v2765_v49 = vshll.u32 %v5063_v55, 16  ;;  %v2591_v6 = vor.u32 %v5036_v26, %v5034_v56  ;;  %v5157_v22 = vld [vmem:[#allocation3 + $0x28] sm:$0xf] }
 0x26f   : > { %3009 = vrot.lane.b32.xlu0 %v3639_v2, %s3960_s14  ;;  %v2594_v24 = vshll.u32 %v5091_v11, 16  ;;  %v2605_v36 = vor.u32 %v5045_v23, %v5042_v52  ;;  %v2608_v19 = vshll.u32 %v2551_v1, 16  ;;  %v3617_v62 = vrot.slane %v2855_v21, 9  ;;  %v2487_v23 = vld [vmem:[#allocation3 + $0x20] sm:$0xe] }
 0x270   : > { %2943 = vrot.lane.b32.xlu1 %v3628_v4, %s3956_s1  ;;  %v2754_v29 = vsel %vm4212_vm12, %v2749_v8, %v2753_v14  ;;  %v2763_v16 = vrot.slane %v2762_v13, 4  ;;  %v2767_v55 = vrot.slane %v2765_v49, 5  ;;  %v2592_v56 = vrot.slane %v2591_v6, 4  ;;  %v2544_v21 = vld [vmem:[#allocation3 + $0x28] sm:$0xf] }
 0x271   : > { %v2596_v26 = vrot.slane %v2594_v24, 5  ;;  %v2606_v63 = vrot.slane %v2605_v36, 4  ;;  %v2610_v9 = vrot.slane %v2608_v19, 5  ;;  %v2887_v60 = vrot.slane %v2735_v47, 5  ;;  %v2545_v14 = vld [vmem:[#allocation3 + $0x30] sm:$0xf] }
 0x272   : > { %v2768_v12 = vsel %vm4212_vm12, %v2763_v16, %v2767_v55  ;;  %v3618_v11 = vrot.slane %v2856_v58, 9  ;;  %v2891_v42 = vrot.slane %v2736_v43, 5  ;;  %v2776_v52 = vor.u32 %v5056_v25, %v5054_v3  ;;  %v5174_v24 = vld [vmem:[#allocation3 + $0x3c] sm:$0x1] }
 0x273   : > { %v3651_v57 = vcombine.low %v2754_v29, %v2768_v12  ;;  %v2597_v27 = vsel %vm4212_vm12, %v2592_v56, %v2596_v26  ;;  %v2611_v53 = vsel %vm4212_vm12, %v2606_v63, %v2610_v9  ;;  %v2888_v1 = vsel %vm4204_vm11, %v3617_v62, %v2887_v60  ;;  %v2489_v29 = vld [vmem:[#allocation3 + $0x30] sm:$0xe]  ;;  %v2490_v63 = vld [vmem:[#allocation3 + $0x38] sm:$0xe] }
 0x274   : > { %3031 = vrot.lane.b32.xlu1 %v3644_v38, %s3967_s27  ;;  %v3640_v61 = vcombine.low %v2597_v27, %v2611_v53  ;;  %v2892_v3 = vsel %vm4204_vm11, %v3618_v11, %v2891_v42  ;;  %v2777_v25 = vrot.slane %v2776_v52, 4  ;;  %v2779_v59 = vshll.u32 %v2735_v47, 16  ;;  %v2729_v42 = vld [vmem:[#allocation3 + $0x30] sm:$0xf]  ;;  %v2730_v53 = vld [vmem:[#allocation3 + $0x38] sm:$0xf] }
 0x275   : > { %3077 = vrot.lane.b32.xlu0 %v3651_v57, %s3969_s26  ;;  %v3656_v40 = vcombine.low %v2888_v1, %v2892_v3  ;;  %v2790_v15 = vor.u32 %v5077_v35, %v5067_v5  ;;  %v2793_v41 = vshll.u32 %v2736_v43, 16  ;;  %v3603_v50 = vrot.slane %v2487_v23, 9  ;;  %v5172_v43 = vld [vmem:[#allocation3 + $0x34] sm:$0x1] }
 0x276   : > { %v2781_v17 = vrot.slane %v2779_v59, 5  ;;  %v2525_v34 = vrot.slane %v2367_v45, 5  ;;  %v3604_v18 = vrot.slane %v2488_v31, 9  ;;  %v2529_v51 = vrot.slane %v2368_v33, 5 }
 0x277   : > { %v2791_v32 = vrot.slane %v2790_v15, 4  ;;  %v2795_v0 = vrot.slane %v2793_v41, 5  ;;  %v2428_v37 = vshrl.u32 %v5151_v39, 16  ;;  %v2431_v20 = vshll.u32 %v5151_v39, 16 }
 0x278   : > { %3011 = vrot.lane.b32.xlu1 %v3640_v61, %s3960_s14  ;;  %v2782_v54 = vsel %vm4212_vm12, %v2777_v25, %v2781_v17  ;;  %v2530_v5 = vsel %vm4204_vm11, %v3604_v18, %v2529_v51  ;;  %v2437_v35 = vshll.u32 %v2367_v45, 16  ;;  %v2526_v2 = vsel %vm4204_vm11, %v3603_v50, %v2525_v34  ;;  %v5197_v34 = vld [vmem:[#allocation3 + $0x40] sm:$0xf]  ;;  %v2552_v18 = vld [vmem:[#allocation3 + $0x2c] sm:$0x1] }
 0x279   : > { %3099 = vrot.lane.b32.xlu0 %v3656_v40, %s3968_s25  ;;  %v2796_v4 = vsel %vm4212_vm12, %v2791_v32, %v2795_v0  ;;  %v2430_v38 = vrot.slane %v2428_v37, 4  ;;  %v2433_v8 = vrot.slane %v2431_v20, 5  ;;  %v3633_v49 = vcombine.low %v2526_v2, %v2530_v5  ;;  %v5188_v40 = vld [vmem:[#allocation3 + $0x38] sm:$0xf]  ;;  %v2553_v20 = vld [vmem:[#allocation3 + $0x34] sm:$0x1] }
 0x27a   : > { %v3652_v13 = vcombine.low %v2782_v54, %v2796_v4  ;;  %v2442_v6 = vshrl.u32 %v5157_v22, 16  ;;  %v2445_v47 = vshll.u32 %v5157_v22, 16  ;;  %v2451_v19 = vshll.u32 %v2368_v33, 16  ;;  %v2672_v54 = vld [vmem:[#allocation3 + $0x28] sm:$0xe] }
 0x27b   : > { %v2434_v36 = vor.u32 %v2433_v8, %v2430_v38  ;;  %v2613_v58 = vshrl.u32 %v2544_v21, 16  ;;  %v2616_v62 = vshll.u32 %v2544_v21, 16  ;;  %v2439_v16 = vrot.slane %v2437_v35, 5  ;;  %v2673_v2 = vld [vmem:[#allocation3 + $0x30] sm:$0xe] }
 0x27c   : > { %3079 = vrot.lane.b32.xlu1 %v3652_v13, %s3969_s26  ;;  %v2444_v55 = vrot.slane %v2442_v6, 4  ;;  %v2447_v56 = vrot.slane %v2445_v47, 5  ;;  %v2627_v26 = vshrl.u32 %v2545_v14, 16  ;;  %v2453_v60 = vrot.slane %v2451_v19, 5 }
 0x27d   : > { %2965 = vrot.lane.b32.xlu0 %v3633_v49, %s3963_s21  ;;  %v2435_v9 = vrot.slane %v2434_v36, 4  ;;  %v5178_v12 = vrot.slane %v2613_v58, 4  ;;  %v3637_v11 = vcombine.low %v2544_v21, %v2545_v14  ;;  %v5180_v23 = vrot.slane %v2616_v62, 5  ;;  %v5212_v49 = vld [vmem:[#allocation3 + $0x30] sm:$0xf] }
 0x27e   : > { %v2448_v52 = vor.u32 %v2447_v56, %v2444_v55  ;;  %v2630_v57 = vshll.u32 %v2545_v14, 16  ;;  %v3605_v27 = vrot.slane %v2489_v29, 9  ;;  %v5182_v1 = vrot.slane %v2627_v26, 4  ;;  %v5219_v58 = vld [vmem:[#allocation3 + $0x38] sm:$0xf] }
 0x27f   : > { %v2533_v45 = vrot.slane %v5172_v43, 5  ;;  %v3606_v33 = vrot.slane %v2490_v63, 9  ;;  %v2537_v31 = vrot.slane %v5174_v24, 5  ;;  %v2440_v61 = vsel %vm4212_vm12, %v2435_v9, %v2439_v16 }
 0x280   : > { %v2449_v3 = vrot.slane %v2448_v52, 4  ;;  %v2798_v25 = vshrl.u32 %v2729_v42, 16  ;;  %v2801_v59 = vshll.u32 %v2729_v42, 16  ;;  %v5191_v15 = vrot.slane %v2630_v57, 5 }
 0x281   : > { %2993 = vrot.lane.b32.xlu0 %v3637_v11, %s3959_s13  ;;  %v2534_v41 = vsel %vm4204_vm11, %v3605_v27, %v2533_v45  ;;  %v2538_v50 = vsel %vm4204_vm11, %v3606_v33, %v2537_v31  ;;  %v2812_v17 = vshrl.u32 %v2730_v53, 16  ;;  %v3649_v37 = vcombine.low %v2729_v42, %v2730_v53  ;;  %v5240_v33 = vld [vmem:[#allocation3 + $0x3c] sm:$0x1]  ;;  %v2674_v31 = vld [vmem:[#allocation3 + $0x38] sm:$0xe] }
 0x282   : > { %v2454_v51 = vsel %vm4212_vm12, %v2449_v3, %v2453_v60  ;;  %v3634_v32 = vcombine.low %v2534_v41, %v2538_v50  ;;  %v5201_v0 = vrot.slane %v2798_v25, 4  ;;  %v5203_v35 = vrot.slane %v2801_v59, 5  ;;  %v2675_v59 = vld [vmem:[#allocation3 + $0x40] sm:$0xe] }
 0x283   : > { %v3629_v5 = vcombine.low %v2440_v61, %v2454_v51  ;;  %v2815_v21 = vshll.u32 %v2730_v53, 16  ;;  %v2641_v4 = vshrl.u32 %v5188_v40, 16  ;;  %v5206_v38 = vrot.slane %v2812_v17, 4  ;;  %v5242_v17 = vld [vmem:[#allocation3 + $0x44] sm:$0x1] }
 0x284   : > { %v2644_v8 = vshll.u32 %v5188_v40, 16  ;;  %v3638_v14 = vcombine.low %v5188_v40, %v5197_v34  ;;  %v2655_v13 = vshrl.u32 %v5197_v34, 16  ;;  %v2658_v47 = vshll.u32 %v5197_v34, 16 }
 0x285   : > { %2945 = vrot.lane.b32.xlu1 %v3629_v5, %s3956_s1  ;;  %3061 = vrot.lane.b32.xlu0 %v3649_v37, %s3966_s23  ;;  %v5216_v6 = vrot.slane %v2815_v21, 5  ;;  %v3611_v36 = vrot.slane %v2672_v54, 9  ;;  %v2710_v19 = vrot.slane %v2552_v18, 5  ;;  %v5221_v62 = vrot.slane %v2641_v4, 4  ;;  %v2737_v21 = vld [vmem:[#allocation3 + $0x34] sm:$0x1] }
 0x286   : > { %v5223_v29 = vrot.slane %v2644_v8, 5  ;;  %v5225_v16 = vrot.slane %v2655_v13, 4  ;;  %v3612_v55 = vrot.slane %v2673_v2, 9  ;;  %v2714_v26 = vrot.slane %v2553_v20, 5 }
 0x287   : > { %v2711_v56 = vsel %vm4204_vm11, %v3611_v36, %v2710_v19  ;;  %v2456_v63 = vshrl.u32 %v5212_v49, 16  ;;  %v2459_v9 = vshll.u32 %v5212_v49, 16  ;;  %v2465_v60 = vshll.u32 %v5172_v43, 16 }
 0x288   : > { %v2470_v11 = vshrl.u32 %v5219_v58, 16  ;;  %v2473_v42 = vshll.u32 %v5219_v58, 16  ;;  %v2479_v52 = vshll.u32 %v5174_v24, 16  ;;  %v2715_v57 = vsel %vm4204_vm11, %v3612_v55, %v2714_v26  ;;  %v2732_v26 = vld [vmem:[#allocation3 + $0x48] sm:$0xf] }
 0x289   : > { %2967 = vrot.lane.b32.xlu1 %v3634_v32, %s3963_s21  ;;  %v2458_v27 = vrot.slane %v2456_v63, 4  ;;  %v2461_v53 = vrot.slane %v2459_v9, 5  ;;  %v2619_v45 = vor.u32 %v5180_v23, %v5178_v12  ;;  %v3645_v43 = vcombine.low %v2711_v56, %v2715_v57  ;;  %v2857_v57 = vld [vmem:[#allocation3 + $0x30] sm:$0xe]  ;;  %s5366_s21 = scalar_lea.hbm %s5431_s9, %s3700_s24 }
 0x28a   : > { %v2467_v61 = vrot.slane %v2465_v60, 5  ;;  %v2472_v3 = vrot.slane %v2470_v11, 4  ;;  %v2475_v25 = vrot.slane %v2473_v42, 5  ;;  %v2481_v24 = vrot.slane %v2479_v52, 5 }
 0x28b   : > { %v2462_v40 = vor.u32 %v2461_v53, %v2458_v27  ;;  %v2620_v41 = vrot.slane %v2619_v45, 4  ;;  %v2622_v50 = vshll.u32 %v2552_v18, 16  ;;  %3033 = vrot.lane.b32.xlu0 %v3645_v43, %s3967_s27  ;;  %v2633_v12 = vor.u32 %v5191_v15, %v5182_v1  ;;  %v2738_v15 = vld [vmem:[#allocation3 + $0x3c] sm:$0x1]  ;;  %v2858_v43 = vld [vmem:[#allocation3 + $0x38] sm:$0xe] }
 0x28c   : > { %v2476_v34 = vor.u32 %v2475_v25, %v2472_v3  ;;  %v2636_v23 = vshll.u32 %v2553_v20, 16  ;;  %v3613_v51 = vrot.slane %v2674_v31, 9  ;;  %v2718_v54 = vrot.slane %v5240_v33, 5 }
 0x28d   : > { %2995 = vrot.lane.b32.xlu1 %v3638_v14, %s3959_s13  ;;  %v2463_v32 = vrot.slane %v2462_v40, 4  ;;  %v2624_v37 = vrot.slane %v2622_v50, 5  ;;  %v3614_v5 = vrot.slane %v2675_v59, 9  ;;  %v2634_v18 = vrot.slane %v2633_v12, 4  ;;  %v2731_v14 = vld [vmem:[#allocation3 + $0x40] sm:$0xf] }
 0x28e   : > { %v2477_v4 = vrot.slane %v2476_v34, 4  ;;  %v2638_v2 = vrot.slane %v2636_v23, 5  ;;  %v2722_v8 = vrot.slane %v5242_v17, 5  ;;  %v2660_v13 = vrot.slane %v2658_v47, 5 }
 0x28f   : > { %v2468_v36 = vsel %vm4212_vm12, %v2463_v32, %v2467_v61  ;;  %v2625_v1 = vsel %vm4212_vm12, %v2620_v41, %v2624_v37  ;;  %v2804_v20 = vor.u32 %v5203_v35, %v5201_v0  ;;  %v2807_v56 = vshll.u32 %v2737_v21, 16 }
 0x290   : > { %v2482_v19 = vsel %vm4212_vm12, %v2477_v4, %v2481_v24  ;;  %v2639_v55 = vsel %vm4212_vm12, %v2634_v18, %v2638_v2  ;;  %v2723_v47 = vsel %vm4204_vm11, %v3614_v5, %v2722_v8  ;;  %v2719_v60 = vsel %vm4204_vm11, %v3613_v51, %v2718_v54  ;;  %v2739_v54 = vld [vmem:[#allocation3 + $0x44] sm:$0x1] }
 0x291   : > { %v3630_v63 = vcombine.low %v2468_v36, %v2482_v19  ;;  %v3641_v9 = vcombine.low %v2625_v1, %v2639_v55  ;;  %v2805_v11 = vrot.slane %v2804_v20, 4  ;;  %v2809_v42 = vrot.slane %v2807_v56, 5  ;;  %v2860_v20 = vld [vmem:[#allocation3 + $0x48] sm:$0xe] }
 0x292   : > { %v2818_v0 = vor.u32 %v5216_v6, %v5206_v38  ;;  %v2821_v35 = vshll.u32 %v2738_v15, 16  ;;  %v2826_v52 = vshrl.u32 %v2731_v14, 16  ;;  %v3646_v27 = vcombine.low %v2719_v60, %v2723_v47  ;;  %v3867_v47 = vld [vmem:[%s5428_s6 + $0x20] ss:$0 sps:$4 sm:$0xff]  }
 0x293   : > { %2947 = vrot.lane.b32.xlu1 %v3630_v63, %s3956_s1  ;;  %3013 = vrot.lane.b32.xlu0 %v3641_v9, %s3960_s14  ;;  %v2829_v53 = vshll.u32 %v2731_v14, 16  ;;  %v2840_v45 = vshrl.u32 %v2732_v26, 16  ;;  %v2843_v31 = vshll.u32 %v2732_v26, 16  ;;  %v2810_v61 = vsel %vm4212_vm12, %v2805_v11, %v2809_v42  ;;  %v2859_v63 = vld [vmem:[#allocation3 + $0x40] sm:$0xe] }
 0x294   : > { %v2819_v3 = vrot.slane %v2818_v0, 4  ;;  %v2823_v25 = vrot.slane %v2821_v35, 5  ;;  %v2828_v59 = vrot.slane %v2826_v52, 4  ;;  %v3619_v24 = vrot.slane %v2857_v57, 9  ;;  %3762 = vmatprep.subr.msk.bf16.mxu1 %vm3222_vm3, %v3867_v47 }
 0x295   : > { %v2831_v40 = vrot.slane %v2829_v53, 5  ;;  %v2842_v38 = vrot.slane %v2840_v45, 4  ;;  %v2845_v6 = vrot.slane %v2843_v31, 5  ;;  %v2895_v50 = vrot.slane %v2737_v21, 5 }
 0x296   : > { %v2824_v41 = vsel %vm4212_vm12, %v2819_v3, %v2823_v25  ;;  %v3620_v34 = vrot.slane %v2858_v43, 9  ;;  %v2899_v12 = vrot.slane %v2738_v15, 5  ;;  %v2647_v51 = vor.u32 %v5223_v29, %v5221_v62 }
 0x297   : > { %3035 = vrot.lane.b32.xlu1 %v3646_v27, %s3967_s27  ;;  %v3653_v23 = vcombine.low %v2810_v61, %v2824_v41  ;;  %v2650_v32 = vshll.u32 %v5240_v33, 16  ;;  %v2661_v37 = vor.u32 %v2660_v13, %v5225_v16  ;;  %v2664_v4 = vshll.u32 %v5242_v17, 16  ;;  %v2740_v33 = vld [vmem:[#allocation3 + $0x4c] sm:$0x1]  ;;  %s3878_s27 = sshll.u32 %s3970_s2, 4  ;;  %s3879_s27 = int_to_ptr.vmem [resolvable:$false] %s3878_s27 }
 0x298   : > { %v2900_v5 = vsel %vm4204_vm11, %v3620_v34, %v2899_v12  ;;  %v2832_v18 = vor.u32 %v2831_v40, %v2828_v59  ;;  %v3650_v21 = vcombine.low %v2731_v14, %v2732_v26  ;;  %v2896_v2 = vsel %vm4204_vm11, %v3619_v24, %v2895_v50  ;;  %s3880_s16 = scalar_lea.vmem %s3879_s27, 2048 }
 0x299   : > { %3081 = vrot.lane.b32.xlu0 %v3653_v23, %s3969_s26  ;;  %v2648_v8 = vrot.slane %v2647_v51, 4  ;;  %v2662_v36 = vrot.slane %v2661_v37, 4  ;;  %v2652_v62 = vrot.slane %v2650_v32, 5  ;;  %v2666_v29 = vrot.slane %v2664_v4, 5 }
 0x29a   : > { %v2835_v1 = vshll.u32 %v2739_v54, 16  ;;  %v2846_v16 = vor.u32 %v2845_v6, %v2842_v38  ;;  %v3657_v13 = vcombine.low %v2896_v2, %v2900_v5  ;;  %v2849_v15 = vshll.u32 %v2740_v33, 16 }
 0x29b   : > { %3063 = vrot.lane.b32.xlu1 %v3650_v21, %s3966_s23  ;;  %v2653_v17 = vsel %vm4212_vm12, %v2648_v8, %v2652_v62  ;;  %v2667_v14 = vsel %vm4212_vm12, %v2662_v36, %v2666_v29  ;;  %v2833_v19 = vrot.slane %v2832_v18, 4  ;;  %v3622_v60 = vrot.slane %v2860_v20, 9 }
 0x29c   : > { %v2847_v55 = vrot.slane %v2846_v16, 4  ;;  %v3642_v56 = vcombine.low %v2653_v17, %v2667_v14  ;;  %v2851_v26 = vrot.slane %v2849_v15, 5  ;;  %v2837_v9 = vrot.slane %v2835_v1, 5 }
 0x29d   : > { %3101 = vrot.lane.b32.xlu0 %v3657_v13, %s3968_s25  ;;  %v2907_v11 = vrot.slane %v2740_v33, 5  ;;  %v3624_v42 = vcombine.low %v5065_v48, %v5069_v10  ;;  %v3621_v52 = vrot.slane %v2859_v63, 9  ;;  %v2903_v57 = vrot.slane %v2739_v54, 5 }
 0x29e   : > { %v2852_v0 = vsel %vm4212_vm12, %v2847_v55, %v2851_v26  ;;  %v2838_v35 = vsel %vm4212_vm12, %v2833_v19, %v2837_v9  ;;  %v3224_v53 = vsel %vm3222_vm3, %v3867_v47, 0  ;;  %v3625_v45 = vcombine.low %v5151_v39, %v5157_v22 }
 0x29f   : > { %3015 = vrot.lane.b32.xlu1 %v3642_v56, %s3960_s14  ;;  %v3654_v27 = vcombine.low %v2838_v35, %v2852_v0  ;;  %v3626_v48 = vcombine.low %v5212_v49, %v5219_v58  ;;  %v2908_v10 = vsel %vm4204_vm11, %v3622_v60, %v2907_v11  ;;  %3753 = vmatpush3.bf16.msra.mxu1 %v3224_v53  ;;  %vm3150_vm12 = vcmask 392192   ;;  %s461_s14 = sand.u32 1, %s3936_s29  }
 0x2a0   : > { %v2904_v46 = vsel %vm4204_vm11, %v3621_v52, %v2903_v57  ;;  %vm3141_vm11 = vcmask 326656   ;;  %s3481_s18 = sshll.u32 %s461_s14, 6  ;;  %s5375_s10 = scalar_lea.sflag [#allocation5], %s461_s14 }
 0x2a1   : > { %v3658_v31 = vcombine.low %v2904_v46, %v2908_v10  ;;  %s463_s22 = scalar_lea.vmem [#allocation4], %s3481_s18 }
 0x2a3   : > { %3083 = vrot.lane.b32.xlu1 %v3654_v27, %s3969_s26 }
 0x2a7   : > { %3103 = vrot.lane.b32.xlu1 %v3658_v31, %s3968_s25  ;;  %s3353_s25 = sshll.u32 %s463_s22, 4  ;;  %s5369_s25 = int_to_ptr.vmem [resolvable:$true] %s3353_s25 }
 0x2a8   : > { %s3874_s23 = scalar_lea.vmem %s5369_s25, 1024  ;;  %p3881_p1 = scmp.lt.s32.totalorder %s5369_s25, %s3879_s27 }
 0x2a9   : > { %p3875_p12 = scmp.ne.s32.totalorder %s5369_s25, %s3874_s23  ;;  %p3882_p2 = scmp.lt.s32.totalorder %s3880_s16, %s3874_s23 }
 0x2ab   : > { %p3876_p13 = pnand %p3875_p12, %p4062_p4  ;;  %p3883_p3 = por %p3882_p2, %p3881_p1 }
 0x2ad   : > { %p3877_p0 = pneg %p3876_p13 }
 0x2af   : > { %p3884_p5 = pnand %p3883_p3, %p3877_p0 }
 0x2b7   : > { %v2962_v43 = vpop.permute.xlu0 %2961 }
 0x2bd   : > { %v2990_v61 = vpop.permute.xlu0 %2989 }
 0x2c1   : > { %v3058_v3 = vpop.permute.xlu0 %3057 }
 0x2c7   : > { %v2964_v25 = vpop.permute.xlu1 %2963 }
 0x2cb   : > { %v2992_v22 = vpop.permute.xlu1 %2991 }
 0x2ce   : > { %v2942_v39 = vpop.permute.xlu0 %2941 }
 0x2cf   : > { %v3107_v49 = vsel %vm1860_vm0, %v3623_v7, %v2942_v39  ;;  %v3060_v58 = vpop.permute.xlu1 %3059 }
 0x2d0   : > { %v3118_v30 = vsel %vm1882_vm4, %v3107_v49, %v2962_v43  ;;  %v3668_v43 = vld [vmem:[%s5429_s7] ss:$0 sm:$0xff] }
 0x2d1   : > { %v3126_v6 = vsel %vm1904_vm6, %v3118_v30, %v2990_v61 }
 0x2d3   : > { %v3030_v59 = vpop.permute.xlu0 %3029 }
 0x2da   : > { %v3098_v40 = vpop.permute.xlu0 %3097 }
 0x2e1   : > { %v3010_v24 = vpop.permute.xlu0 %3009 }
 0x2e2   : > { %v2944_v38 = vpop.permute.xlu1 %2943  ;;  %v3134_v41 = vsel %vm1926_vm8, %v3126_v6, %v3010_v24 }
 0x2e3   : > { %v3110_v50 = vsel %vm1860_vm0, %v3624_v42, %v2944_v38  ;;  %v3143_v34 = vsel %vm3141_vm11, %v3134_v41, %v3030_v59 }
 0x2e4   : > { %v3152_v44 = vsel %vm3150_vm12, %v3143_v34, %v3058_v3  ;;  %v3120_v28 = vsel %vm1882_vm4, %v3110_v50, %v2964_v25  ;;  %v3669_v3 = vld [vmem:[%s5430_s8] ss:$0 sm:$0xff] }
 0x2e5   : > { %v3128_v51 = vsel %vm1904_vm6, %v3120_v28, %v2992_v22 }
 0x2e6   : > { %v3032_v12 = vpop.permute.xlu1 %3031 }
 0x2e7   : > { %v3078_v7 = vpop.permute.xlu0 %3077 }
 0x2e8   : > { %v3161_v23 = vsel %vm3159_vm2, %v3152_v44, %v3078_v7 }
 0x2e9   : > { %v3170_v37 = vsel %vm3168_vm5, %v3161_v23, %v3098_v40 }
 0x2ea   : > { %v3012_v32 = vpop.permute.xlu1 %3011  ;;  %3754 = vmatprep.mubr.msk.bf16.mxu1 %vm3213_vm7, %v3170_v37 }
 0x2eb   : > { %v3136_v54 = vsel %vm1926_vm8, %v3128_v51, %v3012_v32  ;;  %v3100_v4 = vpop.permute.xlu0 %3099 }
 0x2ec   : > { %v3145_v5 = vsel %vm3141_vm11, %v3136_v54, %v3032_v12 }
 0x2ed   : > { %v3154_v18 = vsel %vm3150_vm12, %v3145_v5, %v3060_v58 }
 0x2ee   : > { %v3080_v21 = vpop.permute.xlu1 %3079 }
 0x2ef   : > { %v3163_v2 = vsel %vm3159_vm2, %v3154_v18, %v3080_v21  ;;  %v2966_v8 = vpop.permute.xlu0 %2965 }
 0x2f0   : > { %v3172_v36 = vsel %vm3168_vm5, %v3163_v2, %v3100_v4 }
 0x2f1   : > { %3755 = vmatmul.mubr.msk.bf16.vlgmr.msra.gmra.mrb[0].mxu1 %vm3213_vm7, %v3172_v36 }
 0x2f3   : > { %v2994_v62 = vpop.permute.xlu0 %2993 }
 0x2f7   : > { %v2946_v29 = vpop.permute.xlu1 %2945  ;;  %v3062_v33 = vpop.permute.xlu0 %3061 }
 0x2f8   : > { %v3113_v15 = vsel %vm1860_vm0, %v3625_v45, %v2946_v29 }
 0x2f9   : > { %v3122_v20 = vsel %vm1882_vm4, %v3113_v15, %v2966_v8 }
 0x2fa   : > { %v3130_v17 = vsel %vm1904_vm6, %v3122_v20, %v2994_v62 }
 0x2fb   : > { %v2968_v1 = vpop.permute.xlu1 %2967 }
 0x2fd   : > { %v3034_v13 = vpop.permute.xlu0 %3033 }
 0x2ff   : > { %v2996_v16 = vpop.permute.xlu1 %2995 }
 0x305   : > { %v2948_v14 = vpop.permute.xlu1 %2947  ;;  %v3014_v19 = vpop.permute.xlu0 %3013 }
 0x306   : > { %v3138_v55 = vsel %vm1926_vm8, %v3130_v17, %v3014_v19  ;;  %v3116_v26 = vsel %vm1860_vm0, %v3626_v48, %v2948_v14 }
 0x307   : > { %v3147_v56 = vsel %vm3141_vm11, %v3138_v55, %v3034_v13  ;;  %v3124_v11 = vsel %vm1882_vm4, %v3116_v26, %v2968_v1 }
 0x308   : > { %v3156_v9 = vsel %vm3150_vm12, %v3147_v56, %v3062_v33  ;;  %v3132_v52 = vsel %vm1904_vm6, %v3124_v11, %v2996_v16 }
 0x309   : > { %v3036_v47 = vpop.permute.xlu1 %3035 }
 0x30b   : > { %v3082_v63 = vpop.permute.xlu0 %3081 }
 0x30c   : > { %v3165_v42 = vsel %vm3159_vm2, %v3156_v9, %v3082_v63 }
 0x30d   : > { %v3064_v60 = vpop.permute.xlu1 %3063 }
 0x30f   : > { %v3102_v0 = vpop.permute.xlu0 %3101 }
 0x310   : > { %v3174_v35 = vsel %vm3168_vm5, %v3165_v42, %v3102_v0 }
 0x311   : > { %v3016_v57 = vpop.permute.xlu1 %3015  ;;  %3758 = vmatprep.mubr.msk.bf16.mxu1 %vm3213_vm7, %v3174_v35 }
 0x312   : > { %v3140_v27 = vsel %vm1926_vm8, %v3132_v52, %v3016_v57 }
 0x313   : > { %v3149_v53 = vsel %vm3141_vm11, %v3140_v27, %v3036_v47 }
 0x314   : > { %v3158_v48 = vsel %vm3150_vm12, %v3149_v53, %v3064_v60 }
 0x315   : > { %v3084_v45 = vpop.permute.xlu1 %3083 }
 0x316   : > { %v3167_v10 = vsel %vm3159_vm2, %v3158_v48, %v3084_v45 }
 0x319   : > { %v3104_v46 = vpop.permute.xlu1 %3103 }
 0x31a   : > { %v3176_v31 = vsel %vm3168_vm5, %v3167_v10, %v3104_v46 }
 0x31b   : > { %3759 = vmatmul.mubr.msk.bf16.gmra.mrb[4].mxu1 %vm3213_vm7, %v3176_v31 }
 0x3c4   : > { %v3756_v61 = vpop.f32.mrb[0].mxu1 }
 0x3c5   : > { %v3300_v25 = vmul.f32 %v3756_v61, %v3668_v43  ;;  %v3260_v39 = vpop.f32.mrb[1].mxu1 }
 0x3c6   : > { %v3298_v22 = vmul.f32 %v3668_v43, %v3260_v39  ;;  %v3757_v59 = vpop.f32.mrb[2].mxu1 }
 0x3c7   : > { %v3315_v49 = vadd.f32 %v3669_v3, %v3300_v25  ;;  %v3301_v58 = vmul.f32 %v3757_v59, %v3668_v43  ;;  %v3263_v40 = vpop.f32.mrb[3].mxu1 }
 0x3c8   : > { %v3313_v30 = vadd.f32 %v3669_v3, %v3298_v22  ;;  %v3299_v38 = vmul.f32 %v3668_v43, %v3263_v40 }
 0x3c9   : > { %v3323_v6 = vmax.f32 %v3315_v49, 0.0  ;;  %v3316_v24 = vadd.f32 %v3669_v3, %v3301_v58 }
 0x3ca   : > { %v3321_v41 = vmax.f32 %v3313_v30, 0.0  ;;  %v3314_v50 = vadd.f32 %v3669_v3, %v3299_v38 }
 0x3cb   : > { %3331 = vst.msk [vmem:[%s463_s22 + $0x10] sm:$0xff] %vm1860_vm0, %v3323_v6  ;;  %v3324_v34 = vmax.f32 %v3316_v24, 0.0 }
 0x3cc   : > { %3329 = vst.msk [vmem:[%s463_s22] sm:$0xff] %vm1860_vm0, %v3321_v41  ;;  %v3322_v12 = vmax.f32 %v3314_v50, 0.0 }
 0x3cd   : > { %3332 = vst.msk [vmem:[%s463_s22 + $0x18] sm:$0xff] %vm1860_vm0, %v3324_v34 }
 0x3ce   : > { %3330 = vst.msk [vmem:[%s463_s22 + $0x8] sm:$0xff] %vm1860_vm0, %v3322_v12 }
 0x3ee   : > { %v3760_v44 = vpop.f32.mrb[4].mxu1 }
 0x3ef   : > { %v3304_v28 = vmul.f32 %v3760_v44, %v3668_v43  ;;  %v3276_v7 = vpop.f32.mrb[5].mxu1 }
 0x3f0   : > { %v3302_v23 = vmul.f32 %v3668_v43, %v3276_v7  ;;  %v3761_v51 = vpop.f32.mrb[6].mxu1 }
 0x3f1   : > { %v3319_v32 = vadd.f32 %v3669_v3, %v3304_v28  ;;  %v3305_v37 = vmul.f32 %v3761_v51, %v3668_v43  ;;  %v3279_v54 = vpop.f32.mrb[7].mxu1 }
 0x3f2   : > { %v3317_v5 = vadd.f32 %v3669_v3, %v3302_v23  ;;  %v3303_v4 = vmul.f32 %v3668_v43, %v3279_v54 }
 0x3f3   : > { %v3327_v18 = vmax.f32 %v3319_v32, 0.0  ;;  %v3320_v21 = vadd.f32 %v3669_v3, %v3305_v37 }
 0x3f4   : > { %v3325_v2 = vmax.f32 %v3317_v5, 0.0  ;;  %v3318_v8 = vadd.f32 %v3669_v3, %v3303_v4 }
 0x3f5   : > { %3335 = vst.msk [vmem:[%s463_s22 + $0x30] sm:$0xff] %vm1860_vm0, %v3327_v18  ;;  %v3328_v36 = vmax.f32 %v3320_v21, 0.0 }
 0x3f6   : > { %3333 = vst.msk [vmem:[%s463_s22 + $0x20] sm:$0xff] %vm1860_vm0, %v3325_v2  ;;  %v3326_v62 = vmax.f32 %v3318_v8, 0.0 }
 0x3f7   : > { %3336 = vst.msk [vmem:[%s463_s22 + $0x38] sm:$0xff] %vm1860_vm0, %v3328_v36 }
 0x3f8   : > { %3334 = vst.msk [vmem:[%s463_s22 + $0x28] sm:$0xff] %vm1860_vm0, %v3326_v62 }
 0x3f9   : > { %3887 = shalt.err (!%p3884_p5)
}
 0x3fa   : > { %s3888_s14 = scalar_lea.hbm %s5366_s21, 1024  ;;  %s3892_s24 = scalar_lea.hbm %s5431_s9, 2048 }
 0x3fb   : > { %p3889_p6 = scmp.ne.s32.totalorder %s5366_s21, %s3888_s14  ;;  %p3893_p10 = scmp.lt.u32.totalorder %s5366_s21, %s5431_s9 }
 0x3fc   : > { %p3894_p11 = scmp.lt.u32.totalorder %s3892_s24, %s3888_s14  ;;  %p3896_p13 = scmp.lt.u32.totalorder %s3888_s14, %s5366_s21 }
 0x3fd   : > { %p3890_p7 = pnand %p3889_p6, %p4062_p4 }
 0x3fe   : > { %p3895_p12 = por %p3894_p11, %p3893_p10 }
 0x3ff   : > { %p3891_p9 = pneg %p3890_p7 }
 0x400   : > { %p3897_p0 = por %p3896_p13, %p3895_p12 }
 0x402   : > { %p3898_p1 = pnand %p3897_p0, %p3891_p9 }
 0x404   : > { %3901 = shalt.err (!%p3898_p1)
}
 0x405   : > { %s3971_s23 = smov 128  }
 0x406   : > { %3763 = dma.vmem_to_hbm [thread:$0]  (%p4062_p4), %s5369_s25, 1024, %s5366_s21, %s5375_s10, %s3971_s23, %s3971_s23, %s3956_s1  }
 0x407 PF: > { %p3769_p2 = scmp.ge.s32.totalorder %s3952_s12, 2  ;;  %s3368_s2 = sand.u32 1, %s3932_s28  }
 0x408   : > { %s3369_s27 = scalar_lea.sflag [#allocation5], %s3368_s2 }
 0x409   : > { %p3766_p3 = pnand %p3769_p2, %p4069_p8 }
 0x40b   : > { %3927 = dma.done.wait (!%p3766_p3), %s3369_s27, 1024  }
 0x40c   : > { %3929 = vsyncadd (!%p3766_p3), %s3369_s27, 4294966272  ;;  %s22_s12 = sadd.s32 1, %s3952_s12   ;;  %s5486_s28 = smov %s3936_s29 }
 0x40d   : > { %p19_p5 = scmp.ge.s32.totalorder %s22_s12, 4   ;;  %s5487_s29 = smov %s3940_s30 }
 0x40e   : > { %s5488_s30 = smov %s4075_s20  ;;  %s5489_s10 = smov %s3948_s11 }
 0x40f   : > { %s5490_s11 = smov %s5492_s15  ;;  %21 = sbr.rel (!%p19_p5) target bundleno = 4 (0x4), region = 107 }
 0x416   :  { %3374 = vsyncpa [#allocation5], 1 }
 0x417   :  { %3376 = vsyncpa [#allocation5 + $0x1], 1 }

</bundles_post_ra>
